<compile_context>
chip_gen: v6e
topology: v6e:2x2x1
jax: 0.10.0
libtpu: 0.0.40
codegen_flags: <defaults>
</compile_context>

<pallas_src>
import functools

import numpy as np

import jax
import jax.numpy as jnp
from jax import lax
from jax.experimental import pallas as pl
from jax.experimental.pallas import tpu as pltpu


# ----------------------------------------------------------------------------
# Fused Pallas kernel
# ----------------------------------------------------------------------------
def _encoder_kernel(x_ref,
                    w1_ref, b1_ref,
                    w2_ref, b2_ref,
                    w3_ref, b3_ref,
                    w4_ref, b4_ref,
                    o_ref,
                    *, geom):
    """Fully fused Encoder forward.

    x_ref : (H0, B, W0*C0)            input rows.
    wX_ref: (KH, W_in*Cin, OW*Cout)   banded per-height-tap conv weights.
    bX_ref: (1, OW*Cout)              bias pre-tiled over output width.
    o_ref : (B, Cout4)                final sigmoid output (1x1 spatial).
    """
    conv_geoms, (p_oh, p_ow, p_c) = geom

    def conv_layer(prev_rows, band_ref, bias_ref, out_h, stride, act):
        kh = band_ref.shape[0]
        taps = [band_ref[i] for i in range(kh)]     # (K, N) each, loaded once
        bias = bias_ref[...]                        # (1, N)
        rows = []
        for r in range(out_h):
            acc = bias
            for i in range(kh):                     # contiguous input rows
                acc = acc + jnp.dot(prev_rows[stride * r + i], taps[i],
                                    preferred_element_type=jnp.float32)
            if act == "relu":
                acc = jnp.maximum(acc, 0.0)
            elif act == "sigmoid":
                acc = 1.0 / (1.0 + jnp.exp(-acc))   # exp / divide -> EUP
            rows.append(acc)
        return rows

    # Input rows: contiguous leading-dim reads of the VMEM-resident input.
    h0 = [x_ref[h] for h in range(x_ref.shape[0])]

    (oh1, s1), (oh2, s2), (oh3, s3), (oh4, s4) = conv_geoms
    h1 = conv_layer(h0, w1_ref, b1_ref, oh1, s1, "relu")
    h2 = conv_layer(h1, w2_ref, b2_ref, oh2, s2, "relu")
    h3 = conv_layer(h2, w3_ref, b3_ref, oh3, s3, "relu")

    # 3x3 stride-1 max pool: max over 3 contiguous rows x 3 channel-block
    # (lane) shifts of each (B, OW*C) row.
    pooled = []
    for r in range(p_oh):
        m = None
        for i in range(3):
            row = h3[r + i]
            for j in range(3):
                seg = row[:, j * p_c:(j + p_ow) * p_c]
                m = seg if m is None else jnp.maximum(m, seg)
        pooled.append(m)

    h4 = conv_layer(pooled, w4_ref, b4_ref, oh4, s4, "sigmoid")
    o_ref[...] = h4[0].astype(o_ref.dtype)


# ----------------------------------------------------------------------------
# Host-side operand preparation (exact, gather/mask only -- no matmul rounding)
# ----------------------------------------------------------------------------
def _band_operands(w_oihw, bias, w_in, stride):
    """Fold width taps + width stride of a KHxKW conv into per-height-tap
    banded matrices so the in-kernel access pattern is a contiguous row
    slice followed by a single lane-dense matmul.

    band[i, w*Cin+ci, ow*Cout+co] = weight[co, ci, i, w - stride*ow]
                                    (0 outside the band)
    """
    cout, cin, kh, kw = w_oihw.shape
    ow = (w_in - kw) // stride + 1
    wt = jnp.transpose(w_oihw, (2, 3, 1, 0))                    # (KH, KW, Cin, Cout)
    j = np.arange(w_in)[:, None] - stride * np.arange(ow)[None, :]   # (w_in, OW)
    valid = ((j >= 0) & (j < kw)).astype(np.float32)
    j_clip = np.clip(j, 0, kw - 1)
    band = wt[:, j_clip, :, :]                                  # (KH, w_in, OW, Cin, Cout)
    band = band * jnp.asarray(valid)[None, :, :, None, None]
    band = jnp.transpose(band, (0, 1, 3, 2, 4)).reshape(kh, w_in * cin, ow * cout)
    bias_row = jnp.tile(bias, ow).reshape(1, ow * cout)
    return band, bias_row, ow


def encoder_forward(params, x_nchw):
    b, c, h, w = x_nchw.shape
    # NCHW -> (H, B, W*C) "row" layout used inside the fused kernel.
    x_rows = jnp.transpose(x_nchw, (2, 0, 3, 1)).reshape(h, b, w * c)
    x_rows = x_rows.astype(jnp.float32)

    operands = [x_rows]
    conv_geoms = []

    # conv1..conv3 (+ReLU)
    for name, stride in (("conv1", 1), ("conv2", 2), ("conv3", 2)):
        wgt, bia = params[name]
        band, bias_row, ow = _band_operands(wgt, bia, w, stride)
        oh = (h - wgt.shape[2]) // stride + 1
        operands += [band, bias_row]
        conv_geoms.append((oh, stride))
        h, w, c = oh, ow, wgt.shape[0]

    # 3x3 stride-1 max pool geometry
    pool_geom = (h - 2, w - 2, c)
    h, w = pool_geom[0], pool_geom[1]

    # conv4 (+Sigmoid)
    wgt4, bia4 = params["conv4"]
    band4, bias_row4, _ = _band_operands(wgt4, bia4, w, 1)
    oh4 = (h - wgt4.shape[2]) + 1
    operands += [band4, bias_row4]
    conv_geoms.append((oh4, 1))
    cout4 = wgt4.shape[0]

    geom = (tuple(conv_geoms), pool_geom)

    out2d = pl.pallas_call(
        functools.partial(_encoder_kernel, geom=geom),
        out_shape=jax.ShapeDtypeStruct((b, cout4), jnp.float32),
        compiler_params=pltpu.CompilerParams(vmem_limit_bytes=32 * 1024 * 1024),
    )(*operands)

    # 1x1 spatial output: NHWC == NCHW here, so this reshape is free.
    return out2d.reshape(b, cout4, 1, 1)


# ----------------------------------------------------------------------------
# Deterministic parameter init (PyTorch-style uniform fan-in bounds)
# ----------------------------------------------------------------------------
def init_params(key):
    def conv_param(k, cout, cin, ksz):
        kw, kb = jax.random.split(k)
        fan_in = cin * ksz * ksz
        bound = 1.0 / (fan_in ** 0.5)
        wgt = jax.random.uniform(kw, (cout, cin, ksz, ksz), jnp.float32, -bound, bound)
        bia = jax.random.uniform(kb, (cout,), jnp.float32, -bound, bound)
        return wgt, bia

    k1, k2, k3, k4 = jax.random.split(key, 4)
    return {
        "conv1": conv_param(k1, 4, 1, 3),
        "conv2": conv_param(k2, 8, 4, 3),
        "conv3": conv_param(k3, 16, 8, 3),
        "conv4": conv_param(k4, 32, 16, 3),
    }


# ----------------------------------------------------------------------------
# Pure-JAX reference (lax conv / reduce_window) for a correctness check
# ----------------------------------------------------------------------------
def encoder_reference(params, x_nchw):
    def conv(x, wgt, bia, stride, act):
        y = lax.conv_general_dilated(
            x, wgt, window_strides=(stride, stride), padding="VALID",
            dimension_numbers=("NCHW", "OIHW", "NCHW"))
        y = y + bia.reshape(1, -1, 1, 1)
        if act == "relu":
            return jnp.maximum(y, 0.0)
        return 1.0 / (1.0 + jnp.exp(-y))

    w1, b1 = params["conv1"]
    w2, b2 = params["conv2"]
    w3, b3 = params["conv3"]
    w4, b4 = params["conv4"]
    y = conv(x_nchw, w1, b1, 1, "relu")
    y = conv(y, w2, b2, 2, "relu")
    y = conv(y, w3, b3, 2, "relu")
    y = lax.reduce_window(y, -jnp.inf, lax.max,
                          window_dimensions=(1, 1, 3, 3),
                          window_strides=(1, 1, 1, 1), padding="VALID")
    y = conv(y, w4, b4, 1, "sigmoid")
    return y


if __name__ == "__main__":
    key = jax.random.PRNGKey(0)
    kp, kx = jax.random.split(key)
    params = init_params(kp)

    # Input: (B=2, C=1, H=28, W=28) -- smallest natural size for this stack
    # (two stride-2 convs followed by a 3x3 pool and a 3x3 conv need >= 28).
    x = jax.random.normal(kx, (2, 1, 28, 28), dtype=jnp.float32)

    fwd = jax.jit(encoder_forward)
    out = jax.block_until_ready(fwd(params, x))
    assert out.shape == (2, 32, 1, 1), out.shape

    ref = jax.block_until_ready(encoder_reference(params, x))
    max_err = float(jnp.max(jnp.abs(out - ref)))
    assert jnp.allclose(out, ref, atol=3e-5, rtol=3e-5), max_err

    print("KERNEL_OK")
</pallas_src>

<mosaic_0001>
module attributes {stable_mosaic.version = 11 : i64} {
  func.func @_encoder_kernel(%arg0: memref<28x2x28xf32, #tpu.memory_space<vmem>>, %arg1: memref<3x28x104xf32, #tpu.memory_space<vmem>>, %arg2: memref<1x104xf32, #tpu.memory_space<vmem>>, %arg3: memref<3x104x96xf32, #tpu.memory_space<vmem>>, %arg4: memref<1x96xf32, #tpu.memory_space<vmem>>, %arg5: memref<3x96x80xf32, #tpu.memory_space<vmem>>, %arg6: memref<1x80xf32, #tpu.memory_space<vmem>>, %arg7: memref<3x48x32xf32, #tpu.memory_space<vmem>>, %arg8: memref<1x32xf32, #tpu.memory_space<vmem>>, %arg9: memref<2x32xf32, #tpu.memory_space<vmem>>) attributes {dimension_semantics = [], scalar_prefetch = 0 : i64, scratch_operands = 0 : i64, tpu.core_type = #tpu.core_type<tc>} {
    %c0 = arith.constant 0 : index
    %c0_0 = arith.constant 0 : index
    %c0_1 = arith.constant 0 : index
    %0 = vector.load %arg0[%c0, %c0_0, %c0_1] : memref<28x2x28xf32, #tpu.memory_space<vmem>>, vector<1x2x28xf32>
    %1 = vector.shape_cast %0 : vector<1x2x28xf32> to vector<2x28xf32>
    %c1 = arith.constant 1 : index
    %c0_2 = arith.constant 0 : index
    %c0_3 = arith.constant 0 : index
    %2 = vector.load %arg0[%c1, %c0_2, %c0_3] : memref<28x2x28xf32, #tpu.memory_space<vmem>>, vector<1x2x28xf32>
    %3 = vector.shape_cast %2 : vector<1x2x28xf32> to vector<2x28xf32>
    %c2 = arith.constant 2 : index
    %c0_4 = arith.constant 0 : index
    %c0_5 = arith.constant 0 : index
    %4 = vector.load %arg0[%c2, %c0_4, %c0_5] : memref<28x2x28xf32, #tpu.memory_space<vmem>>, vector<1x2x28xf32>
    %5 = vector.shape_cast %4 : vector<1x2x28xf32> to vector<2x28xf32>
    %c3 = arith.constant 3 : index
    %c0_6 = arith.constant 0 : index
    %c0_7 = arith.constant 0 : index
    %6 = vector.load %arg0[%c3, %c0_6, %c0_7] : memref<28x2x28xf32, #tpu.memory_space<vmem>>, vector<1x2x28xf32>
    %7 = vector.shape_cast %6 : vector<1x2x28xf32> to vector<2x28xf32>
    %c4 = arith.constant 4 : index
    %c0_8 = arith.constant 0 : index
    %c0_9 = arith.constant 0 : index
    %8 = vector.load %arg0[%c4, %c0_8, %c0_9] : memref<28x2x28xf32, #tpu.memory_space<vmem>>, vector<1x2x28xf32>
    %9 = vector.shape_cast %8 : vector<1x2x28xf32> to vector<2x28xf32>
    %c5 = arith.constant 5 : index
    %c0_10 = arith.constant 0 : index
    %c0_11 = arith.constant 0 : index
    %10 = vector.load %arg0[%c5, %c0_10, %c0_11] : memref<28x2x28xf32, #tpu.memory_space<vmem>>, vector<1x2x28xf32>
    %11 = vector.shape_cast %10 : vector<1x2x28xf32> to vector<2x28xf32>
    %c6 = arith.constant 6 : index
    %c0_12 = arith.constant 0 : index
    %c0_13 = arith.constant 0 : index
    %12 = vector.load %arg0[%c6, %c0_12, %c0_13] : memref<28x2x28xf32, #tpu.memory_space<vmem>>, vector<1x2x28xf32>
    %13 = vector.shape_cast %12 : vector<1x2x28xf32> to vector<2x28xf32>
    %c7 = arith.constant 7 : index
    %c0_14 = arith.constant 0 : index
    %c0_15 = arith.constant 0 : index
    %14 = vector.load %arg0[%c7, %c0_14, %c0_15] : memref<28x2x28xf32, #tpu.memory_space<vmem>>, vector<1x2x28xf32>
    %15 = vector.shape_cast %14 : vector<1x2x28xf32> to vector<2x28xf32>
    %c8 = arith.constant 8 : index
    %c0_16 = arith.constant 0 : index
    %c0_17 = arith.constant 0 : index
    %16 = vector.load %arg0[%c8, %c0_16, %c0_17] : memref<28x2x28xf32, #tpu.memory_space<vmem>>, vector<1x2x28xf32>
    %17 = vector.shape_cast %16 : vector<1x2x28xf32> to vector<2x28xf32>
    %c9 = arith.constant 9 : index
    %c0_18 = arith.constant 0 : index
    %c0_19 = arith.constant 0 : index
    %18 = vector.load %arg0[%c9, %c0_18, %c0_19] : memref<28x2x28xf32, #tpu.memory_space<vmem>>, vector<1x2x28xf32>
    %19 = vector.shape_cast %18 : vector<1x2x28xf32> to vector<2x28xf32>
    %c10 = arith.constant 10 : index
    %c0_20 = arith.constant 0 : index
    %c0_21 = arith.constant 0 : index
    %20 = vector.load %arg0[%c10, %c0_20, %c0_21] : memref<28x2x28xf32, #tpu.memory_space<vmem>>, vector<1x2x28xf32>
    %21 = vector.shape_cast %20 : vector<1x2x28xf32> to vector<2x28xf32>
    %c11 = arith.constant 11 : index
    %c0_22 = arith.constant 0 : index
    %c0_23 = arith.constant 0 : index
    %22 = vector.load %arg0[%c11, %c0_22, %c0_23] : memref<28x2x28xf32, #tpu.memory_space<vmem>>, vector<1x2x28xf32>
    %23 = vector.shape_cast %22 : vector<1x2x28xf32> to vector<2x28xf32>
    %c12 = arith.constant 12 : index
    %c0_24 = arith.constant 0 : index
    %c0_25 = arith.constant 0 : index
    %24 = vector.load %arg0[%c12, %c0_24, %c0_25] : memref<28x2x28xf32, #tpu.memory_space<vmem>>, vector<1x2x28xf32>
    %25 = vector.shape_cast %24 : vector<1x2x28xf32> to vector<2x28xf32>
    %c13 = arith.constant 13 : index
    %c0_26 = arith.constant 0 : index
    %c0_27 = arith.constant 0 : index
    %26 = vector.load %arg0[%c13, %c0_26, %c0_27] : memref<28x2x28xf32, #tpu.memory_space<vmem>>, vector<1x2x28xf32>
    %27 = vector.shape_cast %26 : vector<1x2x28xf32> to vector<2x28xf32>
    %c14 = arith.constant 14 : index
    %c0_28 = arith.constant 0 : index
    %c0_29 = arith.constant 0 : index
    %28 = vector.load %arg0[%c14, %c0_28, %c0_29] : memref<28x2x28xf32, #tpu.memory_space<vmem>>, vector<1x2x28xf32>
    %29 = vector.shape_cast %28 : vector<1x2x28xf32> to vector<2x28xf32>
    %c15 = arith.constant 15 : index
    %c0_30 = arith.constant 0 : index
    %c0_31 = arith.constant 0 : index
    %30 = vector.load %arg0[%c15, %c0_30, %c0_31] : memref<28x2x28xf32, #tpu.memory_space<vmem>>, vector<1x2x28xf32>
    %31 = vector.shape_cast %30 : vector<1x2x28xf32> to vector<2x28xf32>
    %c16 = arith.constant 16 : index
    %c0_32 = arith.constant 0 : index
    %c0_33 = arith.constant 0 : index
    %32 = vector.load %arg0[%c16, %c0_32, %c0_33] : memref<28x2x28xf32, #tpu.memory_space<vmem>>, vector<1x2x28xf32>
    %33 = vector.shape_cast %32 : vector<1x2x28xf32> to vector<2x28xf32>
    %c17 = arith.constant 17 : index
    %c0_34 = arith.constant 0 : index
    %c0_35 = arith.constant 0 : index
    %34 = vector.load %arg0[%c17, %c0_34, %c0_35] : memref<28x2x28xf32, #tpu.memory_space<vmem>>, vector<1x2x28xf32>
    %35 = vector.shape_cast %34 : vector<1x2x28xf32> to vector<2x28xf32>
    %c18 = arith.constant 18 : index
    %c0_36 = arith.constant 0 : index
    %c0_37 = arith.constant 0 : index
    %36 = vector.load %arg0[%c18, %c0_36, %c0_37] : memref<28x2x28xf32, #tpu.memory_space<vmem>>, vector<1x2x28xf32>
    %37 = vector.shape_cast %36 : vector<1x2x28xf32> to vector<2x28xf32>
    %c19 = arith.constant 19 : index
    %c0_38 = arith.constant 0 : index
    %c0_39 = arith.constant 0 : index
    %38 = vector.load %arg0[%c19, %c0_38, %c0_39] : memref<28x2x28xf32, #tpu.memory_space<vmem>>, vector<1x2x28xf32>
    %39 = vector.shape_cast %38 : vector<1x2x28xf32> to vector<2x28xf32>
    %c20 = arith.constant 20 : index
    %c0_40 = arith.constant 0 : index
    %c0_41 = arith.constant 0 : index
    %40 = vector.load %arg0[%c20, %c0_40, %c0_41] : memref<28x2x28xf32, #tpu.memory_space<vmem>>, vector<1x2x28xf32>
    %41 = vector.shape_cast %40 : vector<1x2x28xf32> to vector<2x28xf32>
    %c21 = arith.constant 21 : index
    %c0_42 = arith.constant 0 : index
    %c0_43 = arith.constant 0 : index
    %42 = vector.load %arg0[%c21, %c0_42, %c0_43] : memref<28x2x28xf32, #tpu.memory_space<vmem>>, vector<1x2x28xf32>
    %43 = vector.shape_cast %42 : vector<1x2x28xf32> to vector<2x28xf32>
    %c22 = arith.constant 22 : index
    %c0_44 = arith.constant 0 : index
    %c0_45 = arith.constant 0 : index
    %44 = vector.load %arg0[%c22, %c0_44, %c0_45] : memref<28x2x28xf32, #tpu.memory_space<vmem>>, vector<1x2x28xf32>
    %45 = vector.shape_cast %44 : vector<1x2x28xf32> to vector<2x28xf32>
    %c23 = arith.constant 23 : index
    %c0_46 = arith.constant 0 : index
    %c0_47 = arith.constant 0 : index
    %46 = vector.load %arg0[%c23, %c0_46, %c0_47] : memref<28x2x28xf32, #tpu.memory_space<vmem>>, vector<1x2x28xf32>
    %47 = vector.shape_cast %46 : vector<1x2x28xf32> to vector<2x28xf32>
    %c24 = arith.constant 24 : index
    %c0_48 = arith.constant 0 : index
    %c0_49 = arith.constant 0 : index
    %48 = vector.load %arg0[%c24, %c0_48, %c0_49] : memref<28x2x28xf32, #tpu.memory_space<vmem>>, vector<1x2x28xf32>
    %49 = vector.shape_cast %48 : vector<1x2x28xf32> to vector<2x28xf32>
    %c0_50 = arith.constant 0 : index
    %c0_51 = arith.constant 0 : index
    %c0_52 = arith.constant 0 : index
    %50 = vector.load %arg1[%c0_50, %c0_51, %c0_52] : memref<3x28x104xf32, #tpu.memory_space<vmem>>, vector<1x28x104xf32>
    %51 = vector.shape_cast %50 : vector<1x28x104xf32> to vector<28x104xf32>
    %c1_53 = arith.constant 1 : index
    %c0_54 = arith.constant 0 : index
    %c0_55 = arith.constant 0 : index
    %52 = vector.load %arg1[%c1_53, %c0_54, %c0_55] : memref<3x28x104xf32, #tpu.memory_space<vmem>>, vector<1x28x104xf32>
    %53 = vector.shape_cast %52 : vector<1x28x104xf32> to vector<28x104xf32>
    %c2_56 = arith.constant 2 : index
    %c0_57 = arith.constant 0 : index
    %c0_58 = arith.constant 0 : index
    %54 = vector.load %arg1[%c2_56, %c0_57, %c0_58] : memref<3x28x104xf32, #tpu.memory_space<vmem>>, vector<1x28x104xf32>
    %55 = vector.shape_cast %54 : vector<1x28x104xf32> to vector<28x104xf32>
    %c0_59 = arith.constant 0 : index
    %c0_60 = arith.constant 0 : index
    %56 = vector.load %arg2[%c0_59, %c0_60] : memref<1x104xf32, #tpu.memory_space<vmem>>, vector<1x104xf32>
    %cst = arith.constant dense<0.000000e+00> : vector<2x104xf32>
    %57 = tpu.matmul %1, %51, %cst {dimension_numbers = #tpu.dot_dimension_numbers<[1], [0], [0], [1], [0, 0, 1, 1], [], []>} : vector<2x28xf32>, vector<28x104xf32>, vector<2x104xf32> -> vector<2x104xf32>
    %58 = vector.broadcast %56 : vector<1x104xf32> to vector<2x104xf32>
    %59 = arith.addf %58, %57 : vector<2x104xf32>
    %cst_61 = arith.constant dense<0.000000e+00> : vector<2x104xf32>
    %60 = tpu.matmul %3, %53, %cst_61 {dimension_numbers = #tpu.dot_dimension_numbers<[1], [0], [0], [1], [0, 0, 1, 1], [], []>} : vector<2x28xf32>, vector<28x104xf32>, vector<2x104xf32> -> vector<2x104xf32>
    %61 = arith.addf %59, %60 : vector<2x104xf32>
    %cst_62 = arith.constant dense<0.000000e+00> : vector<2x104xf32>
    %62 = tpu.matmul %5, %55, %cst_62 {dimension_numbers = #tpu.dot_dimension_numbers<[1], [0], [0], [1], [0, 0, 1, 1], [], []>} : vector<2x28xf32>, vector<28x104xf32>, vector<2x104xf32> -> vector<2x104xf32>
    %63 = arith.addf %61, %62 : vector<2x104xf32>
    %cst_63 = arith.constant 0.000000e+00 : f32
    %64 = vector.broadcast %cst_63 : f32 to vector<2x104xf32>
    %65 = arith.maximumf %63, %64 : vector<2x104xf32>
    %cst_64 = arith.constant dense<0.000000e+00> : vector<2x104xf32>
    %66 = tpu.matmul %3, %51, %cst_64 {dimension_numbers = #tpu.dot_dimension_numbers<[1], [0], [0], [1], [0, 0, 1, 1], [], []>} : vector<2x28xf32>, vector<28x104xf32>, vector<2x104xf32> -> vector<2x104xf32>
    %67 = vector.broadcast %56 : vector<1x104xf32> to vector<2x104xf32>
    %68 = arith.addf %67, %66 : vector<2x104xf32>
    %cst_65 = arith.constant dense<0.000000e+00> : vector<2x104xf32>
    %69 = tpu.matmul %5, %53, %cst_65 {dimension_numbers = #tpu.dot_dimension_numbers<[1], [0], [0], [1], [0, 0, 1, 1], [], []>} : vector<2x28xf32>, vector<28x104xf32>, vector<2x104xf32> -> vector<2x104xf32>
    %70 = arith.addf %68, %69 : vector<2x104xf32>
    %cst_66 = arith.constant dense<0.000000e+00> : vector<2x104xf32>
    %71 = tpu.matmul %7, %55, %cst_66 {dimension_numbers = #tpu.dot_dimension_numbers<[1], [0], [0], [1], [0, 0, 1, 1], [], []>} : vector<2x28xf32>, vector<28x104xf32>, vector<2x104xf32> -> vector<2x104xf32>
    %72 = arith.addf %70, %71 : vector<2x104xf32>
    %cst_67 = arith.constant 0.000000e+00 : f32
    %73 = vector.broadcast %cst_67 : f32 to vector<2x104xf32>
    %74 = arith.maximumf %72, %73 : vector<2x104xf32>
    %cst_68 = arith.constant dense<0.000000e+00> : vector<2x104xf32>
    %75 = tpu.matmul %5, %51, %cst_68 {dimension_numbers = #tpu.dot_dimension_numbers<[1], [0], [0], [1], [0, 0, 1, 1], [], []>} : vector<2x28xf32>, vector<28x104xf32>, vector<2x104xf32> -> vector<2x104xf32>
    %76 = vector.broadcast %56 : vector<1x104xf32> to vector<2x104xf32>
    %77 = arith.addf %76, %75 : vector<2x104xf32>
    %cst_69 = arith.constant dense<0.000000e+00> : vector<2x104xf32>
    %78 = tpu.matmul %7, %53, %cst_69 {dimension_numbers = #tpu.dot_dimension_numbers<[1], [0], [0], [1], [0, 0, 1, 1], [], []>} : vector<2x28xf32>, vector<28x104xf32>, vector<2x104xf32> -> vector<2x104xf32>
    %79 = arith.addf %77, %78 : vector<2x104xf32>
    %cst_70 = arith.constant dense<0.000000e+00> : vector<2x104xf32>
    %80 = tpu.matmul %9, %55, %cst_70 {dimension_numbers = #tpu.dot_dimension_numbers<[1], [0], [0], [1], [0, 0, 1, 1], [], []>} : vector<2x28xf32>, vector<28x104xf32>, vector<2x104xf32> -> vector<2x104xf32>
    %81 = arith.addf %79, %80 : vector<2x104xf32>
    %cst_71 = arith.constant 0.000000e+00 : f32
    %82 = vector.broadcast %cst_71 : f32 to vector<2x104xf32>
    %83 = arith.maximumf %81, %82 : vector<2x104xf32>
    %cst_72 = arith.constant dense<0.000000e+00> : vector<2x104xf32>
    %84 = tpu.matmul %7, %51, %cst_72 {dimension_numbers = #tpu.dot_dimension_numbers<[1], [0], [0], [1], [0, 0, 1, 1], [], []>} : vector<2x28xf32>, vector<28x104xf32>, vector<2x104xf32> -> vector<2x104xf32>
    %85 = vector.broadcast %56 : vector<1x104xf32> to vector<2x104xf32>
    %86 = arith.addf %85, %84 : vector<2x104xf32>
    %cst_73 = arith.constant dense<0.000000e+00> : vector<2x104xf32>
    %87 = tpu.matmul %9, %53, %cst_73 {dimension_numbers = #tpu.dot_dimension_numbers<[1], [0], [0], [1], [0, 0, 1, 1], [], []>} : vector<2x28xf32>, vector<28x104xf32>, vector<2x104xf32> -> vector<2x104xf32>
    %88 = arith.addf %86, %87 : vector<2x104xf32>
    %cst_74 = arith.constant dense<0.000000e+00> : vector<2x104xf32>
    %89 = tpu.matmul %11, %55, %cst_74 {dimension_numbers = #tpu.dot_dimension_numbers<[1], [0], [0], [1], [0, 0, 1, 1], [], []>} : vector<2x28xf32>, vector<28x104xf32>, vector<2x104xf32> -> vector<2x104xf32>
    %90 = arith.addf %88, %89 : vector<2x104xf32>
    %cst_75 = arith.constant 0.000000e+00 : f32
    %91 = vector.broadcast %cst_75 : f32 to vector<2x104xf32>
    %92 = arith.maximumf %90, %91 : vector<2x104xf32>
    %cst_76 = arith.constant dense<0.000000e+00> : vector<2x104xf32>
    %93 = tpu.matmul %9, %51, %cst_76 {dimension_numbers = #tpu.dot_dimension_numbers<[1], [0], [0], [1], [0, 0, 1, 1], [], []>} : vector<2x28xf32>, vector<28x104xf32>, vector<2x104xf32> -> vector<2x104xf32>
    %94 = vector.broadcast %56 : vector<1x104xf32> to vector<2x104xf32>
    %95 = arith.addf %94, %93 : vector<2x104xf32>
    %cst_77 = arith.constant dense<0.000000e+00> : vector<2x104xf32>
    %96 = tpu.matmul %11, %53, %cst_77 {dimension_numbers = #tpu.dot_dimension_numbers<[1], [0], [0], [1], [0, 0, 1, 1], [], []>} : vector<2x28xf32>, vector<28x104xf32>, vector<2x104xf32> -> vector<2x104xf32>
    %97 = arith.addf %95, %96 : vector<2x104xf32>
    %cst_78 = arith.constant dense<0.000000e+00> : vector<2x104xf32>
    %98 = tpu.matmul %13, %55, %cst_78 {dimension_numbers = #tpu.dot_dimension_numbers<[1], [0], [0], [1], [0, 0, 1, 1], [], []>} : vector<2x28xf32>, vector<28x104xf32>, vector<2x104xf32> -> vector<2x104xf32>
    %99 = arith.addf %97, %98 : vector<2x104xf32>
    %cst_79 = arith.constant 0.000000e+00 : f32
    %100 = vector.broadcast %cst_79 : f32 to vector<2x104xf32>
    %101 = arith.maximumf %99, %100 : vector<2x104xf32>
    %cst_80 = arith.constant dense<0.000000e+00> : vector<2x104xf32>
    %102 = tpu.matmul %11, %51, %cst_80 {dimension_numbers = #tpu.dot_dimension_numbers<[1], [0], [0], [1], [0, 0, 1, 1], [], []>} : vector<2x28xf32>, vector<28x104xf32>, vector<2x104xf32> -> vector<2x104xf32>
    %103 = vector.broadcast %56 : vector<1x104xf32> to vector<2x104xf32>
    %104 = arith.addf %103, %102 : vector<2x104xf32>
    %cst_81 = arith.constant dense<0.000000e+00> : vector<2x104xf32>
    %105 = tpu.matmul %13, %53, %cst_81 {dimension_numbers = #tpu.dot_dimension_numbers<[1], [0], [0], [1], [0, 0, 1, 1], [], []>} : vector<2x28xf32>, vector<28x104xf32>, vector<2x104xf32> -> vector<2x104xf32>
    %106 = arith.addf %104, %105 : vector<2x104xf32>
    %cst_82 = arith.constant dense<0.000000e+00> : vector<2x104xf32>
    %107 = tpu.matmul %15, %55, %cst_82 {dimension_numbers = #tpu.dot_dimension_numbers<[1], [0], [0], [1], [0, 0, 1, 1], [], []>} : vector<2x28xf32>, vector<28x104xf32>, vector<2x104xf32> -> vector<2x104xf32>
    %108 = arith.addf %106, %107 : vector<2x104xf32>
    %cst_83 = arith.constant 0.000000e+00 : f32
    %109 = vector.broadcast %cst_83 : f32 to vector<2x104xf32>
    %110 = arith.maximumf %108, %109 : vector<2x104xf32>
    %cst_84 = arith.constant dense<0.000000e+00> : vector<2x104xf32>
    %111 = tpu.matmul %13, %51, %cst_84 {dimension_numbers = #tpu.dot_dimension_numbers<[1], [0], [0], [1], [0, 0, 1, 1], [], []>} : vector<2x28xf32>, vector<28x104xf32>, vector<2x104xf32> -> vector<2x104xf32>
    %112 = vector.broadcast %56 : vector<1x104xf32> to vector<2x104xf32>
    %113 = arith.addf %112, %111 : vector<2x104xf32>
    %cst_85 = arith.constant dense<0.000000e+00> : vector<2x104xf32>
    %114 = tpu.matmul %15, %53, %cst_85 {dimension_numbers = #tpu.dot_dimension_numbers<[1], [0], [0], [1], [0, 0, 1, 1], [], []>} : vector<2x28xf32>, vector<28x104xf32>, vector<2x104xf32> -> vector<2x104xf32>
    %115 = arith.addf %113, %114 : vector<2x104xf32>
    %cst_86 = arith.constant dense<0.000000e+00> : vector<2x104xf32>
    %116 = tpu.matmul %17, %55, %cst_86 {dimension_numbers = #tpu.dot_dimension_numbers<[1], [0], [0], [1], [0, 0, 1, 1], [], []>} : vector<2x28xf32>, vector<28x104xf32>, vector<2x104xf32> -> vector<2x104xf32>
    %117 = arith.addf %115, %116 : vector<2x104xf32>
    %cst_87 = arith.constant 0.000000e+00 : f32
    %118 = vector.broadcast %cst_87 : f32 to vector<2x104xf32>
    %119 = arith.maximumf %117, %118 : vector<2x104xf32>
    %cst_88 = arith.constant dense<0.000000e+00> : vector<2x104xf32>
    %120 = tpu.matmul %15, %51, %cst_88 {dimension_numbers = #tpu.dot_dimension_numbers<[1], [0], [0], [1], [0, 0, 1, 1], [], []>} : vector<2x28xf32>, vector<28x104xf32>, vector<2x104xf32> -> vector<2x104xf32>
    %121 = vector.broadcast %56 : vector<1x104xf32> to vector<2x104xf32>
    %122 = arith.addf %121, %120 : vector<2x104xf32>
    %cst_89 = arith.constant dense<0.000000e+00> : vector<2x104xf32>
    %123 = tpu.matmul %17, %53, %cst_89 {dimension_numbers = #tpu.dot_dimension_numbers<[1], [0], [0], [1], [0, 0, 1, 1], [], []>} : vector<2x28xf32>, vector<28x104xf32>, vector<2x104xf32> -> vector<2x104xf32>
    %124 = arith.addf %122, %123 : vector<2x104xf32>
    %cst_90 = arith.constant dense<0.000000e+00> : vector<2x104xf32>
    %125 = tpu.matmul %19, %55, %cst_90 {dimension_numbers = #tpu.dot_dimension_numbers<[1], [0], [0], [1], [0, 0, 1, 1], [], []>} : vector<2x28xf32>, vector<28x104xf32>, vector<2x104xf32> -> vector<2x104xf32>
    %126 = arith.addf %124, %125 : vector<2x104xf32>
    %cst_91 = arith.constant 0.000000e+00 : f32
    %127 = vector.broadcast %cst_91 : f32 to vector<2x104xf32>
    %128 = arith.maximumf %126, %127 : vector<2x104xf32>
    %cst_92 = arith.constant dense<0.000000e+00> : vector<2x104xf32>
    %129 = tpu.matmul %17, %51, %cst_92 {dimension_numbers = #tpu.dot_dimension_numbers<[1], [0], [0], [1], [0, 0, 1, 1], [], []>} : vector<2x28xf32>, vector<28x104xf32>, vector<2x104xf32> -> vector<2x104xf32>
    %130 = vector.broadcast %56 : vector<1x104xf32> to vector<2x104xf32>
    %131 = arith.addf %130, %129 : vector<2x104xf32>
    %cst_93 = arith.constant dense<0.000000e+00> : vector<2x104xf32>
    %132 = tpu.matmul %19, %53, %cst_93 {dimension_numbers = #tpu.dot_dimension_numbers<[1], [0], [0], [1], [0, 0, 1, 1], [], []>} : vector<2x28xf32>, vector<28x104xf32>, vector<2x104xf32> -> vector<2x104xf32>
    %133 = arith.addf %131, %132 : vector<2x104xf32>
    %cst_94 = arith.constant dense<0.000000e+00> : vector<2x104xf32>
    %134 = tpu.matmul %21, %55, %cst_94 {dimension_numbers = #tpu.dot_dimension_numbers<[1], [0], [0], [1], [0, 0, 1, 1], [], []>} : vector<2x28xf32>, vector<28x104xf32>, vector<2x104xf32> -> vector<2x104xf32>
    %135 = arith.addf %133, %134 : vector<2x104xf32>
    %cst_95 = arith.constant 0.000000e+00 : f32
    %136 = vector.broadcast %cst_95 : f32 to vector<2x104xf32>
    %137 = arith.maximumf %135, %136 : vector<2x104xf32>
    %cst_96 = arith.constant dense<0.000000e+00> : vector<2x104xf32>
    %138 = tpu.matmul %19, %51, %cst_96 {dimension_numbers = #tpu.dot_dimension_numbers<[1], [0], [0], [1], [0, 0, 1, 1], [], []>} : vector<2x28xf32>, vector<28x104xf32>, vector<2x104xf32> -> vector<2x104xf32>
    %139 = vector.broadcast %56 : vector<1x104xf32> to vector<2x104xf32>
    %140 = arith.addf %139, %138 : vector<2x104xf32>
    %cst_97 = arith.constant dense<0.000000e+00> : vector<2x104xf32>
    %141 = tpu.matmul %21, %53, %cst_97 {dimension_numbers = #tpu.dot_dimension_numbers<[1], [0], [0], [1], [0, 0, 1, 1], [], []>} : vector<2x28xf32>, vector<28x104xf32>, vector<2x104xf32> -> vector<2x104xf32>
    %142 = arith.addf %140, %141 : vector<2x104xf32>
    %cst_98 = arith.constant dense<0.000000e+00> : vector<2x104xf32>
    %143 = tpu.matmul %23, %55, %cst_98 {dimension_numbers = #tpu.dot_dimension_numbers<[1], [0], [0], [1], [0, 0, 1, 1], [], []>} : vector<2x28xf32>, vector<28x104xf32>, vector<2x104xf32> -> vector<2x104xf32>
    %144 = arith.addf %142, %143 : vector<2x104xf32>
    %cst_99 = arith.constant 0.000000e+00 : f32
    %145 = vector.broadcast %cst_99 : f32 to vector<2x104xf32>
    %146 = arith.maximumf %144, %145 : vector<2x104xf32>
    %cst_100 = arith.constant dense<0.000000e+00> : vector<2x104xf32>
    %147 = tpu.matmul %21, %51, %cst_100 {dimension_numbers = #tpu.dot_dimension_numbers<[1], [0], [0], [1], [0, 0, 1, 1], [], []>} : vector<2x28xf32>, vector<28x104xf32>, vector<2x104xf32> -> vector<2x104xf32>
    %148 = vector.broadcast %56 : vector<1x104xf32> to vector<2x104xf32>
    %149 = arith.addf %148, %147 : vector<2x104xf32>
    %cst_101 = arith.constant dense<0.000000e+00> : vector<2x104xf32>
    %150 = tpu.matmul %23, %53, %cst_101 {dimension_numbers = #tpu.dot_dimension_numbers<[1], [0], [0], [1], [0, 0, 1, 1], [], []>} : vector<2x28xf32>, vector<28x104xf32>, vector<2x104xf32> -> vector<2x104xf32>
    %151 = arith.addf %149, %150 : vector<2x104xf32>
    %cst_102 = arith.constant dense<0.000000e+00> : vector<2x104xf32>
    %152 = tpu.matmul %25, %55, %cst_102 {dimension_numbers = #tpu.dot_dimension_numbers<[1], [0], [0], [1], [0, 0, 1, 1], [], []>} : vector<2x28xf32>, vector<28x104xf32>, vector<2x104xf32> -> vector<2x104xf32>
    %153 = arith.addf %151, %152 : vector<2x104xf32>
    %cst_103 = arith.constant 0.000000e+00 : f32
    %154 = vector.broadcast %cst_103 : f32 to vector<2x104xf32>
    %155 = arith.maximumf %153, %154 : vector<2x104xf32>
    %cst_104 = arith.constant dense<0.000000e+00> : vector<2x104xf32>
    %156 = tpu.matmul %23, %51, %cst_104 {dimension_numbers = #tpu.dot_dimension_numbers<[1], [0], [0], [1], [0, 0, 1, 1], [], []>} : vector<2x28xf32>, vector<28x104xf32>, vector<2x104xf32> -> vector<2x104xf32>
    %157 = vector.broadcast %56 : vector<1x104xf32> to vector<2x104xf32>
    %158 = arith.addf %157, %156 : vector<2x104xf32>
    %cst_105 = arith.constant dense<0.000000e+00> : vector<2x104xf32>
    %159 = tpu.matmul %25, %53, %cst_105 {dimension_numbers = #tpu.dot_dimension_numbers<[1], [0], [0], [1], [0, 0, 1, 1], [], []>} : vector<2x28xf32>, vector<28x104xf32>, vector<2x104xf32> -> vector<2x104xf32>
    %160 = arith.addf %158, %159 : vector<2x104xf32>
    %cst_106 = arith.constant dense<0.000000e+00> : vector<2x104xf32>
    %161 = tpu.matmul %27, %55, %cst_106 {dimension_numbers = #tpu.dot_dimension_numbers<[1], [0], [0], [1], [0, 0, 1, 1], [], []>} : vector<2x28xf32>, vector<28x104xf32>, vector<2x104xf32> -> vector<2x104xf32>
    %162 = arith.addf %160, %161 : vector<2x104xf32>
    %cst_107 = arith.constant 0.000000e+00 : f32
    %163 = vector.broadcast %cst_107 : f32 to vector<2x104xf32>
    %164 = arith.maximumf %162, %163 : vector<2x104xf32>
    %cst_108 = arith.constant dense<0.000000e+00> : vector<2x104xf32>
    %165 = tpu.matmul %25, %51, %cst_108 {dimension_numbers = #tpu.dot_dimension_numbers<[1], [0], [0], [1], [0, 0, 1, 1], [], []>} : vector<2x28xf32>, vector<28x104xf32>, vector<2x104xf32> -> vector<2x104xf32>
    %166 = vector.broadcast %56 : vector<1x104xf32> to vector<2x104xf32>
    %167 = arith.addf %166, %165 : vector<2x104xf32>
    %cst_109 = arith.constant dense<0.000000e+00> : vector<2x104xf32>
    %168 = tpu.matmul %27, %53, %cst_109 {dimension_numbers = #tpu.dot_dimension_numbers<[1], [0], [0], [1], [0, 0, 1, 1], [], []>} : vector<2x28xf32>, vector<28x104xf32>, vector<2x104xf32> -> vector<2x104xf32>
    %169 = arith.addf %167, %168 : vector<2x104xf32>
    %cst_110 = arith.constant dense<0.000000e+00> : vector<2x104xf32>
    %170 = tpu.matmul %29, %55, %cst_110 {dimension_numbers = #tpu.dot_dimension_numbers<[1], [0], [0], [1], [0, 0, 1, 1], [], []>} : vector<2x28xf32>, vector<28x104xf32>, vector<2x104xf32> -> vector<2x104xf32>
    %171 = arith.addf %169, %170 : vector<2x104xf32>
    %cst_111 = arith.constant 0.000000e+00 : f32
    %172 = vector.broadcast %cst_111 : f32 to vector<2x104xf32>
    %173 = arith.maximumf %171, %172 : vector<2x104xf32>
    %cst_112 = arith.constant dense<0.000000e+00> : vector<2x104xf32>
    %174 = tpu.matmul %27, %51, %cst_112 {dimension_numbers = #tpu.dot_dimension_numbers<[1], [0], [0], [1], [0, 0, 1, 1], [], []>} : vector<2x28xf32>, vector<28x104xf32>, vector<2x104xf32> -> vector<2x104xf32>
    %175 = vector.broadcast %56 : vector<1x104xf32> to vector<2x104xf32>
    %176 = arith.addf %175, %174 : vector<2x104xf32>
    %cst_113 = arith.constant dense<0.000000e+00> : vector<2x104xf32>
    %177 = tpu.matmul %29, %53, %cst_113 {dimension_numbers = #tpu.dot_dimension_numbers<[1], [0], [0], [1], [0, 0, 1, 1], [], []>} : vector<2x28xf32>, vector<28x104xf32>, vector<2x104xf32> -> vector<2x104xf32>
    %178 = arith.addf %176, %177 : vector<2x104xf32>
    %cst_114 = arith.constant dense<0.000000e+00> : vector<2x104xf32>
    %179 = tpu.matmul %31, %55, %cst_114 {dimension_numbers = #tpu.dot_dimension_numbers<[1], [0], [0], [1], [0, 0, 1, 1], [], []>} : vector<2x28xf32>, vector<28x104xf32>, vector<2x104xf32> -> vector<2x104xf32>
    %180 = arith.addf %178, %179 : vector<2x104xf32>
    %cst_115 = arith.constant 0.000000e+00 : f32
    %181 = vector.broadcast %cst_115 : f32 to vector<2x104xf32>
    %182 = arith.maximumf %180, %181 : vector<2x104xf32>
    %cst_116 = arith.constant dense<0.000000e+00> : vector<2x104xf32>
    %183 = tpu.matmul %29, %51, %cst_116 {dimension_numbers = #tpu.dot_dimension_numbers<[1], [0], [0], [1], [0, 0, 1, 1], [], []>} : vector<2x28xf32>, vector<28x104xf32>, vector<2x104xf32> -> vector<2x104xf32>
    %184 = vector.broadcast %56 : vector<1x104xf32> to vector<2x104xf32>
    %185 = arith.addf %184, %183 : vector<2x104xf32>
    %cst_117 = arith.constant dense<0.000000e+00> : vector<2x104xf32>
    %186 = tpu.matmul %31, %53, %cst_117 {dimension_numbers = #tpu.dot_dimension_numbers<[1], [0], [0], [1], [0, 0, 1, 1], [], []>} : vector<2x28xf32>, vector<28x104xf32>, vector<2x104xf32> -> vector<2x104xf32>
    %187 = arith.addf %185, %186 : vector<2x104xf32>
    %cst_118 = arith.constant dense<0.000000e+00> : vector<2x104xf32>
    %188 = tpu.matmul %33, %55, %cst_118 {dimension_numbers = #tpu.dot_dimension_numbers<[1], [0], [0], [1], [0, 0, 1, 1], [], []>} : vector<2x28xf32>, vector<28x104xf32>, vector<2x104xf32> -> vector<2x104xf32>
    %189 = arith.addf %187, %188 : vector<2x104xf32>
    %cst_119 = arith.constant 0.000000e+00 : f32
    %190 = vector.broadcast %cst_119 : f32 to vector<2x104xf32>
    %191 = arith.maximumf %189, %190 : vector<2x104xf32>
    %cst_120 = arith.constant dense<0.000000e+00> : vector<2x104xf32>
    %192 = tpu.matmul %31, %51, %cst_120 {dimension_numbers = #tpu.dot_dimension_numbers<[1], [0], [0], [1], [0, 0, 1, 1], [], []>} : vector<2x28xf32>, vector<28x104xf32>, vector<2x104xf32> -> vector<2x104xf32>
    %193 = vector.broadcast %56 : vector<1x104xf32> to vector<2x104xf32>
    %194 = arith.addf %193, %192 : vector<2x104xf32>
    %cst_121 = arith.constant dense<0.000000e+00> : vector<2x104xf32>
    %195 = tpu.matmul %33, %53, %cst_121 {dimension_numbers = #tpu.dot_dimension_numbers<[1], [0], [0], [1], [0, 0, 1, 1], [], []>} : vector<2x28xf32>, vector<28x104xf32>, vector<2x104xf32> -> vector<2x104xf32>
    %196 = arith.addf %194, %195 : vector<2x104xf32>
    %cst_122 = arith.constant dense<0.000000e+00> : vector<2x104xf32>
    %197 = tpu.matmul %35, %55, %cst_122 {dimension_numbers = #tpu.dot_dimension_numbers<[1], [0], [0], [1], [0, 0, 1, 1], [], []>} : vector<2x28xf32>, vector<28x104xf32>, vector<2x104xf32> -> vector<2x104xf32>
    %198 = arith.addf %196, %197 : vector<2x104xf32>
    %cst_123 = arith.constant 0.000000e+00 : f32
    %199 = vector.broadcast %cst_123 : f32 to vector<2x104xf32>
    %200 = arith.maximumf %198, %199 : vector<2x104xf32>
    %cst_124 = arith.constant dense<0.000000e+00> : vector<2x104xf32>
    %201 = tpu.matmul %33, %51, %cst_124 {dimension_numbers = #tpu.dot_dimension_numbers<[1], [0], [0], [1], [0, 0, 1, 1], [], []>} : vector<2x28xf32>, vector<28x104xf32>, vector<2x104xf32> -> vector<2x104xf32>
    %202 = vector.broadcast %56 : vector<1x104xf32> to vector<2x104xf32>
    %203 = arith.addf %202, %201 : vector<2x104xf32>
    %cst_125 = arith.constant dense<0.000000e+00> : vector<2x104xf32>
    %204 = tpu.matmul %35, %53, %cst_125 {dimension_numbers = #tpu.dot_dimension_numbers<[1], [0], [0], [1], [0, 0, 1, 1], [], []>} : vector<2x28xf32>, vector<28x104xf32>, vector<2x104xf32> -> vector<2x104xf32>
    %205 = arith.addf %203, %204 : vector<2x104xf32>
    %cst_126 = arith.constant dense<0.000000e+00> : vector<2x104xf32>
    %206 = tpu.matmul %37, %55, %cst_126 {dimension_numbers = #tpu.dot_dimension_numbers<[1], [0], [0], [1], [0, 0, 1, 1], [], []>} : vector<2x28xf32>, vector<28x104xf32>, vector<2x104xf32> -> vector<2x104xf32>
    %207 = arith.addf %205, %206 : vector<2x104xf32>
    %cst_127 = arith.constant 0.000000e+00 : f32
    %208 = vector.broadcast %cst_127 : f32 to vector<2x104xf32>
    %209 = arith.maximumf %207, %208 : vector<2x104xf32>
    %cst_128 = arith.constant dense<0.000000e+00> : vector<2x104xf32>
    %210 = tpu.matmul %35, %51, %cst_128 {dimension_numbers = #tpu.dot_dimension_numbers<[1], [0], [0], [1], [0, 0, 1, 1], [], []>} : vector<2x28xf32>, vector<28x104xf32>, vector<2x104xf32> -> vector<2x104xf32>
    %211 = vector.broadcast %56 : vector<1x104xf32> to vector<2x104xf32>
    %212 = arith.addf %211, %210 : vector<2x104xf32>
    %cst_129 = arith.constant dense<0.000000e+00> : vector<2x104xf32>
    %213 = tpu.matmul %37, %53, %cst_129 {dimension_numbers = #tpu.dot_dimension_numbers<[1], [0], [0], [1], [0, 0, 1, 1], [], []>} : vector<2x28xf32>, vector<28x104xf32>, vector<2x104xf32> -> vector<2x104xf32>
    %214 = arith.addf %212, %213 : vector<2x104xf32>
    %cst_130 = arith.constant dense<0.000000e+00> : vector<2x104xf32>
    %215 = tpu.matmul %39, %55, %cst_130 {dimension_numbers = #tpu.dot_dimension_numbers<[1], [0], [0], [1], [0, 0, 1, 1], [], []>} : vector<2x28xf32>, vector<28x104xf32>, vector<2x104xf32> -> vector<2x104xf32>
    %216 = arith.addf %214, %215 : vector<2x104xf32>
    %cst_131 = arith.constant 0.000000e+00 : f32
    %217 = vector.broadcast %cst_131 : f32 to vector<2x104xf32>
    %218 = arith.maximumf %216, %217 : vector<2x104xf32>
    %cst_132 = arith.constant dense<0.000000e+00> : vector<2x104xf32>
    %219 = tpu.matmul %37, %51, %cst_132 {dimension_numbers = #tpu.dot_dimension_numbers<[1], [0], [0], [1], [0, 0, 1, 1], [], []>} : vector<2x28xf32>, vector<28x104xf32>, vector<2x104xf32> -> vector<2x104xf32>
    %220 = vector.broadcast %56 : vector<1x104xf32> to vector<2x104xf32>
    %221 = arith.addf %220, %219 : vector<2x104xf32>
    %cst_133 = arith.constant dense<0.000000e+00> : vector<2x104xf32>
    %222 = tpu.matmul %39, %53, %cst_133 {dimension_numbers = #tpu.dot_dimension_numbers<[1], [0], [0], [1], [0, 0, 1, 1], [], []>} : vector<2x28xf32>, vector<28x104xf32>, vector<2x104xf32> -> vector<2x104xf32>
    %223 = arith.addf %221, %222 : vector<2x104xf32>
    %cst_134 = arith.constant dense<0.000000e+00> : vector<2x104xf32>
    %224 = tpu.matmul %41, %55, %cst_134 {dimension_numbers = #tpu.dot_dimension_numbers<[1], [0], [0], [1], [0, 0, 1, 1], [], []>} : vector<2x28xf32>, vector<28x104xf32>, vector<2x104xf32> -> vector<2x104xf32>
    %225 = arith.addf %223, %224 : vector<2x104xf32>
    %cst_135 = arith.constant 0.000000e+00 : f32
    %226 = vector.broadcast %cst_135 : f32 to vector<2x104xf32>
    %227 = arith.maximumf %225, %226 : vector<2x104xf32>
    %cst_136 = arith.constant dense<0.000000e+00> : vector<2x104xf32>
    %228 = tpu.matmul %39, %51, %cst_136 {dimension_numbers = #tpu.dot_dimension_numbers<[1], [0], [0], [1], [0, 0, 1, 1], [], []>} : vector<2x28xf32>, vector<28x104xf32>, vector<2x104xf32> -> vector<2x104xf32>
    %229 = vector.broadcast %56 : vector<1x104xf32> to vector<2x104xf32>
    %230 = arith.addf %229, %228 : vector<2x104xf32>
    %cst_137 = arith.constant dense<0.000000e+00> : vector<2x104xf32>
    %231 = tpu.matmul %41, %53, %cst_137 {dimension_numbers = #tpu.dot_dimension_numbers<[1], [0], [0], [1], [0, 0, 1, 1], [], []>} : vector<2x28xf32>, vector<28x104xf32>, vector<2x104xf32> -> vector<2x104xf32>
    %232 = arith.addf %230, %231 : vector<2x104xf32>
    %cst_138 = arith.constant dense<0.000000e+00> : vector<2x104xf32>
    %233 = tpu.matmul %43, %55, %cst_138 {dimension_numbers = #tpu.dot_dimension_numbers<[1], [0], [0], [1], [0, 0, 1, 1], [], []>} : vector<2x28xf32>, vector<28x104xf32>, vector<2x104xf32> -> vector<2x104xf32>
    %234 = arith.addf %232, %233 : vector<2x104xf32>
    %cst_139 = arith.constant 0.000000e+00 : f32
    %235 = vector.broadcast %cst_139 : f32 to vector<2x104xf32>
    %236 = arith.maximumf %234, %235 : vector<2x104xf32>
    %cst_140 = arith.constant dense<0.000000e+00> : vector<2x104xf32>
    %237 = tpu.matmul %41, %51, %cst_140 {dimension_numbers = #tpu.dot_dimension_numbers<[1], [0], [0], [1], [0, 0, 1, 1], [], []>} : vector<2x28xf32>, vector<28x104xf32>, vector<2x104xf32> -> vector<2x104xf32>
    %238 = vector.broadcast %56 : vector<1x104xf32> to vector<2x104xf32>
    %239 = arith.addf %238, %237 : vector<2x104xf32>
    %cst_141 = arith.constant dense<0.000000e+00> : vector<2x104xf32>
    %240 = tpu.matmul %43, %53, %cst_141 {dimension_numbers = #tpu.dot_dimension_numbers<[1], [0], [0], [1], [0, 0, 1, 1], [], []>} : vector<2x28xf32>, vector<28x104xf32>, vector<2x104xf32> -> vector<2x104xf32>
    %241 = arith.addf %239, %240 : vector<2x104xf32>
    %cst_142 = arith.constant dense<0.000000e+00> : vector<2x104xf32>
    %242 = tpu.matmul %45, %55, %cst_142 {dimension_numbers = #tpu.dot_dimension_numbers<[1], [0], [0], [1], [0, 0, 1, 1], [], []>} : vector<2x28xf32>, vector<28x104xf32>, vector<2x104xf32> -> vector<2x104xf32>
    %243 = arith.addf %241, %242 : vector<2x104xf32>
    %cst_143 = arith.constant 0.000000e+00 : f32
    %244 = vector.broadcast %cst_143 : f32 to vector<2x104xf32>
    %245 = arith.maximumf %243, %244 : vector<2x104xf32>
    %cst_144 = arith.constant dense<0.000000e+00> : vector<2x104xf32>
    %246 = tpu.matmul %43, %51, %cst_144 {dimension_numbers = #tpu.dot_dimension_numbers<[1], [0], [0], [1], [0, 0, 1, 1], [], []>} : vector<2x28xf32>, vector<28x104xf32>, vector<2x104xf32> -> vector<2x104xf32>
    %247 = vector.broadcast %56 : vector<1x104xf32> to vector<2x104xf32>
    %248 = arith.addf %247, %246 : vector<2x104xf32>
    %cst_145 = arith.constant dense<0.000000e+00> : vector<2x104xf32>
    %249 = tpu.matmul %45, %53, %cst_145 {dimension_numbers = #tpu.dot_dimension_numbers<[1], [0], [0], [1], [0, 0, 1, 1], [], []>} : vector<2x28xf32>, vector<28x104xf32>, vector<2x104xf32> -> vector<2x104xf32>
    %250 = arith.addf %248, %249 : vector<2x104xf32>
    %cst_146 = arith.constant dense<0.000000e+00> : vector<2x104xf32>
    %251 = tpu.matmul %47, %55, %cst_146 {dimension_numbers = #tpu.dot_dimension_numbers<[1], [0], [0], [1], [0, 0, 1, 1], [], []>} : vector<2x28xf32>, vector<28x104xf32>, vector<2x104xf32> -> vector<2x104xf32>
    %252 = arith.addf %250, %251 : vector<2x104xf32>
    %cst_147 = arith.constant 0.000000e+00 : f32
    %253 = vector.broadcast %cst_147 : f32 to vector<2x104xf32>
    %254 = arith.maximumf %252, %253 : vector<2x104xf32>
    %cst_148 = arith.constant dense<0.000000e+00> : vector<2x104xf32>
    %255 = tpu.matmul %45, %51, %cst_148 {dimension_numbers = #tpu.dot_dimension_numbers<[1], [0], [0], [1], [0, 0, 1, 1], [], []>} : vector<2x28xf32>, vector<28x104xf32>, vector<2x104xf32> -> vector<2x104xf32>
    %256 = vector.broadcast %56 : vector<1x104xf32> to vector<2x104xf32>
    %257 = arith.addf %256, %255 : vector<2x104xf32>
    %cst_149 = arith.constant dense<0.000000e+00> : vector<2x104xf32>
    %258 = tpu.matmul %47, %53, %cst_149 {dimension_numbers = #tpu.dot_dimension_numbers<[1], [0], [0], [1], [0, 0, 1, 1], [], []>} : vector<2x28xf32>, vector<28x104xf32>, vector<2x104xf32> -> vector<2x104xf32>
    %259 = arith.addf %257, %258 : vector<2x104xf32>
    %cst_150 = arith.constant dense<0.000000e+00> : vector<2x104xf32>
    %260 = tpu.matmul %49, %55, %cst_150 {dimension_numbers = #tpu.dot_dimension_numbers<[1], [0], [0], [1], [0, 0, 1, 1], [], []>} : vector<2x28xf32>, vector<28x104xf32>, vector<2x104xf32> -> vector<2x104xf32>
    %261 = arith.addf %259, %260 : vector<2x104xf32>
    %cst_151 = arith.constant 0.000000e+00 : f32
    %262 = vector.broadcast %cst_151 : f32 to vector<2x104xf32>
    %263 = arith.maximumf %261, %262 : vector<2x104xf32>
    %c0_152 = arith.constant 0 : index
    %c0_153 = arith.constant 0 : index
    %c0_154 = arith.constant 0 : index
    %264 = vector.load %arg3[%c0_152, %c0_153, %c0_154] : memref<3x104x96xf32, #tpu.memory_space<vmem>>, vector<1x104x96xf32>
    %265 = vector.shape_cast %264 : vector<1x104x96xf32> to vector<104x96xf32>
    %c1_155 = arith.constant 1 : index
    %c0_156 = arith.constant 0 : index
    %c0_157 = arith.constant 0 : index
    %266 = vector.load %arg3[%c1_155, %c0_156, %c0_157] : memref<3x104x96xf32, #tpu.memory_space<vmem>>, vector<1x104x96xf32>
    %267 = vector.shape_cast %266 : vector<1x104x96xf32> to vector<104x96xf32>
    %c2_158 = arith.constant 2 : index
    %c0_159 = arith.constant 0 : index
    %c0_160 = arith.constant 0 : index
    %268 = vector.load %arg3[%c2_158, %c0_159, %c0_160] : memref<3x104x96xf32, #tpu.memory_space<vmem>>, vector<1x104x96xf32>
    %269 = vector.shape_cast %268 : vector<1x104x96xf32> to vector<104x96xf32>
    %c0_161 = arith.constant 0 : index
    %c0_162 = arith.constant 0 : index
    %270 = vector.load %arg4[%c0_161, %c0_162] : memref<1x96xf32, #tpu.memory_space<vmem>>, vector<1x96xf32>
    %cst_163 = arith.constant dense<0.000000e+00> : vector<2x96xf32>
    %271 = tpu.matmul %65, %265, %cst_163 {dimension_numbers = #tpu.dot_dimension_numbers<[1], [0], [0], [1], [0, 0, 1, 1], [], []>} : vector<2x104xf32>, vector<104x96xf32>, vector<2x96xf32> -> vector<2x96xf32>
    %272 = vector.broadcast %270 : vector<1x96xf32> to vector<2x96xf32>
    %273 = arith.addf %272, %271 : vector<2x96xf32>
    %cst_164 = arith.constant dense<0.000000e+00> : vector<2x96xf32>
    %274 = tpu.matmul %74, %267, %cst_164 {dimension_numbers = #tpu.dot_dimension_numbers<[1], [0], [0], [1], [0, 0, 1, 1], [], []>} : vector<2x104xf32>, vector<104x96xf32>, vector<2x96xf32> -> vector<2x96xf32>
    %275 = arith.addf %273, %274 : vector<2x96xf32>
    %cst_165 = arith.constant dense<0.000000e+00> : vector<2x96xf32>
    %276 = tpu.matmul %83, %269, %cst_165 {dimension_numbers = #tpu.dot_dimension_numbers<[1], [0], [0], [1], [0, 0, 1, 1], [], []>} : vector<2x104xf32>, vector<104x96xf32>, vector<2x96xf32> -> vector<2x96xf32>
    %277 = arith.addf %275, %276 : vector<2x96xf32>
    %cst_166 = arith.constant 0.000000e+00 : f32
    %278 = vector.broadcast %cst_166 : f32 to vector<2x96xf32>
    %279 = arith.maximumf %277, %278 : vector<2x96xf32>
    %cst_167 = arith.constant dense<0.000000e+00> : vector<2x96xf32>
    %280 = tpu.matmul %83, %265, %cst_167 {dimension_numbers = #tpu.dot_dimension_numbers<[1], [0], [0], [1], [0, 0, 1, 1], [], []>} : vector<2x104xf32>, vector<104x96xf32>, vector<2x96xf32> -> vector<2x96xf32>
    %281 = vector.broadcast %270 : vector<1x96xf32> to vector<2x96xf32>
    %282 = arith.addf %281, %280 : vector<2x96xf32>
    %cst_168 = arith.constant dense<0.000000e+00> : vector<2x96xf32>
    %283 = tpu.matmul %92, %267, %cst_168 {dimension_numbers = #tpu.dot_dimension_numbers<[1], [0], [0], [1], [0, 0, 1, 1], [], []>} : vector<2x104xf32>, vector<104x96xf32>, vector<2x96xf32> -> vector<2x96xf32>
    %284 = arith.addf %282, %283 : vector<2x96xf32>
    %cst_169 = arith.constant dense<0.000000e+00> : vector<2x96xf32>
    %285 = tpu.matmul %101, %269, %cst_169 {dimension_numbers = #tpu.dot_dimension_numbers<[1], [0], [0], [1], [0, 0, 1, 1], [], []>} : vector<2x104xf32>, vector<104x96xf32>, vector<2x96xf32> -> vector<2x96xf32>
    %286 = arith.addf %284, %285 : vector<2x96xf32>
    %cst_170 = arith.constant 0.000000e+00 : f32
    %287 = vector.broadcast %cst_170 : f32 to vector<2x96xf32>
    %288 = arith.maximumf %286, %287 : vector<2x96xf32>
    %cst_171 = arith.constant dense<0.000000e+00> : vector<2x96xf32>
    %289 = tpu.matmul %101, %265, %cst_171 {dimension_numbers = #tpu.dot_dimension_numbers<[1], [0], [0], [1], [0, 0, 1, 1], [], []>} : vector<2x104xf32>, vector<104x96xf32>, vector<2x96xf32> -> vector<2x96xf32>
    %290 = vector.broadcast %270 : vector<1x96xf32> to vector<2x96xf32>
    %291 = arith.addf %290, %289 : vector<2x96xf32>
    %cst_172 = arith.constant dense<0.000000e+00> : vector<2x96xf32>
    %292 = tpu.matmul %110, %267, %cst_172 {dimension_numbers = #tpu.dot_dimension_numbers<[1], [0], [0], [1], [0, 0, 1, 1], [], []>} : vector<2x104xf32>, vector<104x96xf32>, vector<2x96xf32> -> vector<2x96xf32>
    %293 = arith.addf %291, %292 : vector<2x96xf32>
    %cst_173 = arith.constant dense<0.000000e+00> : vector<2x96xf32>
    %294 = tpu.matmul %119, %269, %cst_173 {dimension_numbers = #tpu.dot_dimension_numbers<[1], [0], [0], [1], [0, 0, 1, 1], [], []>} : vector<2x104xf32>, vector<104x96xf32>, vector<2x96xf32> -> vector<2x96xf32>
    %295 = arith.addf %293, %294 : vector<2x96xf32>
    %cst_174 = arith.constant 0.000000e+00 : f32
    %296 = vector.broadcast %cst_174 : f32 to vector<2x96xf32>
    %297 = arith.maximumf %295, %296 : vector<2x96xf32>
    %cst_175 = arith.constant dense<0.000000e+00> : vector<2x96xf32>
    %298 = tpu.matmul %119, %265, %cst_175 {dimension_numbers = #tpu.dot_dimension_numbers<[1], [0], [0], [1], [0, 0, 1, 1], [], []>} : vector<2x104xf32>, vector<104x96xf32>, vector<2x96xf32> -> vector<2x96xf32>
    %299 = vector.broadcast %270 : vector<1x96xf32> to vector<2x96xf32>
    %300 = arith.addf %299, %298 : vector<2x96xf32>
    %cst_176 = arith.constant dense<0.000000e+00> : vector<2x96xf32>
    %301 = tpu.matmul %128, %267, %cst_176 {dimension_numbers = #tpu.dot_dimension_numbers<[1], [0], [0], [1], [0, 0, 1, 1], [], []>} : vector<2x104xf32>, vector<104x96xf32>, vector<2x96xf32> -> vector<2x96xf32>
    %302 = arith.addf %300, %301 : vector<2x96xf32>
    %cst_177 = arith.constant dense<0.000000e+00> : vector<2x96xf32>
    %303 = tpu.matmul %137, %269, %cst_177 {dimension_numbers = #tpu.dot_dimension_numbers<[1], [0], [0], [1], [0, 0, 1, 1], [], []>} : vector<2x104xf32>, vector<104x96xf32>, vector<2x96xf32> -> vector<2x96xf32>
    %304 = arith.addf %302, %303 : vector<2x96xf32>
    %cst_178 = arith.constant 0.000000e+00 : f32
    %305 = vector.broadcast %cst_178 : f32 to vector<2x96xf32>
    %306 = arith.maximumf %304, %305 : vector<2x96xf32>
    %cst_179 = arith.constant dense<0.000000e+00> : vector<2x96xf32>
    %307 = tpu.matmul %137, %265, %cst_179 {dimension_numbers = #tpu.dot_dimension_numbers<[1], [0], [0], [1], [0, 0, 1, 1], [], []>} : vector<2x104xf32>, vector<104x96xf32>, vector<2x96xf32> -> vector<2x96xf32>
    %308 = vector.broadcast %270 : vector<1x96xf32> to vector<2x96xf32>
    %309 = arith.addf %308, %307 : vector<2x96xf32>
    %cst_180 = arith.constant dense<0.000000e+00> : vector<2x96xf32>
    %310 = tpu.matmul %146, %267, %cst_180 {dimension_numbers = #tpu.dot_dimension_numbers<[1], [0], [0], [1], [0, 0, 1, 1], [], []>} : vector<2x104xf32>, vector<104x96xf32>, vector<2x96xf32> -> vector<2x96xf32>
    %311 = arith.addf %309, %310 : vector<2x96xf32>
    %cst_181 = arith.constant dense<0.000000e+00> : vector<2x96xf32>
    %312 = tpu.matmul %155, %269, %cst_181 {dimension_numbers = #tpu.dot_dimension_numbers<[1], [0], [0], [1], [0, 0, 1, 1], [], []>} : vector<2x104xf32>, vector<104x96xf32>, vector<2x96xf32> -> vector<2x96xf32>
    %313 = arith.addf %311, %312 : vector<2x96xf32>
    %cst_182 = arith.constant 0.000000e+00 : f32
    %314 = vector.broadcast %cst_182 : f32 to vector<2x96xf32>
    %315 = arith.maximumf %313, %314 : vector<2x96xf32>
    %cst_183 = arith.constant dense<0.000000e+00> : vector<2x96xf32>
    %316 = tpu.matmul %155, %265, %cst_183 {dimension_numbers = #tpu.dot_dimension_numbers<[1], [0], [0], [1], [0, 0, 1, 1], [], []>} : vector<2x104xf32>, vector<104x96xf32>, vector<2x96xf32> -> vector<2x96xf32>
    %317 = vector.broadcast %270 : vector<1x96xf32> to vector<2x96xf32>
    %318 = arith.addf %317, %316 : vector<2x96xf32>
    %cst_184 = arith.constant dense<0.000000e+00> : vector<2x96xf32>
    %319 = tpu.matmul %164, %267, %cst_184 {dimension_numbers = #tpu.dot_dimension_numbers<[1], [0], [0], [1], [0, 0, 1, 1], [], []>} : vector<2x104xf32>, vector<104x96xf32>, vector<2x96xf32> -> vector<2x96xf32>
    %320 = arith.addf %318, %319 : vector<2x96xf32>
    %cst_185 = arith.constant dense<0.000000e+00> : vector<2x96xf32>
    %321 = tpu.matmul %173, %269, %cst_185 {dimension_numbers = #tpu.dot_dimension_numbers<[1], [0], [0], [1], [0, 0, 1, 1], [], []>} : vector<2x104xf32>, vector<104x96xf32>, vector<2x96xf32> -> vector<2x96xf32>
    %322 = arith.addf %320, %321 : vector<2x96xf32>
    %cst_186 = arith.constant 0.000000e+00 : f32
    %323 = vector.broadcast %cst_186 : f32 to vector<2x96xf32>
    %324 = arith.maximumf %322, %323 : vector<2x96xf32>
    %cst_187 = arith.constant dense<0.000000e+00> : vector<2x96xf32>
    %325 = tpu.matmul %173, %265, %cst_187 {dimension_numbers = #tpu.dot_dimension_numbers<[1], [0], [0], [1], [0, 0, 1, 1], [], []>} : vector<2x104xf32>, vector<104x96xf32>, vector<2x96xf32> -> vector<2x96xf32>
    %326 = vector.broadcast %270 : vector<1x96xf32> to vector<2x96xf32>
    %327 = arith.addf %326, %325 : vector<2x96xf32>
    %cst_188 = arith.constant dense<0.000000e+00> : vector<2x96xf32>
    %328 = tpu.matmul %182, %267, %cst_188 {dimension_numbers = #tpu.dot_dimension_numbers<[1], [0], [0], [1], [0, 0, 1, 1], [], []>} : vector<2x104xf32>, vector<104x96xf32>, vector<2x96xf32> -> vector<2x96xf32>
    %329 = arith.addf %327, %328 : vector<2x96xf32>
    %cst_189 = arith.constant dense<0.000000e+00> : vector<2x96xf32>
    %330 = tpu.matmul %191, %269, %cst_189 {dimension_numbers = #tpu.dot_dimension_numbers<[1], [0], [0], [1], [0, 0, 1, 1], [], []>} : vector<2x104xf32>, vector<104x96xf32>, vector<2x96xf32> -> vector<2x96xf32>
    %331 = arith.addf %329, %330 : vector<2x96xf32>
    %cst_190 = arith.constant 0.000000e+00 : f32
    %332 = vector.broadcast %cst_190 : f32 to vector<2x96xf32>
    %333 = arith.maximumf %331, %332 : vector<2x96xf32>
    %cst_191 = arith.constant dense<0.000000e+00> : vector<2x96xf32>
    %334 = tpu.matmul %191, %265, %cst_191 {dimension_numbers = #tpu.dot_dimension_numbers<[1], [0], [0], [1], [0, 0, 1, 1], [], []>} : vector<2x104xf32>, vector<104x96xf32>, vector<2x96xf32> -> vector<2x96xf32>
    %335 = vector.broadcast %270 : vector<1x96xf32> to vector<2x96xf32>
    %336 = arith.addf %335, %334 : vector<2x96xf32>
    %cst_192 = arith.constant dense<0.000000e+00> : vector<2x96xf32>
    %337 = tpu.matmul %200, %267, %cst_192 {dimension_numbers = #tpu.dot_dimension_numbers<[1], [0], [0], [1], [0, 0, 1, 1], [], []>} : vector<2x104xf32>, vector<104x96xf32>, vector<2x96xf32> -> vector<2x96xf32>
    %338 = arith.addf %336, %337 : vector<2x96xf32>
    %cst_193 = arith.constant dense<0.000000e+00> : vector<2x96xf32>
    %339 = tpu.matmul %209, %269, %cst_193 {dimension_numbers = #tpu.dot_dimension_numbers<[1], [0], [0], [1], [0, 0, 1, 1], [], []>} : vector<2x104xf32>, vector<104x96xf32>, vector<2x96xf32> -> vector<2x96xf32>
    %340 = arith.addf %338, %339 : vector<2x96xf32>
    %cst_194 = arith.constant 0.000000e+00 : f32
    %341 = vector.broadcast %cst_194 : f32 to vector<2x96xf32>
    %342 = arith.maximumf %340, %341 : vector<2x96xf32>
    %cst_195 = arith.constant dense<0.000000e+00> : vector<2x96xf32>
    %343 = tpu.matmul %209, %265, %cst_195 {dimension_numbers = #tpu.dot_dimension_numbers<[1], [0], [0], [1], [0, 0, 1, 1], [], []>} : vector<2x104xf32>, vector<104x96xf32>, vector<2x96xf32> -> vector<2x96xf32>
    %344 = vector.broadcast %270 : vector<1x96xf32> to vector<2x96xf32>
    %345 = arith.addf %344, %343 : vector<2x96xf32>
    %cst_196 = arith.constant dense<0.000000e+00> : vector<2x96xf32>
    %346 = tpu.matmul %218, %267, %cst_196 {dimension_numbers = #tpu.dot_dimension_numbers<[1], [0], [0], [1], [0, 0, 1, 1], [], []>} : vector<2x104xf32>, vector<104x96xf32>, vector<2x96xf32> -> vector<2x96xf32>
    %347 = arith.addf %345, %346 : vector<2x96xf32>
    %cst_197 = arith.constant dense<0.000000e+00> : vector<2x96xf32>
    %348 = tpu.matmul %227, %269, %cst_197 {dimension_numbers = #tpu.dot_dimension_numbers<[1], [0], [0], [1], [0, 0, 1, 1], [], []>} : vector<2x104xf32>, vector<104x96xf32>, vector<2x96xf32> -> vector<2x96xf32>
    %349 = arith.addf %347, %348 : vector<2x96xf32>
    %cst_198 = arith.constant 0.000000e+00 : f32
    %350 = vector.broadcast %cst_198 : f32 to vector<2x96xf32>
    %351 = arith.maximumf %349, %350 : vector<2x96xf32>
    %cst_199 = arith.constant dense<0.000000e+00> : vector<2x96xf32>
    %352 = tpu.matmul %227, %265, %cst_199 {dimension_numbers = #tpu.dot_dimension_numbers<[1], [0], [0], [1], [0, 0, 1, 1], [], []>} : vector<2x104xf32>, vector<104x96xf32>, vector<2x96xf32> -> vector<2x96xf32>
    %353 = vector.broadcast %270 : vector<1x96xf32> to vector<2x96xf32>
    %354 = arith.addf %353, %352 : vector<2x96xf32>
    %cst_200 = arith.constant dense<0.000000e+00> : vector<2x96xf32>
    %355 = tpu.matmul %236, %267, %cst_200 {dimension_numbers = #tpu.dot_dimension_numbers<[1], [0], [0], [1], [0, 0, 1, 1], [], []>} : vector<2x104xf32>, vector<104x96xf32>, vector<2x96xf32> -> vector<2x96xf32>
    %356 = arith.addf %354, %355 : vector<2x96xf32>
    %cst_201 = arith.constant dense<0.000000e+00> : vector<2x96xf32>
    %357 = tpu.matmul %245, %269, %cst_201 {dimension_numbers = #tpu.dot_dimension_numbers<[1], [0], [0], [1], [0, 0, 1, 1], [], []>} : vector<2x104xf32>, vector<104x96xf32>, vector<2x96xf32> -> vector<2x96xf32>
    %358 = arith.addf %356, %357 : vector<2x96xf32>
    %cst_202 = arith.constant 0.000000e+00 : f32
    %359 = vector.broadcast %cst_202 : f32 to vector<2x96xf32>
    %360 = arith.maximumf %358, %359 : vector<2x96xf32>
    %cst_203 = arith.constant dense<0.000000e+00> : vector<2x96xf32>
    %361 = tpu.matmul %245, %265, %cst_203 {dimension_numbers = #tpu.dot_dimension_numbers<[1], [0], [0], [1], [0, 0, 1, 1], [], []>} : vector<2x104xf32>, vector<104x96xf32>, vector<2x96xf32> -> vector<2x96xf32>
    %362 = vector.broadcast %270 : vector<1x96xf32> to vector<2x96xf32>
    %363 = arith.addf %362, %361 : vector<2x96xf32>
    %cst_204 = arith.constant dense<0.000000e+00> : vector<2x96xf32>
    %364 = tpu.matmul %254, %267, %cst_204 {dimension_numbers = #tpu.dot_dimension_numbers<[1], [0], [0], [1], [0, 0, 1, 1], [], []>} : vector<2x104xf32>, vector<104x96xf32>, vector<2x96xf32> -> vector<2x96xf32>
    %365 = arith.addf %363, %364 : vector<2x96xf32>
    %cst_205 = arith.constant dense<0.000000e+00> : vector<2x96xf32>
    %366 = tpu.matmul %263, %269, %cst_205 {dimension_numbers = #tpu.dot_dimension_numbers<[1], [0], [0], [1], [0, 0, 1, 1], [], []>} : vector<2x104xf32>, vector<104x96xf32>, vector<2x96xf32> -> vector<2x96xf32>
    %367 = arith.addf %365, %366 : vector<2x96xf32>
    %cst_206 = arith.constant 0.000000e+00 : f32
    %368 = vector.broadcast %cst_206 : f32 to vector<2x96xf32>
    %369 = arith.maximumf %367, %368 : vector<2x96xf32>
    %c0_207 = arith.constant 0 : index
    %c0_208 = arith.constant 0 : index
    %c0_209 = arith.constant 0 : index
    %370 = vector.load %arg5[%c0_207, %c0_208, %c0_209] : memref<3x96x80xf32, #tpu.memory_space<vmem>>, vector<1x96x80xf32>
    %371 = vector.shape_cast %370 : vector<1x96x80xf32> to vector<96x80xf32>
    %c1_210 = arith.constant 1 : index
    %c0_211 = arith.constant 0 : index
    %c0_212 = arith.constant 0 : index
    %372 = vector.load %arg5[%c1_210, %c0_211, %c0_212] : memref<3x96x80xf32, #tpu.memory_space<vmem>>, vector<1x96x80xf32>
    %373 = vector.shape_cast %372 : vector<1x96x80xf32> to vector<96x80xf32>
    %c2_213 = arith.constant 2 : index
    %c0_214 = arith.constant 0 : index
    %c0_215 = arith.constant 0 : index
    %374 = vector.load %arg5[%c2_213, %c0_214, %c0_215] : memref<3x96x80xf32, #tpu.memory_space<vmem>>, vector<1x96x80xf32>
    %375 = vector.shape_cast %374 : vector<1x96x80xf32> to vector<96x80xf32>
    %c0_216 = arith.constant 0 : index
    %c0_217 = arith.constant 0 : index
    %376 = vector.load %arg6[%c0_216, %c0_217] : memref<1x80xf32, #tpu.memory_space<vmem>>, vector<1x80xf32>
    %cst_218 = arith.constant dense<0.000000e+00> : vector<2x80xf32>
    %377 = tpu.matmul %279, %371, %cst_218 {dimension_numbers = #tpu.dot_dimension_numbers<[1], [0], [0], [1], [0, 0, 1, 1], [], []>} : vector<2x96xf32>, vector<96x80xf32>, vector<2x80xf32> -> vector<2x80xf32>
    %378 = vector.broadcast %376 : vector<1x80xf32> to vector<2x80xf32>
    %379 = arith.addf %378, %377 : vector<2x80xf32>
    %cst_219 = arith.constant dense<0.000000e+00> : vector<2x80xf32>
    %380 = tpu.matmul %288, %373, %cst_219 {dimension_numbers = #tpu.dot_dimension_numbers<[1], [0], [0], [1], [0, 0, 1, 1], [], []>} : vector<2x96xf32>, vector<96x80xf32>, vector<2x80xf32> -> vector<2x80xf32>
    %381 = arith.addf %379, %380 : vector<2x80xf32>
    %cst_220 = arith.constant dense<0.000000e+00> : vector<2x80xf32>
    %382 = tpu.matmul %297, %375, %cst_220 {dimension_numbers = #tpu.dot_dimension_numbers<[1], [0], [0], [1], [0, 0, 1, 1], [], []>} : vector<2x96xf32>, vector<96x80xf32>, vector<2x80xf32> -> vector<2x80xf32>
    %383 = arith.addf %381, %382 : vector<2x80xf32>
    %cst_221 = arith.constant 0.000000e+00 : f32
    %384 = vector.broadcast %cst_221 : f32 to vector<2x80xf32>
    %385 = arith.maximumf %383, %384 : vector<2x80xf32>
    %cst_222 = arith.constant dense<0.000000e+00> : vector<2x80xf32>
    %386 = tpu.matmul %297, %371, %cst_222 {dimension_numbers = #tpu.dot_dimension_numbers<[1], [0], [0], [1], [0, 0, 1, 1], [], []>} : vector<2x96xf32>, vector<96x80xf32>, vector<2x80xf32> -> vector<2x80xf32>
    %387 = vector.broadcast %376 : vector<1x80xf32> to vector<2x80xf32>
    %388 = arith.addf %387, %386 : vector<2x80xf32>
    %cst_223 = arith.constant dense<0.000000e+00> : vector<2x80xf32>
    %389 = tpu.matmul %306, %373, %cst_223 {dimension_numbers = #tpu.dot_dimension_numbers<[1], [0], [0], [1], [0, 0, 1, 1], [], []>} : vector<2x96xf32>, vector<96x80xf32>, vector<2x80xf32> -> vector<2x80xf32>
    %390 = arith.addf %388, %389 : vector<2x80xf32>
    %cst_224 = arith.constant dense<0.000000e+00> : vector<2x80xf32>
    %391 = tpu.matmul %315, %375, %cst_224 {dimension_numbers = #tpu.dot_dimension_numbers<[1], [0], [0], [1], [0, 0, 1, 1], [], []>} : vector<2x96xf32>, vector<96x80xf32>, vector<2x80xf32> -> vector<2x80xf32>
    %392 = arith.addf %390, %391 : vector<2x80xf32>
    %cst_225 = arith.constant 0.000000e+00 : f32
    %393 = vector.broadcast %cst_225 : f32 to vector<2x80xf32>
    %394 = arith.maximumf %392, %393 : vector<2x80xf32>
    %cst_226 = arith.constant dense<0.000000e+00> : vector<2x80xf32>
    %395 = tpu.matmul %315, %371, %cst_226 {dimension_numbers = #tpu.dot_dimension_numbers<[1], [0], [0], [1], [0, 0, 1, 1], [], []>} : vector<2x96xf32>, vector<96x80xf32>, vector<2x80xf32> -> vector<2x80xf32>
    %396 = vector.broadcast %376 : vector<1x80xf32> to vector<2x80xf32>
    %397 = arith.addf %396, %395 : vector<2x80xf32>
    %cst_227 = arith.constant dense<0.000000e+00> : vector<2x80xf32>
    %398 = tpu.matmul %324, %373, %cst_227 {dimension_numbers = #tpu.dot_dimension_numbers<[1], [0], [0], [1], [0, 0, 1, 1], [], []>} : vector<2x96xf32>, vector<96x80xf32>, vector<2x80xf32> -> vector<2x80xf32>
    %399 = arith.addf %397, %398 : vector<2x80xf32>
    %cst_228 = arith.constant dense<0.000000e+00> : vector<2x80xf32>
    %400 = tpu.matmul %333, %375, %cst_228 {dimension_numbers = #tpu.dot_dimension_numbers<[1], [0], [0], [1], [0, 0, 1, 1], [], []>} : vector<2x96xf32>, vector<96x80xf32>, vector<2x80xf32> -> vector<2x80xf32>
    %401 = arith.addf %399, %400 : vector<2x80xf32>
    %cst_229 = arith.constant 0.000000e+00 : f32
    %402 = vector.broadcast %cst_229 : f32 to vector<2x80xf32>
    %403 = arith.maximumf %401, %402 : vector<2x80xf32>
    %cst_230 = arith.constant dense<0.000000e+00> : vector<2x80xf32>
    %404 = tpu.matmul %333, %371, %cst_230 {dimension_numbers = #tpu.dot_dimension_numbers<[1], [0], [0], [1], [0, 0, 1, 1], [], []>} : vector<2x96xf32>, vector<96x80xf32>, vector<2x80xf32> -> vector<2x80xf32>
    %405 = vector.broadcast %376 : vector<1x80xf32> to vector<2x80xf32>
    %406 = arith.addf %405, %404 : vector<2x80xf32>
    %cst_231 = arith.constant dense<0.000000e+00> : vector<2x80xf32>
    %407 = tpu.matmul %342, %373, %cst_231 {dimension_numbers = #tpu.dot_dimension_numbers<[1], [0], [0], [1], [0, 0, 1, 1], [], []>} : vector<2x96xf32>, vector<96x80xf32>, vector<2x80xf32> -> vector<2x80xf32>
    %408 = arith.addf %406, %407 : vector<2x80xf32>
    %cst_232 = arith.constant dense<0.000000e+00> : vector<2x80xf32>
    %409 = tpu.matmul %351, %375, %cst_232 {dimension_numbers = #tpu.dot_dimension_numbers<[1], [0], [0], [1], [0, 0, 1, 1], [], []>} : vector<2x96xf32>, vector<96x80xf32>, vector<2x80xf32> -> vector<2x80xf32>
    %410 = arith.addf %408, %409 : vector<2x80xf32>
    %cst_233 = arith.constant 0.000000e+00 : f32
    %411 = vector.broadcast %cst_233 : f32 to vector<2x80xf32>
    %412 = arith.maximumf %410, %411 : vector<2x80xf32>
    %cst_234 = arith.constant dense<0.000000e+00> : vector<2x80xf32>
    %413 = tpu.matmul %351, %371, %cst_234 {dimension_numbers = #tpu.dot_dimension_numbers<[1], [0], [0], [1], [0, 0, 1, 1], [], []>} : vector<2x96xf32>, vector<96x80xf32>, vector<2x80xf32> -> vector<2x80xf32>
    %414 = vector.broadcast %376 : vector<1x80xf32> to vector<2x80xf32>
    %415 = arith.addf %414, %413 : vector<2x80xf32>
    %cst_235 = arith.constant dense<0.000000e+00> : vector<2x80xf32>
    %416 = tpu.matmul %360, %373, %cst_235 {dimension_numbers = #tpu.dot_dimension_numbers<[1], [0], [0], [1], [0, 0, 1, 1], [], []>} : vector<2x96xf32>, vector<96x80xf32>, vector<2x80xf32> -> vector<2x80xf32>
    %417 = arith.addf %415, %416 : vector<2x80xf32>
    %cst_236 = arith.constant dense<0.000000e+00> : vector<2x80xf32>
    %418 = tpu.matmul %369, %375, %cst_236 {dimension_numbers = #tpu.dot_dimension_numbers<[1], [0], [0], [1], [0, 0, 1, 1], [], []>} : vector<2x96xf32>, vector<96x80xf32>, vector<2x80xf32> -> vector<2x80xf32>
    %419 = arith.addf %417, %418 : vector<2x80xf32>
    %cst_237 = arith.constant 0.000000e+00 : f32
    %420 = vector.broadcast %cst_237 : f32 to vector<2x80xf32>
    %421 = arith.maximumf %419, %420 : vector<2x80xf32>
    %422 = vector.extract_strided_slice %385 {offsets = [0, 0], sizes = [2, 48], strides = [1, 1]} : vector<2x80xf32> to vector<2x48xf32>
    %423 = vector.extract_strided_slice %385 {offsets = [0, 16], sizes = [2, 48], strides = [1, 1]} : vector<2x80xf32> to vector<2x48xf32>
    %424 = arith.maximumf %422, %423 : vector<2x48xf32>
    %425 = vector.extract_strided_slice %385 {offsets = [0, 32], sizes = [2, 48], strides = [1, 1]} : vector<2x80xf32> to vector<2x48xf32>
    %426 = arith.maximumf %424, %425 : vector<2x48xf32>
    %427 = vector.extract_strided_slice %394 {offsets = [0, 0], sizes = [2, 48], strides = [1, 1]} : vector<2x80xf32> to vector<2x48xf32>
    %428 = arith.maximumf %426, %427 : vector<2x48xf32>
    %429 = vector.extract_strided_slice %394 {offsets = [0, 16], sizes = [2, 48], strides = [1, 1]} : vector<2x80xf32> to vector<2x48xf32>
    %430 = arith.maximumf %428, %429 : vector<2x48xf32>
    %431 = vector.extract_strided_slice %394 {offsets = [0, 32], sizes = [2, 48], strides = [1, 1]} : vector<2x80xf32> to vector<2x48xf32>
    %432 = arith.maximumf %430, %431 : vector<2x48xf32>
    %433 = vector.extract_strided_slice %403 {offsets = [0, 0], sizes = [2, 48], strides = [1, 1]} : vector<2x80xf32> to vector<2x48xf32>
    %434 = arith.maximumf %432, %433 : vector<2x48xf32>
    %435 = vector.extract_strided_slice %403 {offsets = [0, 16], sizes = [2, 48], strides = [1, 1]} : vector<2x80xf32> to vector<2x48xf32>
    %436 = arith.maximumf %434, %435 : vector<2x48xf32>
    %437 = vector.extract_strided_slice %403 {offsets = [0, 32], sizes = [2, 48], strides = [1, 1]} : vector<2x80xf32> to vector<2x48xf32>
    %438 = arith.maximumf %436, %437 : vector<2x48xf32>
    %439 = vector.extract_strided_slice %394 {offsets = [0, 0], sizes = [2, 48], strides = [1, 1]} : vector<2x80xf32> to vector<2x48xf32>
    %440 = vector.extract_strided_slice %394 {offsets = [0, 16], sizes = [2, 48], strides = [1, 1]} : vector<2x80xf32> to vector<2x48xf32>
    %441 = arith.maximumf %439, %440 : vector<2x48xf32>
    %442 = vector.extract_strided_slice %394 {offsets = [0, 32], sizes = [2, 48], strides = [1, 1]} : vector<2x80xf32> to vector<2x48xf32>
    %443 = arith.maximumf %441, %442 : vector<2x48xf32>
    %444 = vector.extract_strided_slice %403 {offsets = [0, 0], sizes = [2, 48], strides = [1, 1]} : vector<2x80xf32> to vector<2x48xf32>
    %445 = arith.maximumf %443, %444 : vector<2x48xf32>
    %446 = vector.extract_strided_slice %403 {offsets = [0, 16], sizes = [2, 48], strides = [1, 1]} : vector<2x80xf32> to vector<2x48xf32>
    %447 = arith.maximumf %445, %446 : vector<2x48xf32>
    %448 = vector.extract_strided_slice %403 {offsets = [0, 32], sizes = [2, 48], strides = [1, 1]} : vector<2x80xf32> to vector<2x48xf32>
    %449 = arith.maximumf %447, %448 : vector<2x48xf32>
    %450 = vector.extract_strided_slice %412 {offsets = [0, 0], sizes = [2, 48], strides = [1, 1]} : vector<2x80xf32> to vector<2x48xf32>
    %451 = arith.maximumf %449, %450 : vector<2x48xf32>
    %452 = vector.extract_strided_slice %412 {offsets = [0, 16], sizes = [2, 48], strides = [1, 1]} : vector<2x80xf32> to vector<2x48xf32>
    %453 = arith.maximumf %451, %452 : vector<2x48xf32>
    %454 = vector.extract_strided_slice %412 {offsets = [0, 32], sizes = [2, 48], strides = [1, 1]} : vector<2x80xf32> to vector<2x48xf32>
    %455 = arith.maximumf %453, %454 : vector<2x48xf32>
    %456 = vector.extract_strided_slice %403 {offsets = [0, 0], sizes = [2, 48], strides = [1, 1]} : vector<2x80xf32> to vector<2x48xf32>
    %457 = vector.extract_strided_slice %403 {offsets = [0, 16], sizes = [2, 48], strides = [1, 1]} : vector<2x80xf32> to vector<2x48xf32>
    %458 = arith.maximumf %456, %457 : vector<2x48xf32>
    %459 = vector.extract_strided_slice %403 {offsets = [0, 32], sizes = [2, 48], strides = [1, 1]} : vector<2x80xf32> to vector<2x48xf32>
    %460 = arith.maximumf %458, %459 : vector<2x48xf32>
    %461 = vector.extract_strided_slice %412 {offsets = [0, 0], sizes = [2, 48], strides = [1, 1]} : vector<2x80xf32> to vector<2x48xf32>
    %462 = arith.maximumf %460, %461 : vector<2x48xf32>
    %463 = vector.extract_strided_slice %412 {offsets = [0, 16], sizes = [2, 48], strides = [1, 1]} : vector<2x80xf32> to vector<2x48xf32>
    %464 = arith.maximumf %462, %463 : vector<2x48xf32>
    %465 = vector.extract_strided_slice %412 {offsets = [0, 32], sizes = [2, 48], strides = [1, 1]} : vector<2x80xf32> to vector<2x48xf32>
    %466 = arith.maximumf %464, %465 : vector<2x48xf32>
    %467 = vector.extract_strided_slice %421 {offsets = [0, 0], sizes = [2, 48], strides = [1, 1]} : vector<2x80xf32> to vector<2x48xf32>
    %468 = arith.maximumf %466, %467 : vector<2x48xf32>
    %469 = vector.extract_strided_slice %421 {offsets = [0, 16], sizes = [2, 48], strides = [1, 1]} : vector<2x80xf32> to vector<2x48xf32>
    %470 = arith.maximumf %468, %469 : vector<2x48xf32>
    %471 = vector.extract_strided_slice %421 {offsets = [0, 32], sizes = [2, 48], strides = [1, 1]} : vector<2x80xf32> to vector<2x48xf32>
    %472 = arith.maximumf %470, %471 : vector<2x48xf32>
    %c0_238 = arith.constant 0 : index
    %c0_239 = arith.constant 0 : index
    %c0_240 = arith.constant 0 : index
    %473 = vector.load %arg7[%c0_238, %c0_239, %c0_240] : memref<3x48x32xf32, #tpu.memory_space<vmem>>, vector<1x48x32xf32>
    %474 = vector.shape_cast %473 : vector<1x48x32xf32> to vector<48x32xf32>
    %c1_241 = arith.constant 1 : index
    %c0_242 = arith.constant 0 : index
    %c0_243 = arith.constant 0 : index
    %475 = vector.load %arg7[%c1_241, %c0_242, %c0_243] : memref<3x48x32xf32, #tpu.memory_space<vmem>>, vector<1x48x32xf32>
    %476 = vector.shape_cast %475 : vector<1x48x32xf32> to vector<48x32xf32>
    %c2_244 = arith.constant 2 : index
    %c0_245 = arith.constant 0 : index
    %c0_246 = arith.constant 0 : index
    %477 = vector.load %arg7[%c2_244, %c0_245, %c0_246] : memref<3x48x32xf32, #tpu.memory_space<vmem>>, vector<1x48x32xf32>
    %478 = vector.shape_cast %477 : vector<1x48x32xf32> to vector<48x32xf32>
    %c0_247 = arith.constant 0 : index
    %c0_248 = arith.constant 0 : index
    %479 = vector.load %arg8[%c0_247, %c0_248] : memref<1x32xf32, #tpu.memory_space<vmem>>, vector<1x32xf32>
    %cst_249 = arith.constant dense<0.000000e+00> : vector<2x32xf32>
    %480 = tpu.matmul %438, %474, %cst_249 {dimension_numbers = #tpu.dot_dimension_numbers<[1], [0], [0], [1], [0, 0, 1, 1], [], []>} : vector<2x48xf32>, vector<48x32xf32>, vector<2x32xf32> -> vector<2x32xf32>
    %481 = vector.broadcast %479 : vector<1x32xf32> to vector<2x32xf32>
    %482 = arith.addf %481, %480 : vector<2x32xf32>
    %cst_250 = arith.constant dense<0.000000e+00> : vector<2x32xf32>
    %483 = tpu.matmul %455, %476, %cst_250 {dimension_numbers = #tpu.dot_dimension_numbers<[1], [0], [0], [1], [0, 0, 1, 1], [], []>} : vector<2x48xf32>, vector<48x32xf32>, vector<2x32xf32> -> vector<2x32xf32>
    %484 = arith.addf %482, %483 : vector<2x32xf32>
    %cst_251 = arith.constant dense<0.000000e+00> : vector<2x32xf32>
    %485 = tpu.matmul %472, %478, %cst_251 {dimension_numbers = #tpu.dot_dimension_numbers<[1], [0], [0], [1], [0, 0, 1, 1], [], []>} : vector<2x48xf32>, vector<48x32xf32>, vector<2x32xf32> -> vector<2x32xf32>
    %486 = arith.addf %484, %485 : vector<2x32xf32>
    %cst_252 = arith.constant 0.000000e+00 : f32
    %487 = vector.broadcast %cst_252 : f32 to vector<2x32xf32>
    %488 = arith.subf %487, %486 : vector<2x32xf32>
    %489 = math.exp %488 : vector<2x32xf32>
    %cst_253 = arith.constant 1.000000e+00 : f32
    %490 = vector.broadcast %cst_253 : f32 to vector<2x32xf32>
    %491 = arith.addf %490, %489 : vector<2x32xf32>
    %cst_254 = arith.constant 1.000000e+00 : f32
    %492 = vector.broadcast %cst_254 : f32 to vector<2x32xf32>
    %493 = arith.divf %492, %491 : vector<2x32xf32>
    %c0_255 = arith.constant 0 : index
    %c0_256 = arith.constant 0 : index
    %494 = vector.load %arg9[%c0_255, %c0_256] : memref<2x32xf32, #tpu.memory_space<vmem>>, vector<2x32xf32>
    tpu.vector_store %arg9[%c0_255, %c0_256], %493 {strides = array<i32>} : memref<2x32xf32, #tpu.memory_space<vmem>>, vector<2x32xf32>,
    return
  }
}

</mosaic_0001>

<bundles_post_ra>
// kernel: tile.19
= control target key start
LH: loop header
LB: loop body
LE: loop exit
PB: predicated region body
PF: predicated region fallthrough
CT: control target
= control target key end

     0   :  { %s40_s0 = inlined_call_operand.vmem [shape: f32[4], index: 0, kind: input, shape index: {}]   ;;  %s41_s1 = inlined_call_operand.vmem [shape: f32[26,4], index: 1, kind: output, shape index: {}]  }
   0x1   :  { %v4_v0 = vld [vmem:[%s40_s0] ss:$0 sm:$0xff] }
   0x2   :  { %5 = vst [vmem:[%s41_s1] sm:$0xff] %v4_v0  ;;  %12 = vst [vmem:[%s41_s1 + $0x8] sm:$0xff] %v4_v0 }
   0x3   :  { %13 = vst [vmem:[%s41_s1 + $0x10] sm:$0xff] %v4_v0  ;;  %14 = vst [vmem:[%s41_s1 + $0x18] sm:$0xff] %v4_v0 }

// kernel: tile.20
= control target key start
LH: loop header
LB: loop body
LE: loop exit
PB: predicated region body
PF: predicated region fallthrough
CT: control target
= control target key end

     0   :  { %s213_s10 = smov 100   ;;  %s214_s11 = smov 92   ;;  %vm3_vm0 = vcmask 31744   ;;  %vm9_vm1 = vcmask 851744   ;;  %vm15_vm2 = vcmask 818944   ;;  %vm21_vm3 = vcmask 786144   ;;  %s329_s0 = inlined_call_operand.vmem [shape: f32[26,4], index: 0, kind: input, shape index: {}]   ;;  %s330_s1 = inlined_call_operand.vmem [shape: f32[1,104], index: 1, kind: output, shape index: {}]  }
   0x1   :  { %v163_v0 = vld [vmem:[%s329_s0 + $0x19] sm:$0x1]   ;;  %v165_v1 = vld [vmem:[%s329_s0 + $0x17] sm:$0x1]   ;;  %v164_v2 = vld [vmem:[%s329_s0 + $0x18] sm:$0x1]  }
   0x2   :  { %7 = vrot.lane.b32.xlu0 %v163_v0, %s213_s10  ;;  %19 = vrot.lane.b32.xlu1 %v165_v1, %s214_s11  ;;  %v166_v3 = vld [vmem:[%s329_s0 + $0x16] sm:$0x1]   ;;  %s215_s16 = smov 96   ;;  %s216_s17 = smov 88   ;;  %v167_v4 = vld [vmem:[%s329_s0 + $0x15] sm:$0x1]  }
   0x3   :  { %v168_v5 = vld [vmem:[%s329_s0 + $0x14] sm:$0x1]   ;;  %s217_s22 = smov 84   ;;  %s218_s23 = smov 80   ;;  %v169_v6 = vld [vmem:[%s329_s0 + $0x13] sm:$0x1]  }
   0x4   :  { %v170_v7 = vld [vmem:[%s329_s0 + $0x12] sm:$0x1]   ;;  %v2_v8 = vld [vmem:[%s329_s0] sm:$0x1]   ;;  %s219_s30 = smov 76   ;;  %s220_s2 = smov 72  }
   0x5   :  { %v171_v9 = vld [vmem:[%s329_s0 + $0x11] sm:$0x1]   ;;  %v172_v10 = vld [vmem:[%s329_s0 + $0x10] sm:$0x1]   ;;  %4 = vst.msk [vmem:[#allocation0] sm:$0x1] %vm3_vm0, %v2_v8  }
   0x6   :  { %13 = vrot.lane.b32.xlu0 %v164_v2, %s215_s16  ;;  %25 = vrot.lane.b32.xlu1 %v166_v3, %s216_s17  ;;  %s221_s7 = smov 68   ;;  %s222_s8 = smov 64   ;;  %v173_v11 = vld [vmem:[%s329_s0 + $0xf] sm:$0x1]   ;;  %v174_v12 = vld [vmem:[%s329_s0 + $0xe] sm:$0x1]  }
   0x7   :  { %s223_s13 = smov 60   ;;  %s224_s14 = smov 56   ;;  %v175_v13 = vld [vmem:[%s329_s0 + $0xd] sm:$0x1]   ;;  %v176_v14 = vld [vmem:[%s329_s0 + $0xc] sm:$0x1]  }
   0x8   :  { %s225_s19 = smov 52   ;;  %s226_s20 = smov 48   ;;  %v177_v15 = vld [vmem:[%s329_s0 + $0xb] sm:$0x1]   ;;  %v178_v16 = vld [vmem:[%s329_s0 + $0xa] sm:$0x1]  }
   0x9   :  { %s227_s25 = smov 44   ;;  %s228_s26 = smov 40   ;;  %v179_v17 = vld [vmem:[%s329_s0 + $0x9] sm:$0x1]   ;;  %v180_v18 = vld [vmem:[%s329_s0 + $0x8] sm:$0x1]  }
   0xa   :  { %31 = vrot.lane.b32.xlu0 %v167_v4, %s217_s22  ;;  %37 = vrot.lane.b32.xlu1 %v168_v5, %s218_s23  ;;  %s230_s3 = smov 32   ;;  %v181_v19 = vld [vmem:[%s329_s0 + $0x7] sm:$0x1]   ;;  %v182_v20 = vld [vmem:[%s329_s0 + $0x6] sm:$0x1]   ;;  %s232_s9 = smov 24  }
   0xb   :  { %v183_v21 = vld [vmem:[%s329_s0 + $0x5] sm:$0x1]   ;;  %v184_v22 = vld [vmem:[%s329_s0 + $0x4] sm:$0x1]   ;;  %s234_s15 = smov 16   ;;  %s236_s21 = smov 8  }
   0xc   :  { %v185_v23 = vld [vmem:[%s329_s0 + $0x3] sm:$0x1]   ;;  %v186_v24 = vld [vmem:[%s329_s0 + $0x2] sm:$0x1]   ;;  %v187_v25 = vld [vmem:[%s329_s0 + $0x1] sm:$0x1]  }
   0xd   :  { %s237_s0 = smov 4   ;;  %vm27_vm4 = vcmask 753344   ;;  %vm33_vm5 = vcmask 720544   ;;  %vm39_vm6 = vcmask 687744   ;;  %vm45_vm7 = vcmask 654944  }
   0xe   :  { %43 = vrot.lane.b32.xlu0 %v169_v6, %s219_s30  ;;  %49 = vrot.lane.b32.xlu1 %v170_v7, %s220_s2  ;;  %s229_s2 = smov 36   ;;  %vm51_vm8 = vcmask 622144   ;;  %vm57_vm9 = vcmask 589344   ;;  %vm63_vm10 = vcmask 556544   ;;  %vm69_vm11 = vcmask 523744  }
   0xf   :  { %vm75_vm12 = vcmask 490944   ;;  %vm81_vm13 = vcmask 458144   ;;  %vm87_vm14 = vcmask 425344   ;;  %vm93_vm15 = vcmask 392544  }
  0x10   :  { %vm99_vm0 = vcmask 359744  }
  0x12   :  { %55 = vrot.lane.b32.xlu0 %v171_v9, %s221_s7  ;;  %61 = vrot.lane.b32.xlu1 %v172_v10, %s222_s8  ;;  %s231_s8 = smov 28  }
  0x16   :  { %67 = vrot.lane.b32.xlu0 %v173_v11, %s223_s13  ;;  %73 = vrot.lane.b32.xlu1 %v174_v12, %s224_s14  ;;  %s233_s14 = smov 20  }
  0x1a   :  { %79 = vrot.lane.b32.xlu0 %v175_v13, %s225_s19  ;;  %85 = vrot.lane.b32.xlu1 %v176_v14, %s226_s20  ;;  %s235_s20 = smov 12  }
  0x1e   :  { %91 = vrot.lane.b32.xlu0 %v177_v15, %s227_s25  ;;  %97 = vrot.lane.b32.xlu1 %v178_v16, %s228_s26 }
  0x22   :  { %103 = vrot.lane.b32.xlu0 %v179_v17, %s229_s2  ;;  %109 = vrot.lane.b32.xlu1 %v180_v18, %s230_s3 }
  0x26   :  { %115 = vrot.lane.b32.xlu0 %v181_v19, %s231_s8  ;;  %121 = vrot.lane.b32.xlu1 %v182_v20, %s232_s9 }
  0x2a   :  { %127 = vrot.lane.b32.xlu0 %v183_v21, %s233_s14  ;;  %133 = vrot.lane.b32.xlu1 %v184_v22, %s234_s15 }
  0x2e   :  { %139 = vrot.lane.b32.xlu0 %v185_v23, %s235_s20  ;;  %145 = vrot.lane.b32.xlu1 %v186_v24, %s236_s21 }
  0x32   :  { %151 = vrot.lane.b32.xlu0 %v187_v25, %s237_s0 }
  0x74   :  { %v8_v26 = vpop.permute.xlu0 %7   ;;  %v20_v27 = vpop.permute.xlu1 %19  }
  0x75   :  { %10 = vst.msk [vmem:[#allocation0] sm:$0x1] %vm9_vm1, %v8_v26   ;;  %vm105_vm1 = vcmask 326944  }
  0x78   :  { %v14_v28 = vpop.permute.xlu0 %13   ;;  %v26_v29 = vpop.permute.xlu1 %25  }
  0x79   :  { %16 = vst.msk [vmem:[#allocation0] sm:$0x1] %vm15_vm2, %v14_v28   ;;  %vm111_vm2 = vcmask 294144  }
  0x7a   :  { %22 = vst.msk [vmem:[#allocation0] sm:$0x1] %vm21_vm3, %v20_v27   ;;  %vm117_vm3 = vcmask 261344  }
  0x7b   :  { %28 = vst.msk [vmem:[#allocation0] sm:$0x1] %vm27_vm4, %v26_v29   ;;  %vm123_vm4 = vcmask 228544  }
  0x7c   :  { %v32_v30 = vpop.permute.xlu0 %31   ;;  %v38_v31 = vpop.permute.xlu1 %37  }
  0x7d   :  { %34 = vst.msk [vmem:[#allocation0] sm:$0x1] %vm33_vm5, %v32_v30   ;;  %vm129_vm5 = vcmask 195744  }
  0x7e   :  { %40 = vst.msk [vmem:[#allocation0] sm:$0x1] %vm39_vm6, %v38_v31   ;;  %vm135_vm6 = vcmask 162944  }
  0x80   :  { %v44_v32 = vpop.permute.xlu0 %43   ;;  %v50_v33 = vpop.permute.xlu1 %49  }
  0x81   :  { %46 = vst.msk [vmem:[#allocation0] sm:$0x1] %vm45_vm7, %v44_v32   ;;  %vm141_vm7 = vcmask 130144  }
  0x82   :  { %52 = vst.msk [vmem:[#allocation0] sm:$0x1] %vm51_vm8, %v50_v33   ;;  %vm147_vm8 = vcmask 97344  }
  0x84   :  { %v56_v34 = vpop.permute.xlu0 %55   ;;  %v62_v35 = vpop.permute.xlu1 %61  }
  0x85   :  { %58 = vst.msk [vmem:[#allocation0] sm:$0x1] %vm57_vm9, %v56_v34   ;;  %vm153_vm9 = vcmask 64544  }
  0x86   :  { %64 = vst.msk [vmem:[#allocation0] sm:$0x1] %vm63_vm10, %v62_v35  }
  0x88   :  { %v68_v36 = vpop.permute.xlu0 %67   ;;  %v74_v37 = vpop.permute.xlu1 %73  }
  0x89   :  { %70 = vst.msk [vmem:[#allocation0] sm:$0x1] %vm69_vm11, %v68_v36  }
  0x8a   :  { %76 = vst.msk [vmem:[#allocation0] sm:$0x1] %vm75_vm12, %v74_v37  }
  0x8c   :  { %v80_v38 = vpop.permute.xlu0 %79   ;;  %v86_v39 = vpop.permute.xlu1 %85  }
  0x8d   :  { %82 = vst.msk [vmem:[#allocation0] sm:$0x1] %vm81_vm13, %v80_v38  }
  0x8e   :  { %88 = vst.msk [vmem:[#allocation0] sm:$0x1] %vm87_vm14, %v86_v39  }
  0x90   :  { %v92_v40 = vpop.permute.xlu0 %91   ;;  %v98_v41 = vpop.permute.xlu1 %97  }
  0x91   :  { %94 = vst.msk [vmem:[#allocation0] sm:$0x1] %vm93_vm15, %v92_v40  }
  0x92   :  { %100 = vst.msk [vmem:[#allocation0] sm:$0x1] %vm99_vm0, %v98_v41  }
  0x94   :  { %v104_v42 = vpop.permute.xlu0 %103   ;;  %v110_v43 = vpop.permute.xlu1 %109  }
  0x95   :  { %106 = vst.msk [vmem:[#allocation0] sm:$0x1] %vm105_vm1, %v104_v42  }
  0x96   :  { %112 = vst.msk [vmem:[#allocation0] sm:$0x1] %vm111_vm2, %v110_v43  }
  0x98   :  { %v116_v44 = vpop.permute.xlu0 %115   ;;  %v122_v45 = vpop.permute.xlu1 %121  }
  0x99   :  { %118 = vst.msk [vmem:[#allocation0] sm:$0x1] %vm117_vm3, %v116_v44  }
  0x9a   :  { %124 = vst.msk [vmem:[#allocation0] sm:$0x1] %vm123_vm4, %v122_v45  }
  0x9c   :  { %v128_v46 = vpop.permute.xlu0 %127   ;;  %v134_v47 = vpop.permute.xlu1 %133  }
  0x9d   :  { %130 = vst.msk [vmem:[#allocation0] sm:$0x1] %vm129_vm5, %v128_v46  }
  0x9e   :  { %136 = vst.msk [vmem:[#allocation0] sm:$0x1] %vm135_vm6, %v134_v47  }
  0xa0   :  { %v140_v48 = vpop.permute.xlu0 %139   ;;  %v146_v49 = vpop.permute.xlu1 %145  }
  0xa1   :  { %142 = vst.msk [vmem:[#allocation0] sm:$0x1] %vm141_vm7, %v140_v48  }
  0xa2   :  { %148 = vst.msk [vmem:[#allocation0] sm:$0x1] %vm147_vm8, %v146_v49  }
  0xa4   :  { %v152_v50 = vpop.permute.xlu0 %151  }
  0xa5   :  { %154 = vst.msk [vmem:[#allocation0] sm:$0x1] %vm153_vm9, %v152_v50  }
  0xac   :  { %v159_v51 = vld [vmem:[#allocation0] sm:$0x1] }
  0xad   :  { %162 = vst [vmem:[%s330_s1] sm:$0x1] %v159_v51 }

// kernel: tile.24
= control target key start
LH: loop header
LB: loop body
LE: loop exit
PB: predicated region body
PF: predicated region fallthrough
CT: control target
= control target key end

     0   :  { %s28_s0 = inlined_call_operand.vmem [shape: f32[8], index: 0, kind: input, shape index: {}]   ;;  %s29_s1 = inlined_call_operand.vmem [shape: f32[12,8], index: 1, kind: output, shape index: {}]  }
   0x1   :  { %v4_v0 = vld [vmem:[%s28_s0] ss:$0 sm:$0xff] }
   0x2   :  { %5 = vst [vmem:[%s29_s1] sm:$0xff] %v4_v0  ;;  %8 = vst [vmem:[%s29_s1 + $0x8] sm:$0xff] %v4_v0 }

// kernel: tile.25
= control target key start
LH: loop header
LB: loop body
LE: loop exit
PB: predicated region body
PF: predicated region fallthrough
CT: control target
= control target key end

     0   :  { %s101_s10 = smov 88   ;;  %s102_s11 = smov 72   ;;  %vm3_vm0 = vcmask 64512   ;;  %vm9_vm1 = vcmask 786112   ;;  %vm15_vm2 = vcmask 720512   ;;  %vm21_vm3 = vcmask 654912   ;;  %s161_s0 = inlined_call_operand.vmem [shape: f32[12,8], index: 0, kind: input, shape index: {}]   ;;  %s162_s1 = inlined_call_operand.vmem [shape: f32[1,96], index: 1, kind: output, shape index: {}]  }
   0x1   :  { %v79_v0 = vld [vmem:[%s161_s0 + $0xb] sm:$0x1]   ;;  %v81_v1 = vld [vmem:[%s161_s0 + $0x9] sm:$0x1]   ;;  %v80_v2 = vld [vmem:[%s161_s0 + $0xa] sm:$0x1]  }
   0x2   :  { %7 = vrot.lane.b32.xlu0 %v79_v0, %s101_s10  ;;  %19 = vrot.lane.b32.xlu1 %v81_v1, %s102_s11  ;;  %v82_v3 = vld [vmem:[%s161_s0 + $0x8] sm:$0x1]   ;;  %s103_s16 = smov 80   ;;  %s104_s17 = smov 64   ;;  %v83_v4 = vld [vmem:[%s161_s0 + $0x7] sm:$0x1]  }
   0x3   :  { %v2_v5 = vld [vmem:[%s161_s0] sm:$0x1]   ;;  %v84_v6 = vld [vmem:[%s161_s0 + $0x6] sm:$0x1]   ;;  %s105_s24 = smov 56   ;;  %s106_s25 = smov 48  }
   0x4   :  { %4 = vst.msk [vmem:[#allocation0] sm:$0x1] %vm3_vm0, %v2_v5   ;;  %v85_v7 = vld [vmem:[%s161_s0 + $0x5] sm:$0x1]   ;;  %v86_v8 = vld [vmem:[%s161_s0 + $0x4] sm:$0x1]  }
   0x5   :  { %s107_s30 = smov 40   ;;  %s108_s2 = smov 32   ;;  %v87_v9 = vld [vmem:[%s161_s0 + $0x3] sm:$0x1]   ;;  %v88_v10 = vld [vmem:[%s161_s0 + $0x2] sm:$0x1]  }
   0x6   :  { %13 = vrot.lane.b32.xlu0 %v80_v2, %s103_s16  ;;  %25 = vrot.lane.b32.xlu1 %v82_v3, %s104_s17  ;;  %s109_s7 = smov 24   ;;  %s110_s8 = smov 16   ;;  %v89_v11 = vld [vmem:[%s161_s0 + $0x1] sm:$0x1]   ;;  %vm27_vm4 = vcmask 589312   ;;  %vm33_vm5 = vcmask 523712  }
   0x7   :  { %s111_s0 = smov 8   ;;  %vm39_vm6 = vcmask 458112   ;;  %vm45_vm7 = vcmask 392512   ;;  %vm51_vm8 = vcmask 326912   ;;  %vm57_vm9 = vcmask 261312  }
   0x8   :  { %vm63_vm10 = vcmask 195712   ;;  %vm69_vm11 = vcmask 130112  }
   0xa   :  { %31 = vrot.lane.b32.xlu0 %v83_v4, %s105_s24  ;;  %37 = vrot.lane.b32.xlu1 %v84_v6, %s106_s25 }
   0xe   :  { %43 = vrot.lane.b32.xlu0 %v85_v7, %s107_s30  ;;  %49 = vrot.lane.b32.xlu1 %v86_v8, %s108_s2 }
  0x12   :  { %55 = vrot.lane.b32.xlu0 %v87_v9, %s109_s7  ;;  %61 = vrot.lane.b32.xlu1 %v88_v10, %s110_s8 }
  0x16   :  { %67 = vrot.lane.b32.xlu0 %v89_v11, %s111_s0 }
  0x74   :  { %v8_v12 = vpop.permute.xlu0 %7   ;;  %v20_v13 = vpop.permute.xlu1 %19  }
  0x75   :  { %10 = vst.msk [vmem:[#allocation0] sm:$0x1] %vm9_vm1, %v8_v12  }
  0x78   :  { %v14_v14 = vpop.permute.xlu0 %13   ;;  %v26_v15 = vpop.permute.xlu1 %25  }
  0x79   :  { %16 = vst.msk [vmem:[#allocation0] sm:$0x1] %vm15_vm2, %v14_v14  }
  0x7a   :  { %22 = vst.msk [vmem:[#allocation0] sm:$0x1] %vm21_vm3, %v20_v13  }
  0x7b   :  { %28 = vst.msk [vmem:[#allocation0] sm:$0x1] %vm27_vm4, %v26_v15  }
  0x7c   :  { %v32_v16 = vpop.permute.xlu0 %31   ;;  %v38_v17 = vpop.permute.xlu1 %37  }
  0x7d   :  { %34 = vst.msk [vmem:[#allocation0] sm:$0x1] %vm33_vm5, %v32_v16  }
  0x7e   :  { %40 = vst.msk [vmem:[#allocation0] sm:$0x1] %vm39_vm6, %v38_v17  }
  0x80   :  { %v44_v18 = vpop.permute.xlu0 %43   ;;  %v50_v19 = vpop.permute.xlu1 %49  }
  0x81   :  { %46 = vst.msk [vmem:[#allocation0] sm:$0x1] %vm45_vm7, %v44_v18  }
  0x82   :  { %52 = vst.msk [vmem:[#allocation0] sm:$0x1] %vm51_vm8, %v50_v19  }
  0x84   :  { %v56_v20 = vpop.permute.xlu0 %55   ;;  %v62_v21 = vpop.permute.xlu1 %61  }
  0x85   :  { %58 = vst.msk [vmem:[#allocation0] sm:$0x1] %vm57_vm9, %v56_v20  }
  0x86   :  { %64 = vst.msk [vmem:[#allocation0] sm:$0x1] %vm63_vm10, %v62_v21  }
  0x88   :  { %v68_v22 = vpop.permute.xlu0 %67  }
  0x89   :  { %70 = vst.msk [vmem:[#allocation0] sm:$0x1] %vm69_vm11, %v68_v22  }
  0x90   :  { %v75_v23 = vld [vmem:[#allocation0] sm:$0x1] }
  0x91   :  { %78 = vst [vmem:[%s162_s1] sm:$0x1] %v75_v23 }

// kernel: tile.29
= control target key start
LH: loop header
LB: loop body
LE: loop exit
PB: predicated region body
PF: predicated region fallthrough
CT: control target
= control target key end

     0   :  { %s22_s0 = inlined_call_operand.vmem [shape: f32[16], index: 0, kind: input, shape index: {}]   ;;  %s23_s1 = inlined_call_operand.vmem [shape: f32[5,16], index: 1, kind: output, shape index: {}]  }
   0x1   :  { %v4_v0 = vld [vmem:[%s22_s0] ss:$0 sm:$0xff] }
   0x2   :  { %5 = vst [vmem:[%s23_s1] sm:$0xff] %v4_v0 }

// kernel: tile.30
= control target key start
LH: loop header
LB: loop body
LE: loop exit
PB: predicated region body
PF: predicated region fallthrough
CT: control target
= control target key end

     0   :  { %s45_s10 = smov 64   ;;  %s46_s11 = smov 32   ;;  %vm3_vm0 = vcmask 130048   ;;  %vm9_vm1 = vcmask 654848   ;;  %vm15_vm2 = vcmask 523648   ;;  %vm21_vm3 = vcmask 392448   ;;  %s77_s0 = inlined_call_operand.vmem [shape: f32[5,16], index: 0, kind: input, shape index: {}]   ;;  %s78_s1 = inlined_call_operand.vmem [shape: f32[1,80], index: 1, kind: output, shape index: {}]  }
   0x1   :  { %v37_v0 = vld [vmem:[%s77_s0 + $0x4] sm:$0x1]   ;;  %v39_v1 = vld [vmem:[%s77_s0 + $0x2] sm:$0x1]   ;;  %v38_v2 = vld [vmem:[%s77_s0 + $0x3] sm:$0x1]  }
   0x2   :  { %7 = vrot.lane.b32.xlu0 %v37_v0, %s45_s10  ;;  %19 = vrot.lane.b32.xlu1 %v39_v1, %s46_s11  ;;  %v40_v3 = vld [vmem:[%s77_s0 + $0x1] sm:$0x1]   ;;  %v2_v4 = vld [vmem:[%s77_s0] sm:$0x1]   ;;  %s47_s0 = smov 48   ;;  %s48_s18 = smov 16  }
   0x3   :  { %4 = vst.msk [vmem:[#allocation0] sm:$0x1] %vm3_vm0, %v2_v4   ;;  %vm27_vm4 = vcmask 261248  }
   0x6   :  { %13 = vrot.lane.b32.xlu0 %v38_v2, %s47_s0  ;;  %25 = vrot.lane.b32.xlu1 %v40_v3, %s48_s18 }
  0x74   :  { %v8_v5 = vpop.permute.xlu0 %7   ;;  %v20_v6 = vpop.permute.xlu1 %19  }
  0x75   :  { %10 = vst.msk [vmem:[#allocation0] sm:$0x1] %vm9_vm1, %v8_v5  }
  0x78   :  { %v14_v7 = vpop.permute.xlu0 %13   ;;  %v26_v8 = vpop.permute.xlu1 %25  }
  0x79   :  { %16 = vst.msk [vmem:[#allocation0] sm:$0x1] %vm15_vm2, %v14_v7  }
  0x7a   :  { %22 = vst.msk [vmem:[#allocation0] sm:$0x1] %vm21_vm3, %v20_v6  }
  0x7b   :  { %28 = vst.msk [vmem:[#allocation0] sm:$0x1] %vm27_vm4, %v26_v8  }
  0x82   :  { %v33_v9 = vld [vmem:[#allocation0] sm:$0x1] }
  0x83   :  { %36 = vst [vmem:[%s78_s1] sm:$0x1] %v33_v9 }

// kernel: encoder_forward.1
= control target key start
LH: loop header
LB: loop body
LE: loop exit
PB: predicated region body
PF: predicated region fallthrough
CT: control target
= control target key end

     0   :  { %vm101_vm0 = vcmask 1043456   ;;  %v12623_v2 = vmov 0.0   ;;  %vm97_vm1 = vcmask 228352   ;;  %s15939_s0 = inlined_call_operand.vmem [shape: f32[28,2,28], index: 0, kind: input, shape index: {}]   ;;  %s15940_s1 = inlined_call_operand.vmem [shape: f32[3,28,104], index: 1, kind: input, shape index: {}]   ;;  %s15941_s2 = inlined_call_operand.vmem [shape: f32[1,104], index: 2, kind: input, shape index: {}]   ;;  %s15942_s3 = inlined_call_operand.vmem [shape: f32[3,104,96], index: 3, kind: input, shape index: {}]   ;;  %s15943_s4 = inlined_call_operand.vmem [shape: f32[1,96], index: 4, kind: input, shape index: {}]   ;;  %s15944_s5 = inlined_call_operand.vmem [shape: f32[3,96,80], index: 5, kind: input, shape index: {}]   ;;  %s15945_s6 = inlined_call_operand.vmem [shape: f32[1,80], index: 6, kind: input, shape index: {}]   ;;  %s15946_s7 = inlined_call_operand.vmem [shape: f32[3,48,32], index: 7, kind: input, shape index: {}]   ;;  %s15947_s8 = inlined_call_operand.vmem [shape: f32[1,32], index: 8, kind: input, shape index: {}]   ;;  %s15948_s9 = inlined_call_operand.hbm [shape: f32[2,32], index: 9, kind: output, shape index: {}]  }
   0x1   :  { %v12681_v0 = vld [vmem:[%s15940_s1 + $0x18] sm:$0xf]  ;;  %10373 = vmatprep.subr.mxu0 %v12623_v2  ;;  %10384 = vmatprep.subr.mxu1 %v12623_v2  ;;  %v12693_v3 = vld [vmem:[%s15940_s1 + $0x10] sm:$0xff]  ;;  %v12709_v5 = vld [vmem:[%s15940_s1 + $0x8] sm:$0xff] }
   0x2   :  { %v12686_v1 = vld [vmem:[%s15940_s1 + $0x38] sm:$0xf]  ;;  %v12698_v4 = vld [vmem:[%s15940_s1 + $0x30] sm:$0xff]  ;;  %10374 = vmatpush3.msk.msra.mxu0 %vm101_vm0, %v12681_v0  ;;  %v12714_v6 = vld [vmem:[%s15940_s1 + $0x28] sm:$0xff] }
   0x3   :  { %10385 = vmatpush3.msk.msra.mxu1 %vm101_vm0, %v12686_v1  ;;  %10375 = vmatprep.subr.mxu0 %v12623_v2  ;;  %v12723_v7 = vld [vmem:[%s15940_s1] sm:$0xff] }
   0x4   :  { %10386 = vmatprep.subr.mxu1 %v12623_v2  ;;  %10376 = vmatpush3.msra.mxu0 %v12693_v3  ;;  %v12730_v8 = vld [vmem:[%s15940_s1 + $0x20] sm:$0xff] }
   0x5   :  { %10387 = vmatpush3.msra.mxu1 %v12698_v4  ;;  %10377 = vmatprep.subr.mxu0 %v12623_v2  ;;  %v33_v9 = vld [vmem:[%s15939_s0] sm:$0x3]  ;;  %v9063_v10 = vld [vmem:[%s15939_s0 + $0x2] sm:$0x3] }
   0x6   :  { %10388 = vmatprep.subr.mxu1 %v12623_v2  ;;  %10378 = vmatpush3.msra.mxu0 %v12709_v5 }
   0x7   :  { %10389 = vmatpush3.msra.mxu1 %v12714_v6  ;;  %10379 = vmatprep.subr.mxu0 %v12623_v2 }
   0x8   :  { %10390 = vmatprep.subr.mxu1 %v12623_v2 }
   0x9   :  { %14 = vsyncpa [#allocation3], 0  ;;  %10380 = vmatpush3.msra.mxu0 %v12723_v7  ;;  %vm12624_vm2 = vmmov 0   ;;  %10391 = vmatpush3.msra.mxu1 %v12730_v8  ;;  %v12749_v11 = vld [vmem:[%s15940_s1 + $0x58] sm:$0xf]  ;;  %v12758_v12 = vld [vmem:[%s15940_s1 + $0x50] sm:$0xff] }
   0xa   :  { %10381 = vmatprep.mubr.msk.f32.mxu0 %vm12624_vm2, %v12623_v2  ;;  %10392 = vmatprep.mubr.msk.f32.mxu1 %vm12624_vm2, %v12623_v2  ;;  %v12769_v13 = vld [vmem:[%s15940_s1 + $0x48] sm:$0xff]  ;;  %v12778_v14 = vld [vmem:[%s15940_s1 + $0x40] sm:$0xff]  ;;  %v9070_v21 = vld [vmem:[%s15939_s0 + $0x10] sm:$0x3]  ;;  %vm5153_vm3 = vcmask 850944   ;;  %vm7622_vm4 = vcmask 785408  }
   0xb   :  { %10382 = vmatmul.mubr.msk.f32.vlgmr.msra.gmra.mxu0 %vm97_vm1, %v33_v9  ;;  %10393 = vmatmul.mubr.msk.f32.vlgmr.msra.gmra.mxu1 %vm97_vm1, %v9063_v10  ;;  %v9064_v15 = vld [vmem:[%s15939_s0 + $0x4] sm:$0x3]  ;;  %v9065_v16 = vld [vmem:[%s15939_s0 + $0x6] sm:$0x3]  ;;  %v9066_v17 = vld [vmem:[%s15939_s0 + $0x8] sm:$0x3] }
   0xc   :  { %10395 = vmatprep.subr.mxu0 %v12623_v2  ;;  %10406 = vmatprep.subr.mxu1 %v12623_v2  ;;  %v9067_v18 = vld [vmem:[%s15939_s0 + $0xa] sm:$0x3]  ;;  %v9068_v19 = vld [vmem:[%s15939_s0 + $0xc] sm:$0x3]  ;;  %v9069_v20 = vld [vmem:[%s15939_s0 + $0xe] sm:$0x3] }
   0xd   :  { %10396 = vmatpush3.msk.msra.mxu0 %vm101_vm0, %v12749_v11  ;;  %10407 = vmatpush3.msk.msra.mxu1 %vm101_vm0, %v12681_v0  ;;  %v9071_v22 = vld [vmem:[%s15939_s0 + $0x12] sm:$0x3]  ;;  %v9072_v23 = vld [vmem:[%s15939_s0 + $0x14] sm:$0x3]  ;;  %v9073_v24 = vld [vmem:[%s15939_s0 + $0x16] sm:$0x3] }
   0xe   :  { %10397 = vmatprep.subr.mxu0 %v12623_v2  ;;  %10408 = vmatprep.subr.mxu1 %v12623_v2  ;;  %v9074_v25 = vld [vmem:[%s15939_s0 + $0x18] sm:$0x3]  ;;  %v9075_v26 = vld [vmem:[%s15939_s0 + $0x1a] sm:$0x3]  ;;  %v9076_v27 = vld [vmem:[%s15939_s0 + $0x1c] sm:$0x3] }
   0xf   :  { %10398 = vmatpush3.msra.mxu0 %v12758_v12  ;;  %10409 = vmatpush3.msra.mxu1 %v12693_v3  ;;  %v13266_v28 = vld [vmem:[%s15941_s2] ss:$0 sm:$0xff]  ;;  %v9077_v35 = vld [vmem:[%s15939_s0 + $0x1e] sm:$0x3]  ;;  %v13360_v49 = vld [vmem:[%s15940_s1 + $0x38] sm:$0xf] }
  0x10   :  { %10399 = vmatprep.subr.mxu0 %v12623_v2  ;;  %10410 = vmatprep.subr.mxu1 %v12623_v2  ;;  %v13344_v48 = vld [vmem:[%s15939_s0 + $0x20] sm:$0x3]  ;;  %v13372_v53 = vld [vmem:[%s15940_s1 + $0x30] sm:$0xff]  ;;  %v13381_v57 = vld [vmem:[%s15940_s1 + $0x28] sm:$0xff]  ;;  %s12625_s17 = smov 112   ;;  %s12626_s18 = smov 96  }
  0x11   :  { %10400 = vmatpush3.msra.mxu0 %v12769_v13  ;;  %10411 = vmatpush3.msra.mxu1 %v12709_v5  ;;  %v13390_v58 = vld [vmem:[%s15939_s0 + $0x22] sm:$0x3]  ;;  %v13412_v60 = vld [vmem:[%s15940_s1 + $0x18] sm:$0xf]  ;;  %vm8812_vm5 = vcmask 392192   ;;  %s12627_s26 = smov [#allocation2]  }
  0x12   :  { %10401 = vmatprep.subr.mxu0 %v12623_v2  ;;  %10412 = vmatprep.subr.mxu1 %v12623_v2  ;;  %v13395_v59 = vld [vmem:[%s15940_s1 + $0x20] sm:$0xff]  ;;  %vm9047_vm6 = vcmask 254976  }
  0x13   :  { %10402 = vmatpush3.msra.mxu0 %v12778_v14  ;;  %10403 = vmatprep.mubr.msk.f32.mxu0 %vm12624_vm2, %v12623_v2 }
  0x14   :  { %10413 = vmatpush3.msra.mxu1 %v12723_v7  ;;  %10414 = vmatprep.mubr.msk.f32.mxu1 %vm12624_vm2, %v12623_v2 }
  0x15   :  { %10404 = vmatmul.mubr.msk.f32.vlgmr.msra.gmra.mxu0 %vm97_vm1, %v9064_v15  ;;  %10415 = vmatmul.mubr.msk.f32.vlgmr.msra.gmra.mxu1 %vm97_vm1, %v9063_v10 }
  0x16   :  { %10417 = vmatprep.subr.mxu0 %v12623_v2  ;;  %10428 = vmatprep.subr.mxu1 %v12623_v2 }
  0x17   :  { %10418 = vmatpush3.msk.msra.mxu0 %vm101_vm0, %v12686_v1  ;;  %10429 = vmatpush3.msk.msra.mxu1 %vm101_vm0, %v12749_v11 }
  0x18   :  { %10419 = vmatprep.subr.mxu0 %v12623_v2  ;;  %10430 = vmatprep.subr.mxu1 %v12623_v2 }
  0x19   :  { %10420 = vmatpush3.msra.mxu0 %v12698_v4  ;;  %10431 = vmatpush3.msra.mxu1 %v12758_v12 }
  0x1a   :  { %10421 = vmatprep.subr.mxu0 %v12623_v2  ;;  %10432 = vmatprep.subr.mxu1 %v12623_v2 }
  0x1b   :  { %10422 = vmatpush3.msra.mxu0 %v12714_v6  ;;  %10433 = vmatpush3.msra.mxu1 %v12769_v13 }
  0x1c   :  { %10423 = vmatprep.subr.mxu0 %v12623_v2  ;;  %10434 = vmatprep.subr.mxu1 %v12623_v2 }
  0x1d   :  { %10424 = vmatpush3.msra.mxu0 %v12730_v8  ;;  %10425 = vmatprep.mubr.msk.f32.mxu0 %vm12624_vm2, %v12623_v2 }
  0x1e   :  { %10435 = vmatpush3.msra.mxu1 %v12778_v14  ;;  %10436 = vmatprep.mubr.msk.f32.mxu1 %vm12624_vm2, %v12623_v2 }
  0x1f   :  { %10426 = vmatmul.mubr.msk.f32.vlgmr.msra.gmra.mxu0 %vm97_vm1, %v9064_v15  ;;  %10437 = vmatmul.mubr.msk.f32.vlgmr.msra.gmra.mxu1 %vm97_vm1, %v9065_v16 }
  0x20   :  { %10439 = vmatprep.subr.mxu0 %v12623_v2  ;;  %10450 = vmatprep.subr.mxu1 %v12623_v2 }
  0x21   :  { %10440 = vmatpush3.msk.msra.mxu0 %vm101_vm0, %v12681_v0  ;;  %10451 = vmatpush3.msk.msra.mxu1 %vm101_vm0, %v12686_v1 }
  0x22   :  { %10441 = vmatprep.subr.mxu0 %v12623_v2  ;;  %10452 = vmatprep.subr.mxu1 %v12623_v2 }
  0x23   :  { %10442 = vmatpush3.msra.mxu0 %v12693_v3  ;;  %10453 = vmatpush3.msra.mxu1 %v12698_v4 }
  0x24   :  { %10443 = vmatprep.subr.mxu0 %v12623_v2  ;;  %10454 = vmatprep.subr.mxu1 %v12623_v2 }
  0x25   :  { %10444 = vmatpush3.msra.mxu0 %v12709_v5  ;;  %10455 = vmatpush3.msra.mxu1 %v12714_v6 }
  0x26   :  { %10445 = vmatprep.subr.mxu0 %v12623_v2  ;;  %10456 = vmatprep.subr.mxu1 %v12623_v2 }
  0x27   :  { %10446 = vmatpush3.msra.mxu0 %v12723_v7  ;;  %10447 = vmatprep.mubr.msk.f32.mxu0 %vm12624_vm2, %v12623_v2 }
  0x28   :  { %10457 = vmatpush3.msra.mxu1 %v12730_v8  ;;  %10458 = vmatprep.mubr.msk.f32.mxu1 %vm12624_vm2, %v12623_v2 }
  0x29   :  { %10448 = vmatmul.mubr.msk.f32.vlgmr.msra.gmra.mxu0 %vm97_vm1, %v9064_v15  ;;  %10459 = vmatmul.mubr.msk.f32.vlgmr.msra.gmra.mxu1 %vm97_vm1, %v9065_v16  ;;  %v13483_v15 = vld [vmem:[%s15940_s1 + $0x48] sm:$0xff] }
  0x2a   :  { %10461 = vmatprep.subr.mxu0 %v12623_v2  ;;  %10472 = vmatprep.subr.mxu1 %v12623_v2 }
  0x2b   :  { %10462 = vmatpush3.msk.msra.mxu0 %vm101_vm0, %v12749_v11  ;;  %10473 = vmatpush3.msk.msra.mxu1 %vm101_vm0, %v12681_v0 }
  0x2c   :  { %10463 = vmatprep.subr.mxu0 %v12623_v2  ;;  %10474 = vmatprep.subr.mxu1 %v12623_v2 }
  0x2d   :  { %10464 = vmatpush3.msra.mxu0 %v12758_v12  ;;  %10475 = vmatpush3.msra.mxu1 %v12693_v3 }
  0x2e   :  { %10465 = vmatprep.subr.mxu0 %v12623_v2  ;;  %10476 = vmatprep.subr.mxu1 %v12623_v2 }
  0x2f   :  { %10466 = vmatpush3.msra.mxu0 %v12769_v13  ;;  %10477 = vmatpush3.msra.mxu1 %v12709_v5 }
  0x30   :  { %10467 = vmatprep.subr.mxu0 %v12623_v2  ;;  %10478 = vmatprep.subr.mxu1 %v12623_v2 }
  0x31   :  { %10468 = vmatpush3.msra.mxu0 %v12778_v14  ;;  %10469 = vmatprep.mubr.msk.f32.mxu0 %vm12624_vm2, %v12623_v2 }
  0x32   :  { %10479 = vmatpush3.msra.mxu1 %v12723_v7  ;;  %10480 = vmatprep.mubr.msk.f32.mxu1 %vm12624_vm2, %v12623_v2 }
  0x33   :  { %10470 = vmatmul.mubr.msk.f32.vlgmr.msra.gmra.mxu0 %vm97_vm1, %v9066_v17  ;;  %10481 = vmatmul.mubr.msk.f32.vlgmr.msra.gmra.mxu1 %vm97_vm1, %v9065_v16  ;;  %v9080_v16 = vld [vmem:[%s15939_s0 + $0x24] sm:$0x3] }
  0x34   :  { %10483 = vmatprep.subr.mxu0 %v12623_v2  ;;  %10494 = vmatprep.subr.mxu1 %v12623_v2 }
  0x35   :  { %10484 = vmatpush3.msk.msra.mxu0 %vm101_vm0, %v12686_v1  ;;  %10495 = vmatpush3.msk.msra.mxu1 %vm101_vm0, %v12749_v11 }
  0x36   :  { %10485 = vmatprep.subr.mxu0 %v12623_v2  ;;  %10496 = vmatprep.subr.mxu1 %v12623_v2 }
  0x37   :  { %10486 = vmatpush3.msra.mxu0 %v12698_v4  ;;  %10497 = vmatpush3.msra.mxu1 %v12758_v12 }
  0x38   :  { %10487 = vmatprep.subr.mxu0 %v12623_v2  ;;  %10498 = vmatprep.subr.mxu1 %v12623_v2 }
  0x39   :  { %10488 = vmatpush3.msra.mxu0 %v12714_v6  ;;  %10499 = vmatpush3.msra.mxu1 %v12769_v13 }
  0x3a   :  { %10489 = vmatprep.subr.mxu0 %v12623_v2  ;;  %10500 = vmatprep.subr.mxu1 %v12623_v2 }
  0x3b   :  { %10490 = vmatpush3.msra.mxu0 %v12730_v8  ;;  %10491 = vmatprep.mubr.msk.f32.mxu0 %vm12624_vm2, %v12623_v2 }
  0x3c   :  { %10501 = vmatpush3.msra.mxu1 %v12778_v14  ;;  %10502 = vmatprep.mubr.msk.f32.mxu1 %vm12624_vm2, %v12623_v2 }
  0x3d   :  { %10492 = vmatmul.mubr.msk.f32.vlgmr.msra.gmra.mxu0 %vm97_vm1, %v9066_v17  ;;  %10503 = vmatmul.mubr.msk.f32.vlgmr.msra.gmra.mxu1 %vm97_vm1, %v9067_v18 }
  0x3e   :  { %10505 = vmatprep.subr.mxu0 %v12623_v2  ;;  %10516 = vmatprep.subr.mxu1 %v12623_v2 }
  0x3f   :  { %10506 = vmatpush3.msk.msra.mxu0 %vm101_vm0, %v12681_v0  ;;  %10517 = vmatpush3.msk.msra.mxu1 %vm101_vm0, %v12686_v1 }
  0x40   :  { %10507 = vmatprep.subr.mxu0 %v12623_v2  ;;  %10518 = vmatprep.subr.mxu1 %v12623_v2 }
  0x41   :  { %10508 = vmatpush3.msra.mxu0 %v12693_v3  ;;  %10519 = vmatpush3.msra.mxu1 %v12698_v4 }
  0x42   :  { %10509 = vmatprep.subr.mxu0 %v12623_v2  ;;  %10520 = vmatprep.subr.mxu1 %v12623_v2 }
  0x43   :  { %10510 = vmatpush3.msra.mxu0 %v12709_v5  ;;  %10521 = vmatpush3.msra.mxu1 %v12714_v6 }
  0x44   :  { %10511 = vmatprep.subr.mxu0 %v12623_v2  ;;  %10522 = vmatprep.subr.mxu1 %v12623_v2 }
  0x45   :  { %10512 = vmatpush3.msra.mxu0 %v12723_v7  ;;  %10513 = vmatprep.mubr.msk.f32.mxu0 %vm12624_vm2, %v12623_v2 }
  0x46   :  { %10523 = vmatpush3.msra.mxu1 %v12730_v8  ;;  %10524 = vmatprep.mubr.msk.f32.mxu1 %vm12624_vm2, %v12623_v2 }
  0x47   :  { %10514 = vmatmul.mubr.msk.f32.vlgmr.msra.gmra.mxu0 %vm97_vm1, %v9066_v17  ;;  %10525 = vmatmul.mubr.msk.f32.vlgmr.msra.gmra.mxu1 %vm97_vm1, %v9067_v18  ;;  %v13495_v17 = vld [vmem:[%s15940_s1 + $0x40] sm:$0xff] }
  0x48   :  { %10527 = vmatprep.subr.mxu0 %v12623_v2  ;;  %10538 = vmatprep.subr.mxu1 %v12623_v2 }
  0x49   :  { %10528 = vmatpush3.msk.msra.mxu0 %vm101_vm0, %v12749_v11  ;;  %10539 = vmatpush3.msk.msra.mxu1 %vm101_vm0, %v12681_v0 }
  0x4a   :  { %10529 = vmatprep.subr.mxu0 %v12623_v2  ;;  %10540 = vmatprep.subr.mxu1 %v12623_v2 }
  0x4b   :  { %10530 = vmatpush3.msra.mxu0 %v12758_v12  ;;  %10541 = vmatpush3.msra.mxu1 %v12693_v3 }
  0x4c   :  { %10531 = vmatprep.subr.mxu0 %v12623_v2  ;;  %10542 = vmatprep.subr.mxu1 %v12623_v2 }
  0x4d   :  { %10532 = vmatpush3.msra.mxu0 %v12769_v13  ;;  %10543 = vmatpush3.msra.mxu1 %v12709_v5 }
  0x4e   :  { %10533 = vmatprep.subr.mxu0 %v12623_v2  ;;  %10544 = vmatprep.subr.mxu1 %v12623_v2 }
  0x4f   :  { %10534 = vmatpush3.msra.mxu0 %v12778_v14  ;;  %10535 = vmatprep.mubr.msk.f32.mxu0 %vm12624_vm2, %v12623_v2 }
  0x50   :  { %10545 = vmatpush3.msra.mxu1 %v12723_v7  ;;  %10546 = vmatprep.mubr.msk.f32.mxu1 %vm12624_vm2, %v12623_v2 }
  0x51   :  { %10536 = vmatmul.mubr.msk.f32.vlgmr.msra.gmra.mxu0 %vm97_vm1, %v9068_v19  ;;  %10547 = vmatmul.mubr.msk.f32.vlgmr.msra.gmra.mxu1 %vm97_vm1, %v9067_v18 }
  0x52   :  { %10549 = vmatprep.subr.mxu0 %v12623_v2  ;;  %10560 = vmatprep.subr.mxu1 %v12623_v2 }
  0x53   :  { %10550 = vmatpush3.msk.msra.mxu0 %vm101_vm0, %v12686_v1  ;;  %10561 = vmatpush3.msk.msra.mxu1 %vm101_vm0, %v12749_v11 }
  0x54   :  { %10551 = vmatprep.subr.mxu0 %v12623_v2  ;;  %10562 = vmatprep.subr.mxu1 %v12623_v2 }
  0x55   :  { %10552 = vmatpush3.msra.mxu0 %v12698_v4  ;;  %10563 = vmatpush3.msra.mxu1 %v12758_v12 }
  0x56   :  { %10553 = vmatprep.subr.mxu0 %v12623_v2  ;;  %10564 = vmatprep.subr.mxu1 %v12623_v2 }
  0x57   :  { %10554 = vmatpush3.msra.mxu0 %v12714_v6  ;;  %10565 = vmatpush3.msra.mxu1 %v12769_v13 }
  0x58   :  { %10555 = vmatprep.subr.mxu0 %v12623_v2  ;;  %10566 = vmatprep.subr.mxu1 %v12623_v2 }
  0x59   :  { %10556 = vmatpush3.msra.mxu0 %v12730_v8  ;;  %10557 = vmatprep.mubr.msk.f32.mxu0 %vm12624_vm2, %v12623_v2 }
  0x5a   :  { %10567 = vmatpush3.msra.mxu1 %v12778_v14  ;;  %10568 = vmatprep.mubr.msk.f32.mxu1 %vm12624_vm2, %v12623_v2 }
  0x5b   :  { %10558 = vmatmul.mubr.msk.f32.vlgmr.msra.gmra.mxu0 %vm97_vm1, %v9068_v19  ;;  %10569 = vmatmul.mubr.msk.f32.vlgmr.msra.gmra.mxu1 %vm97_vm1, %v9069_v20 }
  0x5c   :  { %10571 = vmatprep.subr.mxu0 %v12623_v2  ;;  %10582 = vmatprep.subr.mxu1 %v12623_v2 }
  0x5d   :  { %10572 = vmatpush3.msk.msra.mxu0 %vm101_vm0, %v12681_v0  ;;  %10583 = vmatpush3.msk.msra.mxu1 %vm101_vm0, %v12686_v1 }
  0x5e   :  { %10573 = vmatprep.subr.mxu0 %v12623_v2  ;;  %10584 = vmatprep.subr.mxu1 %v12623_v2 }
  0x5f   :  { %10574 = vmatpush3.msra.mxu0 %v12693_v3  ;;  %10585 = vmatpush3.msra.mxu1 %v12698_v4 }
  0x60   :  { %10575 = vmatprep.subr.mxu0 %v12623_v2  ;;  %10586 = vmatprep.subr.mxu1 %v12623_v2 }
  0x61   :  { %10576 = vmatpush3.msra.mxu0 %v12709_v5  ;;  %10587 = vmatpush3.msra.mxu1 %v12714_v6 }
  0x62   :  { %10577 = vmatprep.subr.mxu0 %v12623_v2  ;;  %10588 = vmatprep.subr.mxu1 %v12623_v2 }
  0x63   :  { %10578 = vmatpush3.msra.mxu0 %v12723_v7  ;;  %10579 = vmatprep.mubr.msk.f32.mxu0 %vm12624_vm2, %v12623_v2 }
  0x64   :  { %10589 = vmatpush3.msra.mxu1 %v12730_v8  ;;  %10590 = vmatprep.mubr.msk.f32.mxu1 %vm12624_vm2, %v12623_v2 }
  0x65   :  { %10580 = vmatmul.mubr.msk.f32.vlgmr.msra.gmra.mxu0 %vm97_vm1, %v9068_v19  ;;  %10591 = vmatmul.mubr.msk.f32.vlgmr.msra.gmra.mxu1 %vm97_vm1, %v9069_v20 }
  0x66   :  { %10593 = vmatprep.subr.mxu0 %v12623_v2  ;;  %10604 = vmatprep.subr.mxu1 %v12623_v2 }
  0x67   :  { %10594 = vmatpush3.msk.msra.mxu0 %vm101_vm0, %v12749_v11  ;;  %10605 = vmatpush3.msk.msra.mxu1 %vm101_vm0, %v12681_v0 }
  0x68   :  { %10595 = vmatprep.subr.mxu0 %v12623_v2  ;;  %10606 = vmatprep.subr.mxu1 %v12623_v2 }
  0x69   :  { %10596 = vmatpush3.msra.mxu0 %v12758_v12  ;;  %10607 = vmatpush3.msra.mxu1 %v12693_v3 }
  0x6a   :  { %10597 = vmatprep.subr.mxu0 %v12623_v2  ;;  %10608 = vmatprep.subr.mxu1 %v12623_v2 }
  0x6b   :  { %10598 = vmatpush3.msra.mxu0 %v12769_v13  ;;  %10609 = vmatpush3.msra.mxu1 %v12709_v5 }
  0x6c   :  { %10599 = vmatprep.subr.mxu0 %v12623_v2  ;;  %10610 = vmatprep.subr.mxu1 %v12623_v2 }
  0x6d   :  { %10600 = vmatpush3.msra.mxu0 %v12778_v14  ;;  %10601 = vmatprep.mubr.msk.f32.mxu0 %vm12624_vm2, %v12623_v2 }
  0x6e   :  { %10611 = vmatpush3.msra.mxu1 %v12723_v7  ;;  %10612 = vmatprep.mubr.msk.f32.mxu1 %vm12624_vm2, %v12623_v2 }
  0x6f   :  { %10602 = vmatmul.mubr.msk.f32.vlgmr.msra.gmra.mxu0 %vm97_vm1, %v9070_v21  ;;  %10613 = vmatmul.mubr.msk.f32.vlgmr.msra.gmra.mxu1 %vm97_vm1, %v9069_v20 }
  0x70   :  { %10615 = vmatprep.subr.mxu0 %v12623_v2  ;;  %10626 = vmatprep.subr.mxu1 %v12623_v2 }
  0x71   :  { %10616 = vmatpush3.msk.msra.mxu0 %vm101_vm0, %v12686_v1  ;;  %10627 = vmatpush3.msk.msra.mxu1 %vm101_vm0, %v12749_v11 }
  0x72   :  { %10617 = vmatprep.subr.mxu0 %v12623_v2  ;;  %10628 = vmatprep.subr.mxu1 %v12623_v2 }
  0x73   :  { %10618 = vmatpush3.msra.mxu0 %v12698_v4  ;;  %10629 = vmatpush3.msra.mxu1 %v12758_v12 }
  0x74   :  { %10619 = vmatprep.subr.mxu0 %v12623_v2  ;;  %10630 = vmatprep.subr.mxu1 %v12623_v2 }
  0x75   :  { %10620 = vmatpush3.msra.mxu0 %v12714_v6  ;;  %10631 = vmatpush3.msra.mxu1 %v12769_v13 }
  0x76   :  { %10621 = vmatprep.subr.mxu0 %v12623_v2  ;;  %10632 = vmatprep.subr.mxu1 %v12623_v2 }
  0x77   :  { %10622 = vmatpush3.msra.mxu0 %v12730_v8  ;;  %10623 = vmatprep.mubr.msk.f32.mxu0 %vm12624_vm2, %v12623_v2 }
  0x78   :  { %10633 = vmatpush3.msra.mxu1 %v12778_v14  ;;  %10634 = vmatprep.mubr.msk.f32.mxu1 %vm12624_vm2, %v12623_v2 }
  0x79   :  { %10624 = vmatmul.mubr.msk.f32.vlgmr.msra.gmra.mxu0 %vm97_vm1, %v9070_v21  ;;  %10635 = vmatmul.mubr.msk.f32.vlgmr.msra.gmra.mxu1 %vm97_vm1, %v9071_v22 }
  0x7a   :  { %10637 = vmatprep.subr.mxu0 %v12623_v2  ;;  %10648 = vmatprep.subr.mxu1 %v12623_v2 }
  0x7b   :  { %10638 = vmatpush3.msk.msra.mxu0 %vm101_vm0, %v12681_v0  ;;  %10649 = vmatpush3.msk.msra.mxu1 %vm101_vm0, %v12686_v1 }
  0x7c   :  { %10639 = vmatprep.subr.mxu0 %v12623_v2  ;;  %10650 = vmatprep.subr.mxu1 %v12623_v2 }
  0x7d   :  { %10640 = vmatpush3.msra.mxu0 %v12693_v3  ;;  %10651 = vmatpush3.msra.mxu1 %v12698_v4 }
  0x7e   :  { %10641 = vmatprep.subr.mxu0 %v12623_v2  ;;  %10652 = vmatprep.subr.mxu1 %v12623_v2 }
  0x7f   :  { %10642 = vmatpush3.msra.mxu0 %v12709_v5  ;;  %10653 = vmatpush3.msra.mxu1 %v12714_v6 }
  0x80   :  { %10643 = vmatprep.subr.mxu0 %v12623_v2  ;;  %10654 = vmatprep.subr.mxu1 %v12623_v2 }
  0x81   :  { %10644 = vmatpush3.msra.mxu0 %v12723_v7  ;;  %10645 = vmatprep.mubr.msk.f32.mxu0 %vm12624_vm2, %v12623_v2 }
  0x82   :  { %10655 = vmatpush3.msra.mxu1 %v12730_v8  ;;  %10656 = vmatprep.mubr.msk.f32.mxu1 %vm12624_vm2, %v12623_v2 }
  0x83   :  { %10646 = vmatmul.mubr.msk.f32.vlgmr.msra.gmra.mxu0 %vm97_vm1, %v9070_v21  ;;  %10657 = vmatmul.mubr.msk.f32.vlgmr.msra.gmra.mxu1 %vm97_vm1, %v9071_v22 }
  0x84   :  { %10659 = vmatprep.subr.mxu0 %v12623_v2  ;;  %10670 = vmatprep.subr.mxu1 %v12623_v2 }
  0x85   :  { %10660 = vmatpush3.msk.msra.mxu0 %vm101_vm0, %v12749_v11  ;;  %10671 = vmatpush3.msk.msra.mxu1 %vm101_vm0, %v12681_v0 }
  0x86   :  { %10661 = vmatprep.subr.mxu0 %v12623_v2  ;;  %10672 = vmatprep.subr.mxu1 %v12623_v2 }
  0x87   :  { %10662 = vmatpush3.msra.mxu0 %v12758_v12  ;;  %10673 = vmatpush3.msra.mxu1 %v12693_v3 }
  0x88   :  { %10663 = vmatprep.subr.mxu0 %v12623_v2  ;;  %10674 = vmatprep.subr.mxu1 %v12623_v2 }
  0x89   :  { %10664 = vmatpush3.msra.mxu0 %v12769_v13  ;;  %10675 = vmatpush3.msra.mxu1 %v12709_v5 }
  0x8a   :  { %10665 = vmatprep.subr.mxu0 %v12623_v2  ;;  %10676 = vmatprep.subr.mxu1 %v12623_v2 }
  0x8b   :  { %10666 = vmatpush3.msra.mxu0 %v12778_v14  ;;  %10667 = vmatprep.mubr.msk.f32.mxu0 %vm12624_vm2, %v12623_v2 }
  0x8c   :  { %10677 = vmatpush3.msra.mxu1 %v12723_v7  ;;  %10678 = vmatprep.mubr.msk.f32.mxu1 %vm12624_vm2, %v12623_v2 }
  0x8d   :  { %10668 = vmatmul.mubr.msk.f32.vlgmr.msra.gmra.mxu0 %vm97_vm1, %v9072_v23  ;;  %10679 = vmatmul.mubr.msk.f32.vlgmr.msra.gmra.mxu1 %vm97_vm1, %v9071_v22 }
  0x8e   :  { %10681 = vmatprep.subr.mxu0 %v12623_v2  ;;  %10692 = vmatprep.subr.mxu1 %v12623_v2 }
  0x8f   :  { %10682 = vmatpush3.msk.msra.mxu0 %vm101_vm0, %v12686_v1  ;;  %10693 = vmatpush3.msk.msra.mxu1 %vm101_vm0, %v12749_v11 }
  0x90   :  { %10683 = vmatprep.subr.mxu0 %v12623_v2  ;;  %10694 = vmatprep.subr.mxu1 %v12623_v2 }
  0x91   :  { %10684 = vmatpush3.msra.mxu0 %v12698_v4  ;;  %10695 = vmatpush3.msra.mxu1 %v12758_v12 }
  0x92   :  { %10685 = vmatprep.subr.mxu0 %v12623_v2  ;;  %10696 = vmatprep.subr.mxu1 %v12623_v2 }
  0x93   :  { %10686 = vmatpush3.msra.mxu0 %v12714_v6  ;;  %10697 = vmatpush3.msra.mxu1 %v12769_v13 }
  0x94   :  { %10687 = vmatprep.subr.mxu0 %v12623_v2  ;;  %10698 = vmatprep.subr.mxu1 %v12623_v2 }
  0x95   :  { %10688 = vmatpush3.msra.mxu0 %v12730_v8  ;;  %10689 = vmatprep.mubr.msk.f32.mxu0 %vm12624_vm2, %v12623_v2 }
  0x96   :  { %10699 = vmatpush3.msra.mxu1 %v12778_v14  ;;  %10700 = vmatprep.mubr.msk.f32.mxu1 %vm12624_vm2, %v12623_v2 }
  0x97   :  { %10690 = vmatmul.mubr.msk.f32.vlgmr.msra.gmra.mxu0 %vm97_vm1, %v9072_v23  ;;  %10701 = vmatmul.mubr.msk.f32.vlgmr.msra.gmra.mxu1 %vm97_vm1, %v9073_v24 }
  0x98   :  { %10703 = vmatprep.subr.mxu0 %v12623_v2  ;;  %10714 = vmatprep.subr.mxu1 %v12623_v2 }
  0x99   :  { %10704 = vmatpush3.msk.msra.mxu0 %vm101_vm0, %v12681_v0  ;;  %10715 = vmatpush3.msk.msra.mxu1 %vm101_vm0, %v12686_v1 }
  0x9a   :  { %10705 = vmatprep.subr.mxu0 %v12623_v2  ;;  %10716 = vmatprep.subr.mxu1 %v12623_v2 }
  0x9b   :  { %10706 = vmatpush3.msra.mxu0 %v12693_v3  ;;  %10717 = vmatpush3.msra.mxu1 %v12698_v4 }
  0x9c   :  { %10707 = vmatprep.subr.mxu0 %v12623_v2  ;;  %10718 = vmatprep.subr.mxu1 %v12623_v2 }
  0x9d   :  { %10708 = vmatpush3.msra.mxu0 %v12709_v5  ;;  %10719 = vmatpush3.msra.mxu1 %v12714_v6 }
  0x9e   :  { %10709 = vmatprep.subr.mxu0 %v12623_v2  ;;  %10720 = vmatprep.subr.mxu1 %v12623_v2 }
  0x9f   :  { %10710 = vmatpush3.msra.mxu0 %v12723_v7  ;;  %10711 = vmatprep.mubr.msk.f32.mxu0 %vm12624_vm2, %v12623_v2 }
  0xa0   :  { %10721 = vmatpush3.msra.mxu1 %v12730_v8  ;;  %10722 = vmatprep.mubr.msk.f32.mxu1 %vm12624_vm2, %v12623_v2 }
  0xa1   :  { %10712 = vmatmul.mubr.msk.f32.vlgmr.msra.gmra.mxu0 %vm97_vm1, %v9072_v23  ;;  %10723 = vmatmul.mubr.msk.f32.vlgmr.msra.gmra.mxu1 %vm97_vm1, %v9073_v24 }
  0xa2   :  { %10725 = vmatprep.subr.mxu0 %v12623_v2  ;;  %10736 = vmatprep.subr.mxu1 %v12623_v2 }
  0xa3   :  { %10726 = vmatpush3.msk.msra.mxu0 %vm101_vm0, %v12749_v11  ;;  %10737 = vmatpush3.msk.msra.mxu1 %vm101_vm0, %v12681_v0 }
  0xa4   :  { %10727 = vmatprep.subr.mxu0 %v12623_v2  ;;  %10738 = vmatprep.subr.mxu1 %v12623_v2 }
  0xa5   :  { %10728 = vmatpush3.msra.mxu0 %v12758_v12  ;;  %10739 = vmatpush3.msra.mxu1 %v12693_v3 }
  0xa6   :  { %10729 = vmatprep.subr.mxu0 %v12623_v2  ;;  %10740 = vmatprep.subr.mxu1 %v12623_v2 }
  0xa7   :  { %10730 = vmatpush3.msra.mxu0 %v12769_v13  ;;  %10741 = vmatpush3.msra.mxu1 %v12709_v5 }
  0xa8   :  { %10731 = vmatprep.subr.mxu0 %v12623_v2  ;;  %10742 = vmatprep.subr.mxu1 %v12623_v2 }
  0xa9   :  { %10732 = vmatpush3.msra.mxu0 %v12778_v14  ;;  %10733 = vmatprep.mubr.msk.f32.mxu0 %vm12624_vm2, %v12623_v2 }
  0xaa   :  { %10743 = vmatpush3.msra.mxu1 %v12723_v7  ;;  %10744 = vmatprep.mubr.msk.f32.mxu1 %vm12624_vm2, %v12623_v2 }
  0xab   :  { %10734 = vmatmul.mubr.msk.f32.vlgmr.msra.gmra.mxu0 %vm97_vm1, %v9074_v25  ;;  %10745 = vmatmul.mubr.msk.f32.vlgmr.msra.gmra.mxu1 %vm97_vm1, %v9073_v24  ;;  %v9081_v24 = vld [vmem:[%s15939_s0 + $0x26] sm:$0x3] }
  0xac   :  { %10747 = vmatprep.subr.mxu0 %v12623_v2  ;;  %10758 = vmatprep.subr.mxu1 %v12623_v2 }
  0xad   :  { %10748 = vmatpush3.msk.msra.mxu0 %vm101_vm0, %v12686_v1  ;;  %10759 = vmatpush3.msk.msra.mxu1 %vm101_vm0, %v12749_v11 }
  0xae   :  { %10749 = vmatprep.subr.mxu0 %v12623_v2  ;;  %10760 = vmatprep.subr.mxu1 %v12623_v2 }
  0xaf   :  { %10750 = vmatpush3.msra.mxu0 %v12698_v4  ;;  %10761 = vmatpush3.msra.mxu1 %v12758_v12 }
  0xb0   :  { %10751 = vmatprep.subr.mxu0 %v12623_v2  ;;  %10762 = vmatprep.subr.mxu1 %v12623_v2 }
  0xb1   :  { %10752 = vmatpush3.msra.mxu0 %v12714_v6  ;;  %10763 = vmatpush3.msra.mxu1 %v12769_v13 }
  0xb2   :  { %10753 = vmatprep.subr.mxu0 %v12623_v2  ;;  %10764 = vmatprep.subr.mxu1 %v12623_v2 }
  0xb3   :  { %10754 = vmatpush3.msra.mxu0 %v12730_v8  ;;  %10755 = vmatprep.mubr.msk.f32.mxu0 %vm12624_vm2, %v12623_v2 }
  0xb4   :  { %10765 = vmatpush3.msra.mxu1 %v12778_v14  ;;  %10766 = vmatprep.mubr.msk.f32.mxu1 %vm12624_vm2, %v12623_v2 }
  0xb5   :  { %10756 = vmatmul.mubr.msk.f32.vlgmr.msra.gmra.mxu0 %vm97_vm1, %v9074_v25  ;;  %10767 = vmatmul.mubr.msk.f32.vlgmr.msra.gmra.mxu1 %vm97_vm1, %v9075_v26 }
  0xb6   :  { %10769 = vmatprep.subr.mxu0 %v12623_v2  ;;  %10780 = vmatprep.subr.mxu1 %v12623_v2 }
  0xb7   :  { %10770 = vmatpush3.msk.msra.mxu0 %vm101_vm0, %v12681_v0  ;;  %10781 = vmatpush3.msk.msra.mxu1 %vm101_vm0, %v12686_v1 }
  0xb8   :  { %10771 = vmatprep.subr.mxu0 %v12623_v2  ;;  %10782 = vmatprep.subr.mxu1 %v12623_v2 }
  0xb9   :  { %10772 = vmatpush3.msra.mxu0 %v12693_v3  ;;  %10783 = vmatpush3.msra.mxu1 %v12698_v4 }
  0xba   :  { %10773 = vmatprep.subr.mxu0 %v12623_v2  ;;  %10784 = vmatprep.subr.mxu1 %v12623_v2 }
  0xbb   :  { %10774 = vmatpush3.msra.mxu0 %v12709_v5  ;;  %10785 = vmatpush3.msra.mxu1 %v12714_v6 }
  0xbc   :  { %10775 = vmatprep.subr.mxu0 %v12623_v2  ;;  %10786 = vmatprep.subr.mxu1 %v12623_v2 }
  0xbd   :  { %10776 = vmatpush3.msra.mxu0 %v12723_v7  ;;  %10777 = vmatprep.mubr.msk.f32.mxu0 %vm12624_vm2, %v12623_v2 }
  0xbe   :  { %10787 = vmatpush3.msra.mxu1 %v12730_v8  ;;  %10788 = vmatprep.mubr.msk.f32.mxu1 %vm12624_vm2, %v12623_v2 }
  0xbf   :  { %10778 = vmatmul.mubr.msk.f32.vlgmr.msra.gmra.mxu0 %vm97_vm1, %v9074_v25  ;;  %10789 = vmatmul.mubr.msk.f32.vlgmr.msra.gmra.mxu1 %vm97_vm1, %v9075_v26 }
  0xc0   :  { %10791 = vmatprep.subr.mxu0 %v12623_v2  ;;  %10802 = vmatprep.subr.mxu1 %v12623_v2 }
  0xc1   :  { %10792 = vmatpush3.msk.msra.mxu0 %vm101_vm0, %v12749_v11  ;;  %10803 = vmatpush3.msk.msra.mxu1 %vm101_vm0, %v12681_v0 }
  0xc2   :  { %10793 = vmatprep.subr.mxu0 %v12623_v2  ;;  %10804 = vmatprep.subr.mxu1 %v12623_v2 }
  0xc3   :  { %10794 = vmatpush3.msra.mxu0 %v12758_v12  ;;  %10805 = vmatpush3.msra.mxu1 %v12693_v3 }
  0xc4   :  { %10795 = vmatprep.subr.mxu0 %v12623_v2  ;;  %10806 = vmatprep.subr.mxu1 %v12623_v2 }
  0xc5   :  { %10796 = vmatpush3.msra.mxu0 %v12769_v13  ;;  %10807 = vmatpush3.msra.mxu1 %v12709_v5 }
  0xc6   :  { %10797 = vmatprep.subr.mxu0 %v12623_v2  ;;  %10808 = vmatprep.subr.mxu1 %v12623_v2 }
  0xc7   :  { %10798 = vmatpush3.msra.mxu0 %v12778_v14  ;;  %10799 = vmatprep.mubr.msk.f32.mxu0 %vm12624_vm2, %v12623_v2 }
  0xc8   :  { %10809 = vmatpush3.msra.mxu1 %v12723_v7  ;;  %10810 = vmatprep.mubr.msk.f32.mxu1 %vm12624_vm2, %v12623_v2 }
  0xc9   :  { %10800 = vmatmul.mubr.msk.f32.vlgmr.msra.gmra.mxu0 %vm97_vm1, %v9076_v27  ;;  %10811 = vmatmul.mubr.msk.f32.vlgmr.msra.gmra.mxu1 %vm97_vm1, %v9075_v26 }
  0xca   :  { %10813 = vmatprep.subr.mxu0 %v12623_v2  ;;  %10824 = vmatprep.subr.mxu1 %v12623_v2 }
  0xcb   :  { %10814 = vmatpush3.msk.msra.mxu0 %vm101_vm0, %v12686_v1  ;;  %10825 = vmatpush3.msk.msra.mxu1 %vm101_vm0, %v12749_v11  ;;  %v171_v29 = vpop.f32.mrf.mxu0  ;;  %v254_v30 = vpop.f32.mrf.mxu1 }
  0xcc   :  { %10815 = vmatprep.subr.mxu0 %v12623_v2  ;;  %10826 = vmatprep.subr.mxu1 %v12623_v2  ;;  %v181_v31 = vadd.f32 %v13266_v28, %v171_v29 }
  0xcd   :  { %10816 = vmatpush3.msra.mxu0 %v12698_v4  ;;  %10827 = vmatpush3.msra.mxu1 %v12758_v12  ;;  %v10394_v32 = vpop.f32.mrf.mxu1  ;;  %v10383_v33 = vpop.f32.mrf.mxu0 }
  0xce   :  { %10817 = vmatprep.subr.mxu0 %v12623_v2  ;;  %10828 = vmatprep.subr.mxu1 %v12623_v2  ;;  %v258_v34 = vadd.f32 %v254_v30, %v181_v31 }
  0xcf   :  { %10818 = vmatpush3.msra.mxu0 %v12714_v6  ;;  %10829 = vmatpush3.msra.mxu1 %v12769_v13 }
  0xd0   :  { %10819 = vmatprep.subr.mxu0 %v12623_v2  ;;  %10830 = vmatprep.subr.mxu1 %v12623_v2 }
  0xd1   :  { %10820 = vmatpush3.msra.mxu0 %v12730_v8  ;;  %10821 = vmatprep.mubr.msk.f32.mxu0 %vm12624_vm2, %v12623_v2 }
  0xd2   :  { %10831 = vmatpush3.msra.mxu1 %v12778_v14  ;;  %10832 = vmatprep.mubr.msk.f32.mxu1 %vm12624_vm2, %v12623_v2 }
  0xd3   :  { %10822 = vmatmul.mubr.msk.f32.vlgmr.msra.gmra.mxu0 %vm97_vm1, %v9076_v27  ;;  %10833 = vmatmul.mubr.msk.f32.vlgmr.msra.gmra.mxu1 %vm97_vm1, %v9077_v35 }
  0xd4   :  { %10835 = vmatprep.subr.mxu0 %v12623_v2  ;;  %10846 = vmatprep.subr.mxu1 %v12623_v2 }
  0xd5   :  { %10836 = vmatpush3.msk.msra.mxu0 %vm101_vm0, %v12681_v0  ;;  %10847 = vmatpush3.msk.msra.mxu1 %vm101_vm0, %v12686_v1  ;;  %v331_v36 = vpop.f32.mrf.mxu0  ;;  %v403_v37 = vpop.f32.mrf.mxu1 }
  0xd6   :  { %10837 = vmatprep.subr.mxu0 %v12623_v2  ;;  %10848 = vmatprep.subr.mxu1 %v12623_v2  ;;  %v13304_v38 = vadd.f32 %v331_v36, %v258_v34  ;;  %v407_v41 = vadd.f32 %v13266_v28, %v403_v37 }
  0xd7   :  { %10838 = vmatpush3.msra.mxu0 %v12693_v3  ;;  %10849 = vmatpush3.msra.mxu1 %v12698_v4  ;;  %v10416_v39 = vpop.f32.mrf.mxu1  ;;  %v10405_v40 = vpop.f32.mrf.mxu0  ;;  %v13434_v4 = vld [vmem:[%s15940_s1 + $0x8] sm:$0xff] }
  0xd8   :  { %10839 = vmatprep.subr.mxu0 %v12623_v2  ;;  %10850 = vmatprep.subr.mxu1 %v12623_v2  ;;  %v9082_v39 = vld [vmem:[%s15939_s0 + $0x28] sm:$0x3] }
  0xd9   :  { %10840 = vmatpush3.msra.mxu0 %v12709_v5  ;;  %10851 = vmatpush3.msra.mxu1 %v12714_v6 }
  0xda   :  { %10841 = vmatprep.subr.mxu0 %v12623_v2  ;;  %10852 = vmatprep.subr.mxu1 %v12623_v2 }
  0xdb   :  { %10842 = vmatpush3.msra.mxu0 %v12723_v7  ;;  %10843 = vmatprep.mubr.msk.f32.mxu0 %vm12624_vm2, %v12623_v2 }
  0xdc   :  { %10853 = vmatpush3.msra.mxu1 %v12730_v8  ;;  %10854 = vmatprep.mubr.msk.f32.mxu1 %vm12624_vm2, %v12623_v2 }
  0xdd   :  { %10844 = vmatmul.mubr.msk.f32.vlgmr.msra.gmra.mxu0 %vm97_vm1, %v9076_v27  ;;  %10855 = vmatmul.mubr.msk.f32.vlgmr.msra.gmra.mxu1 %vm97_vm1, %v9077_v35 }
  0xde   :  { %10857 = vmatprep.subr.mxu0 %v12623_v2  ;;  %10868 = vmatprep.subr.mxu1 %v12623_v2 }
  0xdf   :  { %10858 = vmatpush3.msk.msra.mxu0 %vm101_vm0, %v12749_v11  ;;  %10869 = vmatpush3.msk.msra.mxu1 %vm101_vm0, %v12681_v0  ;;  %v474_v42 = vpop.f32.mrf.mxu0  ;;  %v548_v43 = vpop.f32.mrf.mxu1  ;;  %v13425_v0 = vld [vmem:[%s15940_s1 + $0x10] sm:$0xff] }
  0xe0   :  { %10859 = vmatprep.subr.mxu0 %v12623_v2  ;;  %10870 = vmatprep.subr.mxu1 %v12623_v2  ;;  %v478_v44 = vadd.f32 %v474_v42, %v407_v41 }
  0xe1   :  { %10860 = vmatpush3.msra.mxu0 %v12758_v12  ;;  %10871 = vmatpush3.msra.mxu1 %v12693_v3  ;;  %v10438_v45 = vpop.f32.mrf.mxu1  ;;  %v10427_v46 = vpop.f32.mrf.mxu0 }
  0xe2   :  { %10861 = vmatprep.subr.mxu0 %v12623_v2  ;;  %10872 = vmatprep.subr.mxu1 %v12623_v2  ;;  %v13335_v47 = vadd.f32 %v548_v43, %v478_v44  ;;  %v9083_v46 = vld [vmem:[%s15939_s0 + $0x2a] sm:$0x3] }
  0xe3   :  { %10862 = vmatpush3.msra.mxu0 %v12769_v13  ;;  %10873 = vmatpush3.msra.mxu1 %v12709_v5  ;;  %v13443_v5 = vld [vmem:[%s15940_s1] sm:$0xff] }
  0xe4   :  { %10863 = vmatprep.subr.mxu0 %v12623_v2  ;;  %10874 = vmatprep.subr.mxu1 %v12623_v2 }
  0xe5   :  { %10864 = vmatpush3.msra.mxu0 %v12778_v14  ;;  %10865 = vmatprep.mubr.msk.f32.mxu0 %vm12624_vm2, %v12623_v2 }
  0xe6   :  { %10875 = vmatpush3.msra.mxu1 %v12723_v7  ;;  %10876 = vmatprep.mubr.msk.f32.mxu1 %vm12624_vm2, %v12623_v2  ;;  %v13461_v7 = vld [vmem:[%s15940_s1 + $0x58] sm:$0xf] }
  0xe7   :  { %10866 = vmatmul.mubr.msk.f32.vlgmr.msra.gmra.mxu0 %vm97_vm1, %v13344_v48  ;;  %10877 = vmatmul.mubr.msk.f32.vlgmr.msra.gmra.mxu1 %vm97_vm1, %v9077_v35 }
  0xe8   :  { %10879 = vmatprep.subr.mxu0 %v12623_v2  ;;  %10890 = vmatprep.subr.mxu1 %v12623_v2 }
  0xe9   :  { %10880 = vmatpush3.msk.msra.mxu0 %vm101_vm0, %v13360_v49  ;;  %10891 = vmatpush3.msk.msra.mxu1 %vm101_vm0, %v12749_v11  ;;  %v620_v50 = vpop.f32.mrf.mxu0  ;;  %v691_v51 = vpop.f32.mrf.mxu1  ;;  %v13472_v11 = vld [vmem:[%s15940_s1 + $0x50] sm:$0xff] }
  0xea   :  { %10881 = vmatprep.subr.mxu0 %v12623_v2  ;;  %10892 = vmatprep.subr.mxu1 %v12623_v2  ;;  %v624_v52 = vadd.f32 %v13266_v28, %v620_v50 }
  0xeb   :  { %10882 = vmatpush3.msra.mxu0 %v13372_v53  ;;  %10893 = vmatpush3.msra.mxu1 %v12758_v12  ;;  %v10460_v54 = vpop.f32.mrf.mxu1  ;;  %v10449_v55 = vpop.f32.mrf.mxu0 }
  0xec   :  { %10883 = vmatprep.subr.mxu0 %v12623_v2  ;;  %10894 = vmatprep.subr.mxu1 %v12623_v2  ;;  %v695_v56 = vadd.f32 %v691_v51, %v624_v52 }
  0xed   :  { %10884 = vmatpush3.msra.mxu0 %v13381_v57  ;;  %10895 = vmatpush3.msra.mxu1 %v12769_v13 }
  0xee   :  { %10885 = vmatprep.subr.mxu0 %v12623_v2  ;;  %10896 = vmatprep.subr.mxu1 %v12623_v2 }
  0xef   :  { %10886 = vmatpush3.msra.mxu0 %v13395_v59  ;;  %10887 = vmatprep.mubr.msk.f32.mxu0 %vm12624_vm2, %v12623_v2 }
  0xf0   :  { %10897 = vmatpush3.msra.mxu1 %v12778_v14  ;;  %10898 = vmatprep.mubr.msk.f32.mxu1 %vm12624_vm2, %v12623_v2 }
  0xf1   :  { %10888 = vmatmul.mubr.msk.f32.vlgmr.msra.gmra.mxu0 %vm97_vm1, %v13344_v48  ;;  %10899 = vmatmul.mubr.msk.f32.vlgmr.msra.gmra.mxu1 %vm97_vm1, %v13390_v58 }
  0xf2   :  { %10901 = vmatprep.subr.mxu0 %v12623_v2  ;;  %10912 = vmatprep.subr.mxu1 %v12623_v2 }
  0xf3   :  { %10902 = vmatpush3.msk.msra.mxu0 %vm101_vm0, %v13412_v60  ;;  %10913 = vmatpush3.msk.msra.mxu1 %vm101_vm0, %v13360_v49  ;;  %v765_v61 = vpop.f32.mrf.mxu0  ;;  %v837_v62 = vpop.f32.mrf.mxu1 }
  0xf4   :  { %10903 = vmatprep.subr.mxu0 %v12623_v2  ;;  %10914 = vmatprep.subr.mxu1 %v12623_v2  ;;  %v13420_v63 = vadd.f32 %v765_v61, %v695_v56  ;;  %v841_v6 = vadd.f32 %v13266_v28, %v837_v62 }
  0xf5   :  { %10904 = vmatpush3.msra.mxu0 %v13425_v0  ;;  %10915 = vmatpush3.msra.mxu1 %v13372_v53  ;;  %v10482_v1 = vpop.f32.mrf.mxu1  ;;  %v10471_v3 = vpop.f32.mrf.mxu0 }
  0xf6   :  { %10905 = vmatprep.subr.mxu0 %v12623_v2  ;;  %10916 = vmatprep.subr.mxu1 %v12623_v2 }
  0xf7   :  { %10906 = vmatpush3.msra.mxu0 %v13434_v4  ;;  %10917 = vmatpush3.msra.mxu1 %v13381_v57 }
  0xf8   :  { %10907 = vmatprep.subr.mxu0 %v12623_v2  ;;  %10918 = vmatprep.subr.mxu1 %v12623_v2 }
  0xf9   :  { %10908 = vmatpush3.msra.mxu0 %v13443_v5  ;;  %10909 = vmatprep.mubr.msk.f32.mxu0 %vm12624_vm2, %v12623_v2 }
  0xfa   :  { %10919 = vmatpush3.msra.mxu1 %v13395_v59  ;;  %10920 = vmatprep.mubr.msk.f32.mxu1 %vm12624_vm2, %v12623_v2 }
  0xfb   :  { %10910 = vmatmul.mubr.msk.f32.vlgmr.msra.gmra.mxu0 %vm97_vm1, %v13344_v48  ;;  %10921 = vmatmul.mubr.msk.f32.vlgmr.msra.gmra.mxu1 %vm97_vm1, %v13390_v58 }
  0xfc   :  { %10923 = vmatprep.subr.mxu0 %v12623_v2  ;;  %10934 = vmatprep.subr.mxu1 %v12623_v2 }
  0xfd   :  { %10924 = vmatpush3.msk.msra.mxu0 %vm101_vm0, %v13461_v7  ;;  %10935 = vmatpush3.msk.msra.mxu1 %vm101_vm0, %v13412_v60  ;;  %v908_v8 = vpop.f32.mrf.mxu0  ;;  %v982_v9 = vpop.f32.mrf.mxu1 }
  0xfe   :  { %10925 = vmatprep.subr.mxu0 %v12623_v2  ;;  %10936 = vmatprep.subr.mxu1 %v12623_v2  ;;  %v912_v10 = vadd.f32 %v908_v8, %v841_v6  ;;  %v9084_v6 = vld [vmem:[%s15939_s0 + $0x2c] sm:$0x3] }
  0xff   :  { %10926 = vmatpush3.msra.mxu0 %v13472_v11  ;;  %10937 = vmatpush3.msra.mxu1 %v13425_v0  ;;  %v10504_v12 = vpop.f32.mrf.mxu1  ;;  %v10493_v13 = vpop.f32.mrf.mxu0 }
 0x100   :  { %10927 = vmatprep.subr.mxu0 %v12623_v2  ;;  %10938 = vmatprep.subr.mxu1 %v12623_v2  ;;  %v13478_v14 = vadd.f32 %v982_v9, %v912_v10 }
 0x101   :  { %10928 = vmatpush3.msra.mxu0 %v13483_v15  ;;  %10939 = vmatpush3.msra.mxu1 %v13434_v4 }
 0x102   :  { %10929 = vmatprep.subr.mxu0 %v12623_v2  ;;  %10940 = vmatprep.subr.mxu1 %v12623_v2 }
 0x103   :  { %10930 = vmatpush3.msra.mxu0 %v13495_v17  ;;  %10931 = vmatprep.mubr.msk.f32.mxu0 %vm12624_vm2, %v12623_v2 }
 0x104   :  { %10941 = vmatpush3.msra.mxu1 %v13443_v5  ;;  %10942 = vmatprep.mubr.msk.f32.mxu1 %vm12624_vm2, %v12623_v2 }
 0x105   :  { %10932 = vmatmul.mubr.msk.f32.vlgmr.msra.gmra.mxu0 %vm97_vm1, %v9080_v16  ;;  %10943 = vmatmul.mubr.msk.f32.vlgmr.msra.gmra.mxu1 %vm97_vm1, %v13390_v58 }
 0x106   :  { %10945 = vmatprep.subr.mxu0 %v12623_v2  ;;  %10956 = vmatprep.subr.mxu1 %v12623_v2 }
 0x107   :  { %10946 = vmatpush3.msk.msra.mxu0 %vm101_vm0, %v13360_v49  ;;  %10957 = vmatpush3.msk.msra.mxu1 %vm101_vm0, %v13461_v7  ;;  %v1054_v18 = vpop.f32.mrf.mxu0  ;;  %v1125_v19 = vpop.f32.mrf.mxu1 }
 0x108   :  { %10947 = vmatprep.subr.mxu0 %v12623_v2  ;;  %10958 = vmatprep.subr.mxu1 %v12623_v2  ;;  %v1058_v20 = vadd.f32 %v13266_v28, %v1054_v18  ;;  %v9085_v18 = vld [vmem:[%s15939_s0 + $0x2e] sm:$0x3] }
 0x109   :  { %10948 = vmatpush3.msra.mxu0 %v13372_v53  ;;  %10959 = vmatpush3.msra.mxu1 %v13472_v11  ;;  %v10526_v21 = vpop.f32.mrf.mxu1  ;;  %v10515_v22 = vpop.f32.mrf.mxu0 }
 0x10a   :  { %10949 = vmatprep.subr.mxu0 %v12623_v2  ;;  %10960 = vmatprep.subr.mxu1 %v12623_v2  ;;  %v1129_v23 = vadd.f32 %v1125_v19, %v1058_v20 }
 0x10b   :  { %10950 = vmatpush3.msra.mxu0 %v13381_v57  ;;  %10961 = vmatpush3.msra.mxu1 %v13483_v15 }
 0x10c   :  { %10951 = vmatprep.subr.mxu0 %v12623_v2  ;;  %10962 = vmatprep.subr.mxu1 %v12623_v2 }
 0x10d   :  { %10952 = vmatpush3.msra.mxu0 %v13395_v59  ;;  %10953 = vmatprep.mubr.msk.f32.mxu0 %vm12624_vm2, %v12623_v2 }
 0x10e   :  { %10963 = vmatpush3.msra.mxu1 %v13495_v17  ;;  %10964 = vmatprep.mubr.msk.f32.mxu1 %vm12624_vm2, %v12623_v2 }
 0x10f   :  { %10954 = vmatmul.mubr.msk.f32.vlgmr.msra.gmra.mxu0 %vm97_vm1, %v9080_v16  ;;  %10965 = vmatmul.mubr.msk.f32.vlgmr.msra.gmra.mxu1 %vm97_vm1, %v9081_v24 }
 0x110   :  { %10967 = vmatprep.subr.mxu0 %v12623_v2  ;;  %10978 = vmatprep.subr.mxu1 %v12623_v2 }
 0x111   :  { %10968 = vmatpush3.msk.msra.mxu0 %vm101_vm0, %v13412_v60  ;;  %10979 = vmatpush3.msk.msra.mxu1 %vm101_vm0, %v13360_v49  ;;  %v1199_v25 = vpop.f32.mrf.mxu0  ;;  %v1271_v26 = vpop.f32.mrf.mxu1 }
 0x112   :  { %10969 = vmatprep.subr.mxu0 %v12623_v2  ;;  %10980 = vmatprep.subr.mxu1 %v12623_v2  ;;  %v13542_v27 = vadd.f32 %v1199_v25, %v1129_v23  ;;  %v1275_v31 = vadd.f32 %v13266_v28, %v1271_v26  ;;  %v13762_v25 = vld [vmem:[%s15942_s3 + $0x48] sm:$0xff] }
 0x113   :  { %10970 = vmatpush3.msra.mxu0 %v13425_v0  ;;  %10981 = vmatpush3.msra.mxu1 %v13372_v53  ;;  %v10548_v29 = vpop.f32.mrf.mxu1  ;;  %v10537_v30 = vpop.f32.mrf.mxu0  ;;  %v13780_v26 = vld [vmem:[%s15942_s3 + $0xc8] sm:$0xff] }
 0x114   :  { %10971 = vmatprep.subr.mxu0 %v12623_v2  ;;  %10982 = vmatprep.subr.mxu1 %v12623_v2  ;;  %v13794_v29 = vld [vmem:[%s15942_s3 + $0xc0] sm:$0xff]  ;;  %v13803_v30 = vld [vmem:[%s15942_s3 + $0x30] sm:$0xff] }
 0x115   :  { %10972 = vmatpush3.msra.mxu0 %v13434_v4  ;;  %10983 = vmatpush3.msra.mxu1 %v13381_v57 }
 0x116   :  { %10973 = vmatprep.subr.mxu0 %v12623_v2  ;;  %10984 = vmatprep.subr.mxu1 %v12623_v2 }
 0x117   :  { %10974 = vmatpush3.msra.mxu0 %v13443_v5  ;;  %10975 = vmatprep.mubr.msk.f32.mxu0 %vm12624_vm2, %v12623_v2 }
 0x118   :  { %10985 = vmatpush3.msra.mxu1 %v13395_v59  ;;  %10986 = vmatprep.mubr.msk.f32.mxu1 %vm12624_vm2, %v12623_v2 }
 0x119   :  { %10976 = vmatmul.mubr.msk.f32.vlgmr.msra.gmra.mxu0 %vm97_vm1, %v9080_v16  ;;  %10987 = vmatmul.mubr.msk.f32.vlgmr.msra.gmra.mxu1 %vm97_vm1, %v9081_v24 }
 0x11a   :  { %10989 = vmatprep.subr.mxu0 %v12623_v2  ;;  %11000 = vmatprep.subr.mxu1 %v12623_v2 }
 0x11b   :  { %10990 = vmatpush3.msk.msra.mxu0 %vm101_vm0, %v13461_v7  ;;  %11001 = vmatpush3.msk.msra.mxu1 %vm101_vm0, %v13412_v60  ;;  %v1342_v32 = vpop.f32.mrf.mxu0  ;;  %v1416_v33 = vpop.f32.mrf.mxu1 }
 0x11c   :  { %10991 = vmatprep.subr.mxu0 %v12623_v2  ;;  %11002 = vmatprep.subr.mxu1 %v12623_v2  ;;  %v1346_v34 = vadd.f32 %v1342_v32, %v1275_v31  ;;  %v13808_v31 = vld [vmem:[%s15942_s3 + $0xb8] sm:$0xff] }
 0x11d   :  { %10992 = vmatpush3.msra.mxu0 %v13472_v11  ;;  %11003 = vmatpush3.msra.mxu1 %v13425_v0  ;;  %v10570_v35 = vpop.f32.mrf.mxu1  ;;  %v10559_v36 = vpop.f32.mrf.mxu0 }
 0x11e   :  { %10993 = vmatprep.subr.mxu0 %v12623_v2  ;;  %11004 = vmatprep.subr.mxu1 %v12623_v2  ;;  %v13573_v37 = vadd.f32 %v1416_v33, %v1346_v34  ;;  %v13818_v35 = vld [vmem:[%s15942_s3 + $0x28] sm:$0xff]  ;;  %v13823_v36 = vld [vmem:[%s15942_s3 + $0xb0] sm:$0xff] }
 0x11f   :  { %10994 = vmatpush3.msra.mxu0 %v13483_v15  ;;  %11005 = vmatpush3.msra.mxu1 %v13434_v4 }
 0x120   :  { %10995 = vmatprep.subr.mxu0 %v12623_v2  ;;  %11006 = vmatprep.subr.mxu1 %v12623_v2 }
 0x121   :  { %10996 = vmatpush3.msra.mxu0 %v13495_v17  ;;  %10997 = vmatprep.mubr.msk.f32.mxu0 %vm12624_vm2, %v12623_v2 }
 0x122   :  { %11007 = vmatpush3.msra.mxu1 %v13443_v5  ;;  %11008 = vmatprep.mubr.msk.f32.mxu1 %vm12624_vm2, %v12623_v2 }
 0x123   :  { %10998 = vmatmul.mubr.msk.f32.vlgmr.msra.gmra.mxu0 %vm97_vm1, %v9082_v39  ;;  %11009 = vmatmul.mubr.msk.f32.vlgmr.msra.gmra.mxu1 %vm97_vm1, %v9081_v24 }
 0x124   :  { %11011 = vmatprep.subr.mxu0 %v12623_v2  ;;  %11022 = vmatprep.subr.mxu1 %v12623_v2 }
 0x125   :  { %11012 = vmatpush3.msk.msra.mxu0 %vm101_vm0, %v13360_v49  ;;  %11023 = vmatpush3.msk.msra.mxu1 %vm101_vm0, %v13461_v7  ;;  %v1488_v40 = vpop.f32.mrf.mxu0  ;;  %v1559_v41 = vpop.f32.mrf.mxu1 }
 0x126   :  { %11013 = vmatprep.subr.mxu0 %v12623_v2  ;;  %11024 = vmatprep.subr.mxu1 %v12623_v2  ;;  %v1492_v42 = vadd.f32 %v13266_v28, %v1488_v40 }
 0x127   :  { %11014 = vmatpush3.msra.mxu0 %v13372_v53  ;;  %11025 = vmatpush3.msra.mxu1 %v13472_v11  ;;  %v10592_v43 = vpop.f32.mrf.mxu1  ;;  %v10581_v44 = vpop.f32.mrf.mxu0 }
 0x128   :  { %11015 = vmatprep.subr.mxu0 %v12623_v2  ;;  %11026 = vmatprep.subr.mxu1 %v12623_v2  ;;  %v1563_v45 = vadd.f32 %v1559_v41, %v1492_v42  ;;  %v13832_v42 = vld [vmem:[%s15942_s3 + $0x20] sm:$0xff]  ;;  %v13837_v43 = vld [vmem:[%s15942_s3 + $0xa8] sm:$0xff]  ;;  %v13846_v44 = vld [vmem:[%s15942_s3 + $0x18] sm:$0xff] }
 0x129   :  { %11016 = vmatpush3.msra.mxu0 %v13381_v57  ;;  %11027 = vmatpush3.msra.mxu1 %v13483_v15 }
 0x12a   :  { %11017 = vmatprep.subr.mxu0 %v12623_v2  ;;  %11028 = vmatprep.subr.mxu1 %v12623_v2 }
 0x12b   :  { %11018 = vmatpush3.msra.mxu0 %v13395_v59  ;;  %11019 = vmatprep.mubr.msk.f32.mxu0 %vm12624_vm2, %v12623_v2 }
 0x12c   :  { %11029 = vmatpush3.msra.mxu1 %v13495_v17  ;;  %11030 = vmatprep.mubr.msk.f32.mxu1 %vm12624_vm2, %v12623_v2 }
 0x12d   :  { %11020 = vmatmul.mubr.msk.f32.vlgmr.msra.gmra.mxu0 %vm97_vm1, %v9082_v39  ;;  %11031 = vmatmul.mubr.msk.f32.vlgmr.msra.gmra.mxu1 %vm97_vm1, %v9083_v46 }
 0x12e   :  { %11033 = vmatprep.subr.mxu0 %v12623_v2  ;;  %11044 = vmatprep.subr.mxu1 %v12623_v2 }
 0x12f   :  { %11034 = vmatpush3.msk.msra.mxu0 %vm101_vm0, %v13412_v60  ;;  %11045 = vmatpush3.msk.msra.mxu1 %vm101_vm0, %v13360_v49  ;;  %v1633_v48 = vpop.f32.mrf.mxu0  ;;  %v1705_v50 = vpop.f32.mrf.mxu1 }
 0x130   :  { %11035 = vmatprep.subr.mxu0 %v12623_v2  ;;  %11046 = vmatprep.subr.mxu1 %v12623_v2  ;;  %v13626_v51 = vadd.f32 %v1633_v48, %v1563_v45  ;;  %v1709_v55 = vadd.f32 %v13266_v28, %v1705_v50  ;;  %v13851_v45 = vld [vmem:[%s15942_s3 + $0xa0] sm:$0xff]  ;;  %v13865_v48 = vld [vmem:[%s15942_s3 + $0x98] sm:$0xff]  ;;  %v13874_v50 = vld [vmem:[%s15942_s3 + $0x8] sm:$0xff] }
 0x131   :  { %11036 = vmatpush3.msra.mxu0 %v13425_v0  ;;  %11047 = vmatpush3.msra.mxu1 %v13372_v53  ;;  %v10614_v52 = vpop.f32.mrf.mxu1  ;;  %v10603_v54 = vpop.f32.mrf.mxu0 }
 0x132   :  { %11037 = vmatprep.subr.mxu0 %v12623_v2  ;;  %11048 = vmatprep.subr.mxu1 %v12623_v2  ;;  %v13879_v52 = vld [vmem:[%s15942_s3 + $0x90] sm:$0xff] }
 0x133   :  { %11038 = vmatpush3.msra.mxu0 %v13434_v4  ;;  %11049 = vmatpush3.msra.mxu1 %v13381_v57 }
 0x134   :  { %11039 = vmatprep.subr.mxu0 %v12623_v2  ;;  %11050 = vmatprep.subr.mxu1 %v12623_v2 }
 0x135   :  { %11040 = vmatpush3.msra.mxu0 %v13443_v5  ;;  %11041 = vmatprep.mubr.msk.f32.mxu0 %vm12624_vm2, %v12623_v2 }
 0x136   :  { %11051 = vmatpush3.msra.mxu1 %v13395_v59  ;;  %11052 = vmatprep.mubr.msk.f32.mxu1 %vm12624_vm2, %v12623_v2 }
 0x137   :  { %11042 = vmatmul.mubr.msk.f32.vlgmr.msra.gmra.mxu0 %vm97_vm1, %v9082_v39  ;;  %11053 = vmatmul.mubr.msk.f32.vlgmr.msra.gmra.mxu1 %vm97_vm1, %v9083_v46 }
 0x138   :  { %11055 = vmatprep.subr.mxu0 %v12623_v2  ;;  %11066 = vmatprep.subr.mxu1 %v12623_v2 }
 0x139   :  { %11056 = vmatpush3.msk.msra.mxu0 %vm101_vm0, %v13461_v7  ;;  %11067 = vmatpush3.msk.msra.mxu1 %vm101_vm0, %v13412_v60  ;;  %v1776_v56 = vpop.f32.mrf.mxu0  ;;  %v1850_v58 = vpop.f32.mrf.mxu1 }
 0x13a   :  { %11057 = vmatprep.subr.mxu0 %v12623_v2  ;;  %11068 = vmatprep.subr.mxu1 %v12623_v2  ;;  %v1780_v61 = vadd.f32 %v1776_v56, %v1709_v55 }
 0x13b   :  { %11058 = vmatpush3.msra.mxu0 %v13472_v11  ;;  %11069 = vmatpush3.msra.mxu1 %v13425_v0  ;;  %v10636_v62 = vpop.f32.mrf.mxu1  ;;  %v10625_v1 = vpop.f32.mrf.mxu0 }
 0x13c   :  { %11059 = vmatprep.subr.mxu0 %v12623_v2  ;;  %11070 = vmatprep.subr.mxu1 %v12623_v2  ;;  %v13657_v3 = vadd.f32 %v1850_v58, %v1780_v61  ;;  %v13890_v58 = vld [vmem:[%s15942_s3] sm:$0xff]  ;;  %v13897_v1 = vld [vmem:[%s15942_s3 + $0x88] sm:$0xff] }
 0x13d   :  { %11060 = vmatpush3.msra.mxu0 %v13483_v15  ;;  %11071 = vmatpush3.msra.mxu1 %v13434_v4 }
 0x13e   :  { %11061 = vmatprep.subr.mxu0 %v12623_v2  ;;  %11072 = vmatprep.subr.mxu1 %v12623_v2 }
 0x13f   :  { %11062 = vmatpush3.msra.mxu0 %v13495_v17  ;;  %11063 = vmatprep.mubr.msk.f32.mxu0 %vm12624_vm2, %v12623_v2 }
 0x140   :  { %11073 = vmatpush3.msra.mxu1 %v13443_v5  ;;  %11074 = vmatprep.mubr.msk.f32.mxu1 %vm12624_vm2, %v12623_v2 }
 0x141   :  { %11064 = vmatmul.mubr.msk.f32.vlgmr.msra.gmra.mxu0 %vm97_vm1, %v9084_v6  ;;  %11075 = vmatmul.mubr.msk.f32.vlgmr.msra.gmra.mxu1 %vm97_vm1, %v9083_v46  ;;  %v13860_v46 = vld [vmem:[%s15942_s3 + $0x10] sm:$0xff] }
 0x142   :  { %11077 = vmatprep.subr.mxu0 %v12623_v2  ;;  %11088 = vmatprep.subr.mxu1 %v12623_v2 }
 0x143   :  { %11078 = vmatpush3.msk.msra.mxu0 %vm101_vm0, %v13360_v49  ;;  %11089 = vmatpush3.msk.msra.mxu1 %vm101_vm0, %v13461_v7  ;;  %v1922_v8 = vpop.f32.mrf.mxu0  ;;  %v1993_v9 = vpop.f32.mrf.mxu1 }
 0x144   :  { %11079 = vmatprep.subr.mxu0 %v12623_v2  ;;  %11090 = vmatprep.subr.mxu1 %v12623_v2  ;;  %v1926_v10 = vadd.f32 %v13266_v28, %v1922_v8  ;;  %v13908_v8 = vld [vmem:[%s15942_s3 + $0x80] sm:$0xff] }
 0x145   :  { %11080 = vmatpush3.msra.mxu0 %v13372_v53  ;;  %11091 = vmatpush3.msra.mxu1 %v13472_v11  ;;  %v10658_v12 = vpop.f32.mrf.mxu1  ;;  %v10647_v13 = vpop.f32.mrf.mxu0 }
 0x146   :  { %11081 = vmatprep.subr.mxu0 %v12623_v2  ;;  %11092 = vmatprep.subr.mxu1 %v12623_v2  ;;  %v1997_v16 = vadd.f32 %v1993_v9, %v1926_v10  ;;  %v13913_v9 = vld [vmem:[%s15942_s3 + $0x130] sm:$0xff]  ;;  %v13927_v10 = vld [vmem:[%s15942_s3 + $0x128] sm:$0xff]  ;;  %v13941_v13 = vld [vmem:[%s15942_s3 + $0x120] sm:$0xff] }
 0x147   :  { %11082 = vmatpush3.msra.mxu0 %v13381_v57  ;;  %11093 = vmatpush3.msra.mxu1 %v13483_v15  ;;  %v13936_v12 = vld [vmem:[%s15942_s3 + $0x70] sm:$0xff] }
 0x148   :  { %11083 = vmatprep.subr.mxu0 %v12623_v2  ;;  %11094 = vmatprep.subr.mxu1 %v12623_v2 }
 0x149   :  { %11084 = vmatpush3.msra.mxu0 %v13395_v59  ;;  %11085 = vmatprep.mubr.msk.f32.mxu0 %vm12624_vm2, %v12623_v2 }
 0x14a   :  { %11095 = vmatpush3.msra.mxu1 %v13495_v17  ;;  %11096 = vmatprep.mubr.msk.f32.mxu1 %vm12624_vm2, %v12623_v2 }
 0x14b   :  { %11086 = vmatmul.mubr.msk.f32.vlgmr.msra.gmra.mxu0 %vm97_vm1, %v9084_v6  ;;  %11097 = vmatmul.mubr.msk.f32.vlgmr.msra.gmra.mxu1 %vm97_vm1, %v9085_v18 }
 0x14c   :  { %11099 = vmatprep.subr.mxu0 %v12623_v2  ;;  %11110 = vmatprep.subr.mxu1 %v12623_v2 }
 0x14d   :  { %11100 = vmatpush3.msk.msra.mxu0 %vm101_vm0, %v13412_v60  ;;  %11111 = vmatpush3.msk.msra.mxu1 %vm101_vm0, %v13360_v49  ;;  %v2067_v19 = vpop.f32.mrf.mxu0  ;;  %v2139_v20 = vpop.f32.mrf.mxu1  ;;  %v13729_v49 = vld [vmem:[%s15942_s3 + $0x60] sm:$0xff] }
 0x14e   :  { %11101 = vmatprep.subr.mxu0 %v12623_v2  ;;  %11112 = vmatprep.subr.mxu1 %v12623_v2  ;;  %v13710_v21 = vadd.f32 %v2067_v19, %v1997_v16 }
 0x14f   :  { %11102 = vmatpush3.msra.mxu0 %v13425_v0  ;;  %11113 = vmatpush3.msra.mxu1 %v13372_v53  ;;  %v10680_v22 = vpop.f32.mrf.mxu1  ;;  %v10669_v23 = vpop.f32.mrf.mxu0  ;;  %v13738_v53 = vld [vmem:[%s15942_s3 + $0x58] sm:$0xff]  ;;  %v13749_v0 = vld [vmem:[%s15942_s3 + $0x50] sm:$0xff] }
 0x150   :  { %11103 = vmatprep.subr.mxu0 %v12623_v2  ;;  %11114 = vmatprep.subr.mxu1 %v12623_v2 }
 0x151   :  { %11104 = vmatpush3.msra.mxu0 %v13434_v4  ;;  %11115 = vmatpush3.msra.mxu1 %v13381_v57  ;;  %v2143_v57 = vadd.f32 %v13266_v28, %v2139_v20  ;;  %v13951_v20 = vld [vmem:[%s15942_s3 + $0x68] sm:$0xff] }
 0x152   :  { %11105 = vmatprep.subr.mxu0 %v12623_v2  ;;  %11116 = vmatprep.subr.mxu1 %v12623_v2 }
 0x153   :  { %11106 = vmatpush3.msra.mxu0 %v13443_v5  ;;  %11107 = vmatprep.mubr.msk.f32.mxu0 %vm12624_vm2, %v12623_v2 }
 0x154   :  { %11117 = vmatpush3.msra.mxu1 %v13395_v59  ;;  %11118 = vmatprep.mubr.msk.f32.mxu1 %vm12624_vm2, %v12623_v2 }
 0x155   :  { %11108 = vmatmul.mubr.msk.f32.vlgmr.msra.gmra.mxu0 %vm97_vm1, %v9084_v6  ;;  %11119 = vmatmul.mubr.msk.f32.vlgmr.msra.gmra.mxu1 %vm97_vm1, %v9085_v18  ;;  %v336_v6 = vmax.f32 %v13304_v38, 0.0  ;;  %v13922_v38 = vld [vmem:[%s15942_s3 + $0x78] sm:$0xff] }
 0x156   :  { %11121 = vmatprep.subr.mxu0 %v12623_v2  ;;  %11132 = vmatprep.subr.mxu1 %v12623_v2 }
 0x157   :  { %11122 = vmatpush3.msk.msra.mxu0 %vm101_vm0, %v13461_v7  ;;  %11133 = vmatpush3.msra.mxu1 %v13729_v49  ;;  %v2210_v59 = vpop.f32.mrf.mxu0  ;;  %v2284_v60 = vpop.f32.mrf.mxu1 }
 0x158   :  { %11123 = vmatprep.subr.mxu0 %v12623_v2  ;;  %11134 = vmatprep.subr.mxu1 %v12623_v2  ;;  %v2214_v4 = vadd.f32 %v2210_v59, %v2143_v57  ;;  %v553_v59 = vmax.f32 %v13335_v47, 0.0  ;;  %v13980_v47 = vld [vmem:[%s15942_s3 + $0x108] sm:$0xff] }
 0x159   :  { %11124 = vmatpush3.msra.mxu0 %v13472_v11  ;;  %11135 = vmatpush3.msra.mxu1 %v13738_v53  ;;  %v10702_v5 = vpop.f32.mrf.mxu1  ;;  %v10691_v7 = vpop.f32.mrf.mxu0  ;;  %v9086_v11 = vld [vmem:[%s15939_s0 + $0x30] sm:$0x3] }
 0x15a   :  { %11125 = vmatprep.subr.mxu0 %v12623_v2  ;;  %11136 = vmatprep.subr.mxu1 %v12623_v2  ;;  %v13755_v24 = vadd.f32 %v2284_v60, %v2214_v4  ;;  %v13971_v4 = vld [vmem:[%s15942_s3 + $0x110] sm:$0xff]  ;;  %v13989_v5 = vld [vmem:[%s15942_s3 + $0x100] sm:$0xff]  ;;  %v13998_v7 = vld [vmem:[%s15942_s3 + $0xf8] sm:$0xff] }
 0x15b   :  { %11126 = vmatpush3.msra.mxu0 %v13483_v15  ;;  %11137 = vmatpush3.msra.mxu1 %v13749_v0  ;;  %v13775_v15 = vld [vmem:[%s15942_s3 + $0x40] sm:$0xff] }
 0x15c   :  { %11127 = vmatprep.subr.mxu0 %v12623_v2  ;;  %11138 = vmatprep.subr.mxu1 %v12623_v2 }
 0x15d   :  { %11128 = vmatpush3.msra.mxu0 %v13495_v17  ;;  %11129 = vmatprep.mubr.msk.f32.mxu0 %vm12624_vm2, %v12623_v2  ;;  %v13789_v17 = vld [vmem:[%s15942_s3 + $0x38] sm:$0xff] }
 0x15e   :  { %11139 = vmatpush3.msra.mxu1 %v13762_v25  ;;  %11130 = vmatmul.mubr.msk.f32.vlgmr.msra.gmra.mxu0 %vm97_vm1, %v9086_v11 }
 0x15f   :  { %11140 = vmatprep.subr.mxu1 %v12623_v2  ;;  %11161 = vmatprep.subr.mxu0 %v12623_v2 }
 0x160   :  { %11141 = vmatpush3.msra.mxu1 %v13775_v15  ;;  %11162 = vmatpush3.msra.mxu0 %v13780_v26 }
 0x161   :  { %11142 = vmatprep.subr.mxu1 %v12623_v2  ;;  %11163 = vmatprep.subr.mxu0 %v12623_v2  ;;  %v2356_v32 = vpop.f32.mrf.mxu0  ;;  %v2427_v33 = vpop.f32.mrf.mxu1 }
 0x162   :  { %11143 = vmatpush3.msra.mxu1 %v13789_v17  ;;  %11164 = vmatpush3.msra.mxu0 %v13794_v29  ;;  %v2360_v34 = vadd.f32 %v13266_v28, %v2356_v32 }
 0x163   :  { %11144 = vmatprep.subr.mxu1 %v12623_v2  ;;  %11165 = vmatprep.subr.mxu0 %v12623_v2  ;;  %v10724_v39 = vpop.f32.mrf.mxu1  ;;  %v10713_v40 = vpop.f32.mrf.mxu0 }
 0x164   :  { %11145 = vmatpush3.msra.mxu1 %v13803_v30  ;;  %11166 = vmatpush3.msra.mxu0 %v13808_v31  ;;  %v2431_v41 = vadd.f32 %v2427_v33, %v2360_v34  ;;  %v14005_v33 = vld [vmem:[%s15941_s2] ss:$0 sm:$0xff]  ;;  %v14013_v39 = vld [vmem:[%s15942_s3 + $0xf0] sm:$0xff] }
 0x165   :  { %11146 = vmatprep.subr.mxu1 %v12623_v2  ;;  %11167 = vmatprep.subr.mxu0 %v12623_v2 }
 0x166   :  { %11147 = vmatpush3.msra.mxu1 %v13818_v35  ;;  %11168 = vmatpush3.msra.mxu0 %v13823_v36 }
 0x167   :  { %11148 = vmatprep.subr.mxu1 %v12623_v2  ;;  %11169 = vmatprep.subr.mxu0 %v12623_v2 }
 0x168   :  { %11149 = vmatpush3.msra.mxu1 %v13832_v42  ;;  %11170 = vmatpush3.msra.mxu0 %v13837_v43 }
 0x169   :  { %11150 = vmatprep.subr.mxu1 %v12623_v2  ;;  %11171 = vmatprep.subr.mxu0 %v12623_v2 }
 0x16a   :  { %11151 = vmatpush3.msra.mxu1 %v13846_v44  ;;  %11172 = vmatpush3.msra.mxu0 %v13851_v45 }
 0x16b   :  { %11152 = vmatprep.subr.mxu1 %v12623_v2  ;;  %11173 = vmatprep.subr.mxu0 %v12623_v2  ;;  %v2501_v54 = vpop.f32.mrf.mxu0  ;;  %v2573_v55 = vpop.f32.mrf.mxu1 }
 0x16c   :  { %11153 = vmatpush3.msra.mxu1 %v13860_v46  ;;  %11174 = vmatpush3.msra.mxu0 %v13865_v48  ;;  %v13883_v56 = vadd.f32 %v2501_v54, %v2431_v41  ;;  %v2577_v16 = vadd.f32 %v13266_v28, %v2573_v55  ;;  %v13958_v28 = vld [vmem:[%s15942_s3 + $0x118] sm:$0xff]  ;;  %v14022_v55 = vld [vmem:[%s15942_s3 + $0xe8] sm:$0xff] }
 0x16d   :  { %11154 = vmatprep.subr.mxu1 %v12623_v2  ;;  %11175 = vmatprep.subr.mxu0 %v12623_v2  ;;  %v10746_v61 = vpop.f32.mrf.mxu1  ;;  %v10735_v62 = vpop.f32.mrf.mxu0 }
 0x16e   :  { %11155 = vmatpush3.msra.mxu1 %v13874_v50  ;;  %11176 = vmatpush3.msra.mxu0 %v13879_v52  ;;  %v14031_v61 = vld [vmem:[%s15942_s3 + $0xe0] sm:$0xff]  ;;  %v14040_v62 = vld [vmem:[%s15942_s3 + $0xd8] sm:$0xff] }
 0x16f   :  { %11156 = vmatprep.subr.mxu1 %v12623_v2  ;;  %11177 = vmatprep.subr.mxu0 %v12623_v2 }
 0x170   :  { %11157 = vmatpush3.msra.mxu1 %v13890_v58  ;;  %11158 = vmatprep.mubr.msk.f32.mxu1 %vm12624_vm2, %v12623_v2 }
 0x171   :  { %11178 = vmatpush3.msra.mxu0 %v13897_v1  ;;  %11159 = vmatmul.mubr.msk.f32.vlgmr.msra.gmra.mxu1 %vm5153_vm3, %v336_v6  ;;  %v14049_v6 = vld [vmem:[%s15942_s3 + $0xd0] sm:$0xff] }
 0x172   :  { %11179 = vmatprep.subr.mxu0 %v12623_v2  ;;  %11190 = vmatprep.subr.mxu1 %v12623_v2 }
 0x173   :  { %11180 = vmatpush3.msra.mxu0 %v13908_v8  ;;  %11191 = vmatpush3.msra.mxu1 %v13913_v9 }
 0x174   :  { %11181 = vmatprep.subr.mxu0 %v12623_v2  ;;  %11192 = vmatprep.subr.mxu1 %v12623_v2 }
 0x175   :  { %11182 = vmatpush3.msra.mxu0 %v13922_v38  ;;  %11193 = vmatpush3.msra.mxu1 %v13927_v10  ;;  %v2644_v18 = vpop.f32.mrf.mxu0  ;;  %v2718_v19 = vpop.f32.mrf.mxu1 }
 0x176   :  { %11183 = vmatprep.subr.mxu0 %v12623_v2  ;;  %11194 = vmatprep.subr.mxu1 %v12623_v2  ;;  %v2648_v22 = vadd.f32 %v2644_v18, %v2577_v16 }
 0x177   :  { %11184 = vmatpush3.msra.mxu0 %v13936_v12  ;;  %11195 = vmatpush3.msra.mxu1 %v13941_v13  ;;  %v10768_v23 = vpop.f32.mrf.mxu1  ;;  %v10757_v57 = vpop.f32.mrf.mxu0 }
 0x178   :  { %11185 = vmatprep.subr.mxu0 %v12623_v2  ;;  %11196 = vmatprep.subr.mxu1 %v12623_v2  ;;  %v13963_v60 = vadd.f32 %v2718_v19, %v2648_v22  ;;  %v770_v22 = vmax.f32 %v13420_v63, 0.0 }
 0x179   :  { %11186 = vmatpush3.msra.mxu0 %v13951_v20  ;;  %11187 = vmatprep.mubr.msk.f32.mxu0 %vm12624_vm2, %v12623_v2 }
 0x17a   :  { %11197 = vmatpush3.msra.mxu1 %v13958_v28  ;;  %11188 = vmatmul.mubr.msk.f32.vlgmr.msra.gmra.mxu0 %vm5153_vm3, %v553_v59 }
 0x17b   :  { %11198 = vmatprep.subr.mxu1 %v12623_v2  ;;  %11219 = vmatprep.subr.mxu0 %v12623_v2 }
 0x17c   :  { %11199 = vmatpush3.msra.mxu1 %v13971_v4  ;;  %11220 = vmatpush3.msra.mxu0 %v13729_v49 }
 0x17d   :  { %11200 = vmatprep.subr.mxu1 %v12623_v2  ;;  %11221 = vmatprep.subr.mxu0 %v12623_v2 }
 0x17e   :  { %11201 = vmatpush3.msra.mxu1 %v13980_v47  ;;  %11222 = vmatpush3.msra.mxu0 %v13738_v53 }
 0x17f   :  { %11202 = vmatprep.subr.mxu1 %v12623_v2  ;;  %11223 = vmatprep.subr.mxu0 %v12623_v2  ;;  %v2790_v11 = vpop.f32.mrf.mxu0  ;;  %v2861_v32 = vpop.f32.mrf.mxu1 }
 0x180   :  { %11203 = vmatpush3.msra.mxu1 %v13989_v5  ;;  %11224 = vmatpush3.msra.mxu0 %v13749_v0  ;;  %v2794_v34 = vadd.f32 %v14005_v33, %v2790_v11 }
 0x181   :  { %11204 = vmatprep.subr.mxu1 %v12623_v2  ;;  %11225 = vmatprep.subr.mxu0 %v12623_v2  ;;  %v10790_v40 = vpop.f32.mrf.mxu1  ;;  %v10779_v41 = vpop.f32.mrf.mxu0 }
 0x182   :  { %11205 = vmatpush3.msra.mxu1 %v13998_v7  ;;  %11226 = vmatpush3.msra.mxu0 %v13762_v25  ;;  %v2865_v54 = vadd.f32 %v2861_v32, %v2794_v34 }
 0x183   :  { %11206 = vmatprep.subr.mxu1 %v12623_v2  ;;  %11227 = vmatprep.subr.mxu0 %v12623_v2 }
 0x184   :  { %11207 = vmatpush3.msra.mxu1 %v14013_v39  ;;  %11228 = vmatpush3.msra.mxu0 %v13775_v15 }
 0x185   :  { %11208 = vmatprep.subr.mxu1 %v12623_v2  ;;  %11229 = vmatprep.subr.mxu0 %v12623_v2 }
 0x186   :  { %11209 = vmatpush3.msra.mxu1 %v14022_v55  ;;  %11230 = vmatpush3.msra.mxu0 %v13789_v17 }
 0x187   :  { %11210 = vmatprep.subr.mxu1 %v12623_v2  ;;  %11231 = vmatprep.subr.mxu0 %v12623_v2 }
 0x188   :  { %11211 = vmatpush3.msra.mxu1 %v14031_v61  ;;  %11232 = vmatpush3.msra.mxu0 %v13803_v30 }
 0x189   :  { %11212 = vmatprep.subr.mxu1 %v12623_v2  ;;  %11233 = vmatprep.subr.mxu0 %v12623_v2  ;;  %v2935_v16 = vpop.f32.mrf.mxu0  ;;  %v3007_v18 = vpop.f32.mrf.mxu1 }
 0x18a   :  { %11213 = vmatpush3.msra.mxu1 %v14040_v62  ;;  %11234 = vmatpush3.msra.mxu0 %v13818_v35  ;;  %v14053_v19 = vadd.f32 %v2935_v16, %v2865_v54  ;;  %v3011_v63 = vadd.f32 %v14005_v33, %v3007_v18 }
 0x18b   :  { %11214 = vmatprep.subr.mxu1 %v12623_v2  ;;  %11235 = vmatprep.subr.mxu0 %v12623_v2  ;;  %v10812_v23 = vpop.f32.mrf.mxu1  ;;  %v10801_v57 = vpop.f32.mrf.mxu0 }
 0x18c   :  { %11215 = vmatpush3.msra.mxu1 %v14049_v6  ;;  %11216 = vmatprep.mubr.msk.f32.mxu1 %vm12624_vm2, %v12623_v2 }
 0x18d   :  { %11236 = vmatpush3.msra.mxu0 %v13832_v42  ;;  %11217 = vmatmul.mubr.msk.f32.vlgmr.msra.gmra.mxu1 %vm5153_vm3, %v770_v22 }
 0x18e   :  { %11237 = vmatprep.subr.mxu0 %v12623_v2  ;;  %11248 = vmatprep.subr.mxu1 %v12623_v2 }
 0x18f   :  { %11238 = vmatpush3.msra.mxu0 %v13846_v44  ;;  %11249 = vmatpush3.msra.mxu1 %v13780_v26 }
 0x190   :  { %11239 = vmatprep.subr.mxu0 %v12623_v2  ;;  %11250 = vmatprep.subr.mxu1 %v12623_v2 }
 0x191   :  { %11240 = vmatpush3.msra.mxu0 %v13860_v46  ;;  %11251 = vmatpush3.msra.mxu1 %v13794_v29 }
 0x192   :  { %11241 = vmatprep.subr.mxu0 %v12623_v2  ;;  %11252 = vmatprep.subr.mxu1 %v12623_v2 }
 0x193   :  { %11242 = vmatpush3.msra.mxu0 %v13874_v50  ;;  %11253 = vmatpush3.msra.mxu1 %v13808_v31  ;;  %v3078_v59 = vpop.f32.mrf.mxu0  ;;  %v3152_v11 = vpop.f32.mrf.mxu1 }
 0x194   :  { %11243 = vmatprep.subr.mxu0 %v12623_v2  ;;  %11254 = vmatprep.subr.mxu1 %v12623_v2  ;;  %v3082_v32 = vadd.f32 %v3078_v59, %v3011_v63  ;;  %v987_v63 = vmax.f32 %v13478_v14, 0.0  ;;  %v1204_v14 = vmax.f32 %v13542_v27, 0.0 }
 0x195   :  { %11244 = vmatpush3.msra.mxu0 %v13890_v58  ;;  %11245 = vmatprep.mubr.msk.f32.mxu0 %vm12624_vm2, %v12623_v2  ;;  %v10834_v34 = vpop.f32.mrf.mxu1  ;;  %v10823_v40 = vpop.f32.mrf.mxu0 }
 0x196   :  { %11255 = vmatpush3.msra.mxu1 %v13823_v36  ;;  %11246 = vmatmul.mubr.msk.f32.vlgmr.msra.gmra.mxu0 %vm5153_vm3, %v770_v22  ;;  %v14083_v41 = vadd.f32 %v3152_v11, %v3082_v32 }
 0x197   :  { %11256 = vmatprep.subr.mxu1 %v12623_v2  ;;  %11277 = vmatprep.subr.mxu0 %v12623_v2 }
 0x198   :  { %11257 = vmatpush3.msra.mxu1 %v13837_v43  ;;  %11278 = vmatpush3.msra.mxu0 %v13913_v9 }
 0x199   :  { %11258 = vmatprep.subr.mxu1 %v12623_v2  ;;  %11279 = vmatprep.subr.mxu0 %v12623_v2 }
 0x19a   :  { %11259 = vmatpush3.msra.mxu1 %v13851_v45  ;;  %11280 = vmatpush3.msra.mxu0 %v13927_v10 }
 0x19b   :  { %11260 = vmatprep.subr.mxu1 %v12623_v2  ;;  %11281 = vmatprep.subr.mxu0 %v12623_v2 }
 0x19c   :  { %11261 = vmatpush3.msra.mxu1 %v13865_v48  ;;  %11282 = vmatpush3.msra.mxu0 %v13941_v13 }
 0x19d   :  { %11262 = vmatprep.subr.mxu1 %v12623_v2  ;;  %11283 = vmatprep.subr.mxu0 %v12623_v2  ;;  %v3224_v54 = vpop.f32.mrf.mxu0  ;;  %v3295_v16 = vpop.f32.mrf.mxu1 }
 0x19e   :  { %11263 = vmatpush3.msra.mxu1 %v13879_v52  ;;  %11284 = vmatpush3.msra.mxu0 %v13958_v28  ;;  %v3228_v18 = vadd.f32 %v14005_v33, %v3224_v54 }
 0x19f   :  { %11264 = vmatprep.subr.mxu1 %v12623_v2  ;;  %11285 = vmatprep.subr.mxu0 %v12623_v2  ;;  %v10856_v22 = vpop.f32.mrf.mxu1  ;;  %v10845_v23 = vpop.f32.mrf.mxu0 }
 0x1a0   :  { %11265 = vmatpush3.msra.mxu1 %v13897_v1  ;;  %11286 = vmatpush3.msra.mxu0 %v13971_v4  ;;  %v3299_v57 = vadd.f32 %v3295_v16, %v3228_v18 }
 0x1a1   :  { %11266 = vmatprep.subr.mxu1 %v12623_v2  ;;  %11287 = vmatprep.subr.mxu0 %v12623_v2 }
 0x1a2   :  { %11267 = vmatpush3.msra.mxu1 %v13908_v8  ;;  %11288 = vmatpush3.msra.mxu0 %v13980_v47 }
 0x1a3   :  { %11268 = vmatprep.subr.mxu1 %v12623_v2  ;;  %11289 = vmatprep.subr.mxu0 %v12623_v2 }
 0x1a4   :  { %11269 = vmatpush3.msra.mxu1 %v13922_v38  ;;  %11290 = vmatpush3.msra.mxu0 %v13989_v5 }
 0x1a5   :  { %11270 = vmatprep.subr.mxu1 %v12623_v2  ;;  %11291 = vmatprep.subr.mxu0 %v12623_v2 }
 0x1a6   :  { %11271 = vmatpush3.msra.mxu1 %v13936_v12  ;;  %11292 = vmatpush3.msra.mxu0 %v13998_v7 }
 0x1a7   :  { %11272 = vmatprep.subr.mxu1 %v12623_v2  ;;  %11293 = vmatprep.subr.mxu0 %v12623_v2  ;;  %v3369_v59 = vpop.f32.mrf.mxu0  ;;  %v3441_v11 = vpop.f32.mrf.mxu1 }
 0x1a8   :  { %11273 = vmatpush3.msra.mxu1 %v13951_v20  ;;  %11274 = vmatprep.mubr.msk.f32.mxu1 %vm12624_vm2, %v12623_v2  ;;  %v14124_v32 = vadd.f32 %v3369_v59, %v3299_v57  ;;  %v3445_v54 = vadd.f32 %v14005_v33, %v3441_v11 }
 0x1a9   :  { %11294 = vmatpush3.msra.mxu0 %v14013_v39  ;;  %11275 = vmatmul.mubr.msk.f32.vlgmr.msra.gmra.mxu1 %vm5153_vm3, %v987_v63  ;;  %v10878_v34 = vpop.f32.mrf.mxu1  ;;  %v10867_v40 = vpop.f32.mrf.mxu0 }
 0x1aa   :  { %11295 = vmatprep.subr.mxu0 %v12623_v2  ;;  %11306 = vmatprep.subr.mxu1 %v12623_v2 }
 0x1ab   :  { %11296 = vmatpush3.msra.mxu0 %v14022_v55  ;;  %11307 = vmatpush3.msra.mxu1 %v13729_v49 }
 0x1ac   :  { %11297 = vmatprep.subr.mxu0 %v12623_v2  ;;  %11308 = vmatprep.subr.mxu1 %v12623_v2 }
 0x1ad   :  { %11298 = vmatpush3.msra.mxu0 %v14031_v61  ;;  %11309 = vmatpush3.msra.mxu1 %v13738_v53 }
 0x1ae   :  { %11299 = vmatprep.subr.mxu0 %v12623_v2  ;;  %11310 = vmatprep.subr.mxu1 %v12623_v2 }
 0x1af   :  { %11300 = vmatpush3.msra.mxu0 %v14040_v62  ;;  %11311 = vmatpush3.msra.mxu1 %v13749_v0 }
 0x1b0   :  { %11301 = vmatprep.subr.mxu0 %v12623_v2  ;;  %11312 = vmatprep.subr.mxu1 %v12623_v2 }
 0x1b1   :  { %11302 = vmatpush3.msra.mxu0 %v14049_v6  ;;  %11303 = vmatprep.mubr.msk.f32.mxu0 %vm12624_vm2, %v12623_v2  ;;  %v3512_v16 = vpop.f32.mrf.mxu0  ;;  %v3586_v18 = vpop.f32.mrf.mxu1 }
 0x1b2   :  { %11313 = vmatpush3.msra.mxu1 %v13762_v25  ;;  %11304 = vmatmul.mubr.msk.f32.vlgmr.msra.gmra.mxu0 %vm5153_vm3, %v1204_v14  ;;  %v3516_v22 = vadd.f32 %v3512_v16, %v3445_v54 }
 0x1b3   :  { %11314 = vmatprep.subr.mxu1 %v12623_v2  ;;  %11335 = vmatprep.subr.mxu0 %v12623_v2  ;;  %v10900_v27 = vpop.f32.mrf.mxu1  ;;  %v10889_v23 = vpop.f32.mrf.mxu0 }
 0x1b4   :  { %11315 = vmatpush3.msra.mxu1 %v13775_v15  ;;  %11336 = vmatpush3.msra.mxu0 %v13780_v26  ;;  %v14153_v57 = vadd.f32 %v3586_v18, %v3516_v22 }
 0x1b5   :  { %11316 = vmatprep.subr.mxu1 %v12623_v2  ;;  %11337 = vmatprep.subr.mxu0 %v12623_v2 }
 0x1b6   :  { %11317 = vmatpush3.msra.mxu1 %v13789_v17  ;;  %11338 = vmatpush3.msra.mxu0 %v13794_v29 }
 0x1b7   :  { %11318 = vmatprep.subr.mxu1 %v12623_v2  ;;  %11339 = vmatprep.subr.mxu0 %v12623_v2 }
 0x1b8   :  { %11319 = vmatpush3.msra.mxu1 %v13803_v30  ;;  %11340 = vmatpush3.msra.mxu0 %v13808_v31 }
 0x1b9   :  { %11320 = vmatprep.subr.mxu1 %v12623_v2  ;;  %11341 = vmatprep.subr.mxu0 %v12623_v2 }
 0x1ba   :  { %11321 = vmatpush3.msra.mxu1 %v13818_v35  ;;  %11342 = vmatpush3.msra.mxu0 %v13823_v36 }
 0x1bb   :  { %11322 = vmatprep.subr.mxu1 %v12623_v2  ;;  %11343 = vmatprep.subr.mxu0 %v12623_v2  ;;  %v3658_v63 = vpop.f32.mrf.mxu0  ;;  %v3729_v59 = vpop.f32.mrf.mxu1 }
 0x1bc   :  { %11323 = vmatpush3.msra.mxu1 %v13832_v42  ;;  %11344 = vmatpush3.msra.mxu0 %v13837_v43  ;;  %v3662_v11 = vadd.f32 %v14005_v33, %v3658_v63 }
 0x1bd   :  { %11324 = vmatprep.subr.mxu1 %v12623_v2  ;;  %11345 = vmatprep.subr.mxu0 %v12623_v2  ;;  %v10922_v34 = vpop.f32.mrf.mxu1  ;;  %v10911_v40 = vpop.f32.mrf.mxu0 }
 0x1be   :  { %11325 = vmatpush3.msra.mxu1 %v13846_v44  ;;  %11346 = vmatpush3.msra.mxu0 %v13851_v45  ;;  %v3733_v54 = vadd.f32 %v3729_v59, %v3662_v11 }
 0x1bf   :  { %11326 = vmatprep.subr.mxu1 %v12623_v2  ;;  %11347 = vmatprep.subr.mxu0 %v12623_v2 }
 0x1c0   :  { %11327 = vmatpush3.msra.mxu1 %v13860_v46  ;;  %11348 = vmatpush3.msra.mxu0 %v13865_v48 }
 0x1c1   :  { %11328 = vmatprep.subr.mxu1 %v12623_v2  ;;  %11349 = vmatprep.subr.mxu0 %v12623_v2 }
 0x1c2   :  { %11329 = vmatpush3.msra.mxu1 %v13874_v50  ;;  %11350 = vmatpush3.msra.mxu0 %v13879_v52 }
 0x1c3   :  { %11330 = vmatprep.subr.mxu1 %v12623_v2  ;;  %11351 = vmatprep.subr.mxu0 %v12623_v2 }
 0x1c4   :  { %11331 = vmatpush3.msra.mxu1 %v13890_v58  ;;  %11332 = vmatprep.mubr.msk.f32.mxu1 %vm12624_vm2, %v12623_v2 }
 0x1c5   :  { %11352 = vmatpush3.msra.mxu0 %v13897_v1  ;;  %11333 = vmatmul.mubr.msk.f32.vlgmr.msra.gmra.mxu1 %vm5153_vm3, %v1204_v14  ;;  %v3803_v16 = vpop.f32.mrf.mxu0  ;;  %v3875_v18 = vpop.f32.mrf.mxu1  ;;  %v1421_v14 = vmax.f32 %v13573_v37, 0.0 }
 0x1c6   :  { %11353 = vmatprep.subr.mxu0 %v12623_v2  ;;  %11364 = vmatprep.subr.mxu1 %v12623_v2  ;;  %v14193_v22 = vadd.f32 %v3803_v16, %v3733_v54  ;;  %v3879_v63 = vadd.f32 %v14005_v33, %v3875_v18 }
 0x1c7   :  { %11354 = vmatpush3.msra.mxu0 %v13908_v8  ;;  %11365 = vmatpush3.msra.mxu1 %v13913_v9  ;;  %v10944_v27 = vpop.f32.mrf.mxu1  ;;  %v10933_v23 = vpop.f32.mrf.mxu0 }
 0x1c8   :  { %11355 = vmatprep.subr.mxu0 %v12623_v2  ;;  %11366 = vmatprep.subr.mxu1 %v12623_v2 }
 0x1c9   :  { %11356 = vmatpush3.msra.mxu0 %v13922_v38  ;;  %11367 = vmatpush3.msra.mxu1 %v13927_v10 }
 0x1ca   :  { %11357 = vmatprep.subr.mxu0 %v12623_v2  ;;  %11368 = vmatprep.subr.mxu1 %v12623_v2 }
 0x1cb   :  { %11358 = vmatpush3.msra.mxu0 %v13936_v12  ;;  %11369 = vmatpush3.msra.mxu1 %v13941_v13 }
 0x1cc   :  { %11359 = vmatprep.subr.mxu0 %v12623_v2  ;;  %11370 = vmatprep.subr.mxu1 %v12623_v2 }
 0x1cd   :  { %11360 = vmatpush3.msra.mxu0 %v13951_v20  ;;  %11361 = vmatprep.mubr.msk.f32.mxu0 %vm12624_vm2, %v12623_v2 }
 0x1ce   :  { %11371 = vmatpush3.msra.mxu1 %v13958_v28  ;;  %11362 = vmatmul.mubr.msk.f32.vlgmr.msra.gmra.mxu0 %vm5153_vm3, %v1421_v14 }
 0x1cf   :  { %11372 = vmatprep.subr.mxu1 %v12623_v2  ;;  %11393 = vmatprep.subr.mxu0 %v12623_v2  ;;  %v3946_v37 = vpop.f32.mrf.mxu0  ;;  %v4020_v59 = vpop.f32.mrf.mxu1 }
 0x1d0   :  { %11373 = vmatpush3.msra.mxu1 %v13971_v4  ;;  %11394 = vmatpush3.msra.mxu0 %v13729_v49  ;;  %v3950_v11 = vadd.f32 %v3946_v37, %v3879_v63  ;;  %v1638_v37 = vmax.f32 %v13626_v51, 0.0 }
 0x1d1   :  { %11374 = vmatprep.subr.mxu1 %v12623_v2  ;;  %11395 = vmatprep.subr.mxu0 %v12623_v2  ;;  %v10966_v34 = vpop.f32.mrf.mxu1  ;;  %v10955_v40 = vpop.f32.mrf.mxu0 }
 0x1d2   :  { %11375 = vmatpush3.msra.mxu1 %v13980_v47  ;;  %11396 = vmatpush3.msra.mxu0 %v13738_v53  ;;  %v14222_v54 = vadd.f32 %v4020_v59, %v3950_v11 }
 0x1d3   :  { %11376 = vmatprep.subr.mxu1 %v12623_v2  ;;  %11397 = vmatprep.subr.mxu0 %v12623_v2 }
 0x1d4   :  { %11377 = vmatpush3.msra.mxu1 %v13989_v5  ;;  %11398 = vmatpush3.msra.mxu0 %v13749_v0 }
 0x1d5   :  { %11378 = vmatprep.subr.mxu1 %v12623_v2  ;;  %11399 = vmatprep.subr.mxu0 %v12623_v2 }
 0x1d6   :  { %11379 = vmatpush3.msra.mxu1 %v13998_v7  ;;  %11400 = vmatpush3.msra.mxu0 %v13762_v25 }
 0x1d7   :  { %11380 = vmatprep.subr.mxu1 %v12623_v2  ;;  %11401 = vmatprep.subr.mxu0 %v12623_v2 }
 0x1d8   :  { %11381 = vmatpush3.msra.mxu1 %v14013_v39  ;;  %11402 = vmatpush3.msra.mxu0 %v13775_v15 }
 0x1d9   :  { %11382 = vmatprep.subr.mxu1 %v12623_v2  ;;  %11403 = vmatprep.subr.mxu0 %v12623_v2  ;;  %v4092_v16 = vpop.f32.mrf.mxu0  ;;  %v4163_v18 = vpop.f32.mrf.mxu1 }
 0x1da   :  { %11383 = vmatpush3.msra.mxu1 %v14022_v55  ;;  %11404 = vmatpush3.msra.mxu0 %v13789_v17  ;;  %v4096_v27 = vadd.f32 %v14005_v33, %v4092_v16 }
 0x1db   :  { %11384 = vmatprep.subr.mxu1 %v12623_v2  ;;  %11405 = vmatprep.subr.mxu0 %v12623_v2  ;;  %v10988_v23 = vpop.f32.mrf.mxu1  ;;  %v10977_v14 = vpop.f32.mrf.mxu0 }
 0x1dc   :  { %11385 = vmatpush3.msra.mxu1 %v14031_v61  ;;  %11406 = vmatpush3.msra.mxu0 %v13803_v30  ;;  %v4167_v63 = vadd.f32 %v4163_v18, %v4096_v27 }
 0x1dd   :  { %11386 = vmatprep.subr.mxu1 %v12623_v2  ;;  %11407 = vmatprep.subr.mxu0 %v12623_v2 }
 0x1de   :  { %11387 = vmatpush3.msra.mxu1 %v14040_v62  ;;  %11408 = vmatpush3.msra.mxu0 %v13818_v35 }
 0x1df   :  { %11388 = vmatprep.subr.mxu1 %v12623_v2  ;;  %11409 = vmatprep.subr.mxu0 %v12623_v2 }
 0x1e0   :  { %11389 = vmatpush3.msra.mxu1 %v14049_v6  ;;  %11390 = vmatprep.mubr.msk.f32.mxu1 %vm12624_vm2, %v12623_v2 }
 0x1e1   :  { %11410 = vmatpush3.msra.mxu0 %v13832_v42  ;;  %11391 = vmatmul.mubr.msk.f32.vlgmr.msra.gmra.mxu1 %vm5153_vm3, %v1638_v37 }
 0x1e2   :  { %11411 = vmatprep.subr.mxu0 %v12623_v2  ;;  %11422 = vmatprep.subr.mxu1 %v12623_v2 }
 0x1e3   :  { %11412 = vmatpush3.msra.mxu0 %v13846_v44  ;;  %11423 = vmatpush3.msra.mxu1 %v13780_v26  ;;  %v4237_v51 = vpop.f32.mrf.mxu0  ;;  %v4309_v59 = vpop.f32.mrf.mxu1 }
 0x1e4   :  { %11413 = vmatprep.subr.mxu0 %v12623_v2  ;;  %11424 = vmatprep.subr.mxu1 %v12623_v2  ;;  %v14263_v11 = vadd.f32 %v4237_v51, %v4167_v63  ;;  %v4313_v16 = vadd.f32 %v14005_v33, %v4309_v59 }
 0x1e5   :  { %11414 = vmatpush3.msra.mxu0 %v13860_v46  ;;  %11425 = vmatpush3.msra.mxu1 %v13794_v29  ;;  %v11010_v34 = vpop.f32.mrf.mxu1  ;;  %v10999_v40 = vpop.f32.mrf.mxu0 }
 0x1e6   :  { %11415 = vmatprep.subr.mxu0 %v12623_v2  ;;  %11426 = vmatprep.subr.mxu1 %v12623_v2 }
 0x1e7   :  { %11416 = vmatpush3.msra.mxu0 %v13874_v50  ;;  %11427 = vmatpush3.msra.mxu1 %v13808_v31 }
 0x1e8   :  { %11417 = vmatprep.subr.mxu0 %v12623_v2  ;;  %11428 = vmatprep.subr.mxu1 %v12623_v2 }
 0x1e9   :  { %11418 = vmatpush3.msra.mxu0 %v13890_v58  ;;  %11419 = vmatprep.mubr.msk.f32.mxu0 %vm12624_vm2, %v12623_v2 }
 0x1ea   :  { %11429 = vmatpush3.msra.mxu1 %v13823_v36  ;;  %11420 = vmatmul.mubr.msk.f32.vlgmr.msra.gmra.mxu0 %vm5153_vm3, %v1638_v37 }
 0x1eb   :  { %11430 = vmatprep.subr.mxu1 %v12623_v2  ;;  %11451 = vmatprep.subr.mxu0 %v12623_v2 }
 0x1ec   :  { %11431 = vmatpush3.msra.mxu1 %v13837_v43  ;;  %11452 = vmatpush3.msra.mxu0 %v13913_v9 }
 0x1ed   :  { %11432 = vmatprep.subr.mxu1 %v12623_v2  ;;  %11453 = vmatprep.subr.mxu0 %v12623_v2  ;;  %v4380_v18 = vpop.f32.mrf.mxu0  ;;  %v4454_v27 = vpop.f32.mrf.mxu1 }
 0x1ee   :  { %11433 = vmatpush3.msra.mxu1 %v13851_v45  ;;  %11454 = vmatpush3.msra.mxu0 %v13927_v10  ;;  %v4384_v23 = vadd.f32 %v4380_v18, %v4313_v16 }
 0x1ef   :  { %11434 = vmatprep.subr.mxu1 %v12623_v2  ;;  %11455 = vmatprep.subr.mxu0 %v12623_v2  ;;  %v11032_v14 = vpop.f32.mrf.mxu1  ;;  %v11021_v63 = vpop.f32.mrf.mxu0 }
 0x1f0   :  { %11435 = vmatpush3.msra.mxu1 %v13865_v48  ;;  %11456 = vmatpush3.msra.mxu0 %v13941_v13  ;;  %v14291_v37 = vadd.f32 %v4454_v27, %v4384_v23  ;;  %v1855_v27 = vmax.f32 %v13657_v3, 0.0 }
 0x1f1   :  { %11436 = vmatprep.subr.mxu1 %v12623_v2  ;;  %11457 = vmatprep.subr.mxu0 %v12623_v2 }
 0x1f2   :  { %11437 = vmatpush3.msra.mxu1 %v13879_v52  ;;  %11458 = vmatpush3.msra.mxu0 %v13958_v28 }
 0x1f3   :  { %11438 = vmatprep.subr.mxu1 %v12623_v2  ;;  %11459 = vmatprep.subr.mxu0 %v12623_v2 }
 0x1f4   :  { %11439 = vmatpush3.msra.mxu1 %v13897_v1  ;;  %11460 = vmatpush3.msra.mxu0 %v13971_v4 }
 0x1f5   :  { %11440 = vmatprep.subr.mxu1 %v12623_v2  ;;  %11461 = vmatprep.subr.mxu0 %v12623_v2 }
 0x1f6   :  { %11441 = vmatpush3.msra.mxu1 %v13908_v8  ;;  %11462 = vmatpush3.msra.mxu0 %v13980_v47 }
 0x1f7   :  { %11442 = vmatprep.subr.mxu1 %v12623_v2  ;;  %11463 = vmatprep.subr.mxu0 %v12623_v2  ;;  %v4526_v51 = vpop.f32.mrf.mxu0  ;;  %v4597_v59 = vpop.f32.mrf.mxu1 }
 0x1f8   :  { %11443 = vmatpush3.msra.mxu1 %v13922_v38  ;;  %11464 = vmatpush3.msra.mxu0 %v13989_v5  ;;  %v4530_v34 = vadd.f32 %v14005_v33, %v4526_v51  ;;  %v2072_v51 = vmax.f32 %v13710_v21, 0.0 }
 0x1f9   :  { %11444 = vmatprep.subr.mxu1 %v12623_v2  ;;  %11465 = vmatprep.subr.mxu0 %v12623_v2  ;;  %v11054_v40 = vpop.f32.mrf.mxu1  ;;  %v11043_v16 = vpop.f32.mrf.mxu0 }
 0x1fa   :  { %11445 = vmatpush3.msra.mxu1 %v13936_v12  ;;  %11466 = vmatpush3.msra.mxu0 %v13998_v7  ;;  %v4601_v18 = vadd.f32 %v4597_v59, %v4530_v34  ;;  %v14564_v59 = vld [vmem:[%s15942_s3 + $0xa8] sm:$0xff]  ;;  %v14570_v34 = vld [vmem:[%s15942_s3 + $0x130] sm:$0xff]  ;;  %v14578_v40 = vld [vmem:[%s15942_s3 + $0xa0] sm:$0xff] }
 0x1fb   :  { %11446 = vmatprep.subr.mxu1 %v12623_v2  ;;  %11467 = vmatprep.subr.mxu0 %v12623_v2  ;;  %v14584_v16 = vld [vmem:[%s15942_s3 + $0x128] sm:$0xff] }
 0x1fc   :  { %11447 = vmatpush3.msra.mxu1 %v13951_v20  ;;  %11448 = vmatprep.mubr.msk.f32.mxu1 %vm12624_vm2, %v12623_v2 }
 0x1fd   :  { %11468 = vmatpush3.msra.mxu0 %v14013_v39  ;;  %11449 = vmatmul.mubr.msk.f32.vlgmr.msra.gmra.mxu1 %vm5153_vm3, %v1855_v27  ;;  %v14598_v27 = vld [vmem:[%s15942_s3 + $0x120] sm:$0xff] }
 0x1fe   :  { %11469 = vmatprep.subr.mxu0 %v12623_v2  ;;  %11480 = vmatprep.subr.mxu1 %v12623_v2 }
 0x1ff   :  { %11470 = vmatpush3.msra.mxu0 %v14022_v55  ;;  %11481 = vmatpush3.msra.mxu1 %v13729_v49 }
 0x200   :  { %11471 = vmatprep.subr.mxu0 %v12623_v2  ;;  %11482 = vmatprep.subr.mxu1 %v12623_v2 }
 0x201   :  { %11472 = vmatpush3.msra.mxu0 %v14031_v61  ;;  %11483 = vmatpush3.msra.mxu1 %v13738_v53  ;;  %v4671_v3 = vpop.f32.mrf.mxu0  ;;  %v4743_v23 = vpop.f32.mrf.mxu1 }
 0x202   :  { %11473 = vmatprep.subr.mxu0 %v12623_v2  ;;  %11484 = vmatprep.subr.mxu1 %v12623_v2  ;;  %v14332_v14 = vadd.f32 %v4671_v3, %v4601_v18  ;;  %v4747_v21 = vadd.f32 %v14005_v33, %v4743_v23  ;;  %v14592_v18 = vld [vmem:[%s15942_s3 + $0x98] sm:$0xff]  ;;  %v14606_v3 = vld [vmem:[%s15942_s3 + $0x90] sm:$0xff] }
 0x203   :  { %11474 = vmatpush3.msra.mxu0 %v14040_v62  ;;  %11485 = vmatpush3.msra.mxu1 %v13749_v0  ;;  %v11076_v49 = vpop.f32.mrf.mxu1  ;;  %v11065_v63 = vpop.f32.mrf.mxu0  ;;  %v14612_v23 = vld [vmem:[%s15942_s3 + $0x118] sm:$0xff] }
 0x204   :  { %11475 = vmatprep.subr.mxu0 %v12623_v2  ;;  %11486 = vmatprep.subr.mxu1 %v12623_v2  ;;  %v14620_v49 = vld [vmem:[%s15942_s3 + $0x88] sm:$0xff]  ;;  %v14626_v63 = vld [vmem:[%s15942_s3 + $0x110] sm:$0xff] }
 0x205   :  { %11476 = vmatpush3.msra.mxu0 %v14049_v6  ;;  %11477 = vmatprep.mubr.msk.f32.mxu0 %vm12624_vm2, %v12623_v2 }
 0x206   :  { %11487 = vmatpush3.msra.mxu1 %v13762_v25  ;;  %11478 = vmatmul.mubr.msk.f32.vlgmr.msra.gmra.mxu0 %vm5153_vm3, %v2072_v51 }
 0x207   :  { %11488 = vmatprep.subr.mxu1 %v12623_v2  ;;  %11509 = vmatprep.subr.mxu0 %v12623_v2 }
 0x208   :  { %11489 = vmatpush3.msra.mxu1 %v13775_v15  ;;  %11510 = vmatpush3.msra.mxu0 %v13780_v26 }
 0x209   :  { %11490 = vmatprep.subr.mxu1 %v12623_v2  ;;  %11511 = vmatprep.subr.mxu0 %v12623_v2 }
 0x20a   :  { %11491 = vmatpush3.msra.mxu1 %v13789_v17  ;;  %11512 = vmatpush3.msra.mxu0 %v13794_v29 }
 0x20b   :  { %11492 = vmatprep.subr.mxu1 %v12623_v2  ;;  %11513 = vmatprep.subr.mxu0 %v12623_v2  ;;  %v4814_v53 = vpop.f32.mrf.mxu0  ;;  %v4888_v0 = vpop.f32.mrf.mxu1 }
 0x20c   :  { %11493 = vmatpush3.msra.mxu1 %v13803_v30  ;;  %11514 = vmatpush3.msra.mxu0 %v13808_v31  ;;  %v4818_v25 = vadd.f32 %v4814_v53, %v4747_v21  ;;  %v14640_v21 = vld [vmem:[%s15942_s3 + $0x108] sm:$0xff]  ;;  %v14648_v53 = vld [vmem:[%s15942_s3 + $0x78] sm:$0xff] }
 0x20d   :  { %11494 = vmatprep.subr.mxu1 %v12623_v2  ;;  %11515 = vmatprep.subr.mxu0 %v12623_v2  ;;  %v11098_v15 = vpop.f32.mrf.mxu1  ;;  %v11087_v26 = vpop.f32.mrf.mxu0 }
 0x20e   :  { %11495 = vmatpush3.msra.mxu1 %v13818_v35  ;;  %11516 = vmatpush3.msra.mxu0 %v13823_v36  ;;  %v14361_v17 = vadd.f32 %v4888_v0, %v4818_v25  ;;  %v14654_v0 = vld [vmem:[%s15942_s3 + $0x100] sm:$0xff]  ;;  %v14662_v15 = vld [vmem:[%s15942_s3 + $0x70] sm:$0xff]  ;;  %v14668_v26 = vld [vmem:[%s15942_s3 + $0xf8] sm:$0xff] }
 0x20f   :  { %11496 = vmatprep.subr.mxu1 %v12623_v2  ;;  %11517 = vmatprep.subr.mxu0 %v12623_v2 }
 0x210   :  { %11497 = vmatpush3.msra.mxu1 %v13832_v42  ;;  %11518 = vmatpush3.msra.mxu0 %v13837_v43 }
 0x211   :  { %11498 = vmatprep.subr.mxu1 %v12623_v2  ;;  %11519 = vmatprep.subr.mxu0 %v12623_v2 }
 0x212   :  { %11499 = vmatpush3.msra.mxu1 %v13846_v44  ;;  %11520 = vmatpush3.msra.mxu0 %v13851_v45  ;;  %v2289_v45 = vmax.f32 %v13755_v24, 0.0  ;;  %v14415_v24 = vld [vmem:[%s15942_s3 + $0x60] sm:$0xff] }
 0x213   :  { %11500 = vmatprep.subr.mxu1 %v12623_v2  ;;  %11521 = vmatprep.subr.mxu0 %v12623_v2 }
 0x214   :  { %11501 = vmatpush3.msra.mxu1 %v13860_v46  ;;  %11522 = vmatpush3.msra.mxu0 %v13865_v48  ;;  %v14424_v48 = vld [vmem:[%s15942_s3 + $0x58] sm:$0xff] }
 0x215   :  { %11502 = vmatprep.subr.mxu1 %v12623_v2  ;;  %11523 = vmatprep.subr.mxu0 %v12623_v2  ;;  %v4960_v29 = vpop.f32.mrf.mxu0  ;;  %v5031_v30 = vpop.f32.mrf.mxu1 }
 0x216   :  { %11503 = vmatpush3.msra.mxu1 %v13874_v50  ;;  %11524 = vmatpush3.msra.mxu0 %v13879_v52  ;;  %v4964_v31 = vadd.f32 %v14005_v33, %v4960_v29  ;;  %v14433_v50 = vld [vmem:[%s15942_s3 + $0x50] sm:$0xff]  ;;  %v14442_v52 = vld [vmem:[%s15942_s3 + $0x48] sm:$0xff] }
 0x217   :  { %11504 = vmatprep.subr.mxu1 %v12623_v2  ;;  %11525 = vmatprep.subr.mxu0 %v12623_v2  ;;  %v11120_v35 = vpop.f32.mrf.mxu1  ;;  %v11109_v36 = vpop.f32.mrf.mxu0  ;;  %v14533_v33 = vld [vmem:[%s15942_s3 + $0x8] sm:$0xff] }
 0x218   :  { %11505 = vmatpush3.msra.mxu1 %v13890_v58  ;;  %11506 = vmatprep.mubr.msk.f32.mxu1 %vm12624_vm2, %v12623_v2  ;;  %v5035_v42 = vadd.f32 %v5031_v30, %v4964_v31  ;;  %v14451_v58 = vld [vmem:[%s15942_s3 + $0x40] sm:$0xff]  ;;  %v2723_v30 = vmax.f32 %v13963_v60, 0.0  ;;  %v14679_v35 = vld [vmem:[%s15942_s3 + $0x68] sm:$0xff]  ;;  %v14687_v36 = vld [vmem:[%s15942_s3 + $0xf0] sm:$0xff] }
 0x219   :  { %11526 = vmatpush3.msra.mxu0 %v13897_v1  ;;  %11507 = vmatmul.mubr.msk.f32.vlgmr.msra.gmra.mxu1 %vm5153_vm3, %v2072_v51  ;;  %v14460_v1 = vld [vmem:[%s15942_s3 + $0x38] sm:$0xff]  ;;  %v14634_v51 = vld [vmem:[%s15942_s3 + $0x80] sm:$0xff]  ;;  %v14696_v60 = vld [vmem:[%s15942_s3 + $0xe8] sm:$0xff] }
 0x21a   :  { %11527 = vmatprep.subr.mxu0 %v12623_v2  ;;  %11538 = vmatprep.subr.mxu1 %v12623_v2 }
 0x21b   :  { %11528 = vmatpush3.msra.mxu0 %v13908_v8  ;;  %11539 = vmatpush3.msra.mxu1 %v13913_v9  ;;  %v14469_v8 = vld [vmem:[%s15942_s3 + $0x30] sm:$0xff] }
 0x21c   :  { %11529 = vmatprep.subr.mxu0 %v12623_v2  ;;  %11540 = vmatprep.subr.mxu1 %v12623_v2 }
 0x21d   :  { %11530 = vmatpush3.msra.mxu0 %v13922_v38  ;;  %11541 = vmatpush3.msra.mxu1 %v13927_v10  ;;  %v14478_v38 = vld [vmem:[%s15942_s3 + $0x28] sm:$0xff]  ;;  %v2506_v10 = vmax.f32 %v13883_v56, 0.0  ;;  %v14499_v56 = vld [vmem:[%s15943_s4] ss:$0 sm:$0xff] }
 0x21e   :  { %11531 = vmatprep.subr.mxu0 %v12623_v2  ;;  %11542 = vmatprep.subr.mxu1 %v12623_v2  ;;  %v5105_v43 = vpop.f32.mrf.mxu0 }
 0x21f   :  { %11532 = vmatpush3.msra.mxu0 %v13936_v12  ;;  %11543 = vmatpush3.msra.mxu1 %v13941_v13  ;;  %v14399_v44 = vadd.f32 %v5105_v43, %v5035_v42  ;;  %v14490_v13 = vld [vmem:[%s15942_s3 + $0x20] sm:$0xff] }
 0x220   :  { %11533 = vmatprep.subr.mxu0 %v12623_v2  ;;  %11544 = vmatprep.subr.mxu1 %v12623_v2  ;;  %v11131_v46 = vpop.f32.mrf.mxu0  ;;  %v14705_v42 = vld [vmem:[%s15942_s3 + $0xe0] sm:$0xff] }
 0x221   :  { %11534 = vmatpush3.msra.mxu0 %v13951_v20  ;;  %11535 = vmatprep.mubr.msk.f32.mxu0 %vm12624_vm2, %v12623_v2  ;;  %v14504_v20 = vld [vmem:[%s15942_s3 + $0x18] sm:$0xff]  ;;  %v2940_v46 = vmax.f32 %v14053_v19, 0.0 }
 0x222   :  { %11545 = vmatpush3.msra.mxu1 %v13958_v28  ;;  %11536 = vmatmul.mubr.msk.f32.vlgmr.msra.gmra.mxu0 %vm5153_vm3, %v2289_v45  ;;  %v14510_v28 = vld [vmem:[%s15942_s3 + $0xc8] sm:$0xff]  ;;  %v14714_v45 = vld [vmem:[%s15942_s3 + $0xd8] sm:$0xff] }
 0x223   :  { %11546 = vmatprep.subr.mxu1 %v12623_v2  ;;  %11567 = vmatprep.subr.mxu0 %v12623_v2 }
 0x224   :  { %11547 = vmatpush3.msra.mxu1 %v13971_v4  ;;  %11568 = vmatpush3.msra.mxu0 %v14415_v24  ;;  %v14518_v4 = vld [vmem:[%s15942_s3 + $0x10] sm:$0xff] }
 0x225   :  { %11548 = vmatprep.subr.mxu1 %v12623_v2  ;;  %11569 = vmatprep.subr.mxu0 %v12623_v2 }
 0x226   :  { %11549 = vmatpush3.msra.mxu1 %v13980_v47  ;;  %11570 = vmatpush3.msra.mxu0 %v14424_v48  ;;  %v14524_v47 = vld [vmem:[%s15942_s3 + $0xc0] sm:$0xff] }
 0x227   :  { %11550 = vmatprep.subr.mxu1 %v12623_v2  ;;  %11571 = vmatprep.subr.mxu0 %v12623_v2 }
 0x228   :  { %11551 = vmatpush3.msra.mxu1 %v13989_v5  ;;  %11572 = vmatpush3.msra.mxu0 %v14433_v50 }
 0x229   :  { %11552 = vmatprep.subr.mxu1 %v12623_v2  ;;  %11573 = vmatprep.subr.mxu0 %v12623_v2 }
 0x22a   :  { %11553 = vmatpush3.msra.mxu1 %v13998_v7  ;;  %11574 = vmatpush3.msra.mxu0 %v14442_v52 }
 0x22b   :  { %11554 = vmatprep.subr.mxu1 %v12623_v2  ;;  %11575 = vmatprep.subr.mxu0 %v12623_v2 }
 0x22c   :  { %11555 = vmatpush3.msra.mxu1 %v14013_v39  ;;  %11576 = vmatpush3.msra.mxu0 %v14451_v58  ;;  %v14539_v39 = vld [vmem:[%s15942_s3 + $0xb8] sm:$0xff] }
 0x22d   :  { %11556 = vmatprep.subr.mxu1 %v12623_v2  ;;  %11577 = vmatprep.subr.mxu0 %v12623_v2 }
 0x22e   :  { %11557 = vmatpush3.msra.mxu1 %v14022_v55  ;;  %11578 = vmatpush3.msra.mxu0 %v14460_v1 }
 0x22f   :  { %11558 = vmatprep.subr.mxu1 %v12623_v2  ;;  %11579 = vmatprep.subr.mxu0 %v12623_v2 }
 0x230   :  { %11559 = vmatpush3.msra.mxu1 %v14031_v61  ;;  %11580 = vmatpush3.msra.mxu0 %v14469_v8 }
 0x231   :  { %11560 = vmatprep.subr.mxu1 %v12623_v2  ;;  %11581 = vmatprep.subr.mxu0 %v12623_v2  ;;  %v5223_v9 = vpop.f32.mrf.mxu1 }
 0x232   :  { %11561 = vmatpush3.msra.mxu1 %v14040_v62  ;;  %11582 = vmatpush3.msra.mxu0 %v14478_v38  ;;  %v5233_v5 = vadd.f32 %v14499_v56, %v5223_v9  ;;  %v14547_v62 = vld [vmem:[%s15942_s3] sm:$0xff] }
 0x233   :  { %11562 = vmatprep.subr.mxu1 %v12623_v2  ;;  %11583 = vmatprep.subr.mxu0 %v12623_v2  ;;  %v11160_v12 = vpop.f32.mrf.mxu1 }
 0x234   :  { %11563 = vmatpush3.msra.mxu1 %v14049_v6  ;;  %11564 = vmatprep.mubr.msk.f32.mxu1 %vm12624_vm2, %v12623_v2  ;;  %v14555_v6 = vld [vmem:[%s15942_s3 + $0xb0] sm:$0xff] }
 0x235   :  { %11584 = vmatpush3.msra.mxu0 %v14490_v13  ;;  %11565 = vmatmul.mubr.msk.f32.vlgmr.msra.gmra.mxu1 %vm5153_vm3, %v2506_v10 }
 0x236   :  { %11585 = vmatprep.subr.mxu0 %v12623_v2  ;;  %11596 = vmatprep.subr.mxu1 %v12623_v2 }
 0x237   :  { %11586 = vmatpush3.msra.mxu0 %v14504_v20  ;;  %11597 = vmatpush3.msra.mxu1 %v14510_v28 }
 0x238   :  { %11587 = vmatprep.subr.mxu0 %v12623_v2  ;;  %11598 = vmatprep.subr.mxu1 %v12623_v2 }
 0x239   :  { %11588 = vmatpush3.msra.mxu0 %v14518_v4  ;;  %11599 = vmatpush3.msra.mxu1 %v14524_v47 }
 0x23a   :  { %11589 = vmatprep.subr.mxu0 %v12623_v2  ;;  %11600 = vmatprep.subr.mxu1 %v12623_v2  ;;  %v5303_v7 = vpop.f32.mrf.mxu0 }
 0x23b   :  { %11590 = vmatpush3.msra.mxu0 %v14533_v33  ;;  %11601 = vmatpush3.msra.mxu1 %v14539_v39  ;;  %v5307_v55 = vadd.f32 %v5303_v7, %v5233_v5 }
 0x23c   :  { %11591 = vmatprep.subr.mxu0 %v12623_v2  ;;  %11602 = vmatprep.subr.mxu1 %v12623_v2  ;;  %v11189_v61 = vpop.f32.mrf.mxu0 }
 0x23d   :  { %11592 = vmatpush3.msra.mxu0 %v14547_v62  ;;  %11593 = vmatprep.mubr.msk.f32.mxu0 %vm12624_vm2, %v12623_v2 }
 0x23e   :  { %11603 = vmatpush3.msra.mxu1 %v14555_v6  ;;  %11594 = vmatmul.mubr.msk.f32.vlgmr.msra.gmra.mxu0 %vm5153_vm3, %v2506_v10  ;;  %v14724_v10 = vld [vmem:[%s15942_s3 + $0xd0] sm:$0xff] }
 0x23f   :  { %11604 = vmatprep.subr.mxu1 %v12623_v2  ;;  %11625 = vmatprep.subr.mxu0 %v12623_v2 }
 0x240   :  { %11605 = vmatpush3.msra.mxu1 %v14564_v59  ;;  %11626 = vmatpush3.msra.mxu0 %v14570_v34 }
 0x241   :  { %11606 = vmatprep.subr.mxu1 %v12623_v2  ;;  %11627 = vmatprep.subr.mxu0 %v12623_v2 }
 0x242   :  { %11607 = vmatpush3.msra.mxu1 %v14578_v40  ;;  %11628 = vmatpush3.msra.mxu0 %v14584_v16 }
 0x243   :  { %11608 = vmatprep.subr.mxu1 %v12623_v2  ;;  %11629 = vmatprep.subr.mxu0 %v12623_v2 }
 0x244   :  { %11609 = vmatpush3.msra.mxu1 %v14592_v18  ;;  %11630 = vmatpush3.msra.mxu0 %v14598_v27 }
 0x245   :  { %11610 = vmatprep.subr.mxu1 %v12623_v2  ;;  %11631 = vmatprep.subr.mxu0 %v12623_v2 }
 0x246   :  { %11611 = vmatpush3.msra.mxu1 %v14606_v3  ;;  %11632 = vmatpush3.msra.mxu0 %v14612_v23 }
 0x247   :  { %11612 = vmatprep.subr.mxu1 %v12623_v2  ;;  %11633 = vmatprep.subr.mxu0 %v12623_v2 }
 0x248   :  { %11613 = vmatpush3.msra.mxu1 %v14620_v49  ;;  %11634 = vmatpush3.msra.mxu0 %v14626_v63 }
 0x249   :  { %11614 = vmatprep.subr.mxu1 %v12623_v2  ;;  %11635 = vmatprep.subr.mxu0 %v12623_v2 }
 0x24a   :  { %11615 = vmatpush3.msra.mxu1 %v14634_v51  ;;  %11636 = vmatpush3.msra.mxu0 %v14640_v21 }
 0x24b   :  { %11616 = vmatprep.subr.mxu1 %v12623_v2  ;;  %11637 = vmatprep.subr.mxu0 %v12623_v2 }
 0x24c   :  { %11617 = vmatpush3.msra.mxu1 %v14648_v53  ;;  %11638 = vmatpush3.msra.mxu0 %v14654_v0 }
 0x24d   :  { %11618 = vmatprep.subr.mxu1 %v12623_v2  ;;  %11639 = vmatprep.subr.mxu0 %v12623_v2  ;;  %v5377_v25 = vpop.f32.mrf.mxu1 }
 0x24e   :  { %11619 = vmatpush3.msra.mxu1 %v14662_v15  ;;  %11640 = vmatpush3.msra.mxu0 %v14668_v26  ;;  %v14671_v29 = vadd.f32 %v5377_v25, %v5307_v55  ;;  %v3157_v25 = vmax.f32 %v14083_v41, 0.0 }
 0x24f   :  { %11620 = vmatprep.subr.mxu1 %v12623_v2  ;;  %11641 = vmatprep.subr.mxu0 %v12623_v2  ;;  %v11218_v31 = vpop.f32.mrf.mxu1 }
 0x250   :  { %11621 = vmatpush3.msra.mxu1 %v14679_v35  ;;  %11622 = vmatprep.mubr.msk.f32.mxu1 %vm12624_vm2, %v12623_v2  ;;  %v3374_v31 = vmax.f32 %v14124_v32, 0.0 }
 0x251   :  { %11642 = vmatpush3.msra.mxu0 %v14687_v36  ;;  %11623 = vmatmul.mubr.msk.f32.vlgmr.msra.gmra.mxu1 %vm5153_vm3, %v2723_v30 }
 0x252   :  { %11643 = vmatprep.subr.mxu0 %v12623_v2  ;;  %11654 = vmatprep.subr.mxu1 %v12623_v2 }
 0x253   :  { %11644 = vmatpush3.msra.mxu0 %v14696_v60  ;;  %11655 = vmatpush3.msra.mxu1 %v14415_v24 }
 0x254   :  { %11645 = vmatprep.subr.mxu0 %v12623_v2  ;;  %11656 = vmatprep.subr.mxu1 %v12623_v2 }
 0x255   :  { %11646 = vmatpush3.msra.mxu0 %v14705_v42  ;;  %11657 = vmatpush3.msra.mxu1 %v14424_v48 }
 0x256   :  { %11647 = vmatprep.subr.mxu0 %v12623_v2  ;;  %11658 = vmatprep.subr.mxu1 %v12623_v2  ;;  %v5449_v43 = vpop.f32.mrf.mxu0 }
 0x257   :  { %11648 = vmatpush3.msra.mxu0 %v14714_v45  ;;  %11659 = vmatpush3.msra.mxu1 %v14433_v50  ;;  %v5453_v19 = vadd.f32 %v14499_v56, %v5449_v43 }
 0x258   :  { %11649 = vmatprep.subr.mxu0 %v12623_v2  ;;  %11660 = vmatprep.subr.mxu1 %v12623_v2  ;;  %v11247_v9 = vpop.f32.mrf.mxu0 }
 0x259   :  { %11650 = vmatpush3.msra.mxu0 %v14724_v10  ;;  %11651 = vmatprep.mubr.msk.f32.mxu0 %vm12624_vm2, %v12623_v2 }
 0x25a   :  { %11661 = vmatpush3.msra.mxu1 %v14442_v52  ;;  %11652 = vmatmul.mubr.msk.f32.vlgmr.msra.gmra.mxu0 %vm5153_vm3, %v2940_v46 }
 0x25b   :  { %11662 = vmatprep.subr.mxu1 %v12623_v2  ;;  %11683 = vmatprep.subr.mxu0 %v12623_v2 }
 0x25c   :  { %11663 = vmatpush3.msra.mxu1 %v14451_v58  ;;  %11684 = vmatpush3.msra.mxu0 %v14510_v28 }
 0x25d   :  { %11664 = vmatprep.subr.mxu1 %v12623_v2  ;;  %11685 = vmatprep.subr.mxu0 %v12623_v2 }
 0x25e   :  { %11665 = vmatpush3.msra.mxu1 %v14460_v1  ;;  %11686 = vmatpush3.msra.mxu0 %v14524_v47 }
 0x25f   :  { %11666 = vmatprep.subr.mxu1 %v12623_v2  ;;  %11687 = vmatprep.subr.mxu0 %v12623_v2 }
 0x260   :  { %11667 = vmatpush3.msra.mxu1 %v14469_v8  ;;  %11688 = vmatpush3.msra.mxu0 %v14539_v39 }
 0x261   :  { %11668 = vmatprep.subr.mxu1 %v12623_v2  ;;  %11689 = vmatprep.subr.mxu0 %v12623_v2 }
 0x262   :  { %11669 = vmatpush3.msra.mxu1 %v14478_v38  ;;  %11690 = vmatpush3.msra.mxu0 %v14555_v6 }
 0x263   :  { %11670 = vmatprep.subr.mxu1 %v12623_v2  ;;  %11691 = vmatprep.subr.mxu0 %v12623_v2 }
 0x264   :  { %11671 = vmatpush3.msra.mxu1 %v14490_v13  ;;  %11692 = vmatpush3.msra.mxu0 %v14564_v59 }
 0x265   :  { %11672 = vmatprep.subr.mxu1 %v12623_v2  ;;  %11693 = vmatprep.subr.mxu0 %v12623_v2 }
 0x266   :  { %11673 = vmatpush3.msra.mxu1 %v14504_v20  ;;  %11694 = vmatpush3.msra.mxu0 %v14578_v40 }
 0x267   :  { %11674 = vmatprep.subr.mxu1 %v12623_v2  ;;  %11695 = vmatprep.subr.mxu0 %v12623_v2 }
 0x268   :  { %11675 = vmatpush3.msra.mxu1 %v14518_v4  ;;  %11696 = vmatpush3.msra.mxu0 %v14592_v18 }
 0x269   :  { %11676 = vmatprep.subr.mxu1 %v12623_v2  ;;  %11697 = vmatprep.subr.mxu0 %v12623_v2  ;;  %v5523_v12 = vpop.f32.mrf.mxu1 }
 0x26a   :  { %11677 = vmatpush3.msra.mxu1 %v14533_v33  ;;  %11698 = vmatpush3.msra.mxu0 %v14606_v3  ;;  %v5527_v5 = vadd.f32 %v5523_v12, %v5453_v19 }
 0x26b   :  { %11678 = vmatprep.subr.mxu1 %v12623_v2  ;;  %11699 = vmatprep.subr.mxu0 %v12623_v2  ;;  %v11276_v7 = vpop.f32.mrf.mxu1 }
 0x26c   :  { %11679 = vmatpush3.msra.mxu1 %v14547_v62  ;;  %11680 = vmatprep.mubr.msk.f32.mxu1 %vm12624_vm2, %v12623_v2  ;;  %v3591_v7 = vmax.f32 %v14153_v57, 0.0 }
 0x26d   :  { %11700 = vmatpush3.msra.mxu0 %v14620_v49  ;;  %11681 = vmatmul.mubr.msk.f32.vlgmr.msra.gmra.mxu1 %vm5153_vm3, %v2940_v46 }
 0x26e   :  { %11701 = vmatprep.subr.mxu0 %v12623_v2  ;;  %11712 = vmatprep.subr.mxu1 %v12623_v2 }
 0x26f   :  { %11702 = vmatpush3.msra.mxu0 %v14634_v51  ;;  %11713 = vmatpush3.msra.mxu1 %v14570_v34 }
 0x270   :  { %11703 = vmatprep.subr.mxu0 %v12623_v2  ;;  %11714 = vmatprep.subr.mxu1 %v12623_v2 }
 0x271   :  { %11704 = vmatpush3.msra.mxu0 %v14648_v53  ;;  %11715 = vmatpush3.msra.mxu1 %v14584_v16 }
 0x272   :  { %11705 = vmatprep.subr.mxu0 %v12623_v2  ;;  %11716 = vmatprep.subr.mxu1 %v12623_v2  ;;  %v5597_v55 = vpop.f32.mrf.mxu0 }
 0x273   :  { %11706 = vmatpush3.msra.mxu0 %v14662_v15  ;;  %11717 = vmatpush3.msra.mxu1 %v14598_v27  ;;  %v14783_v61 = vadd.f32 %v5597_v55, %v5527_v5 }
 0x274   :  { %11707 = vmatprep.subr.mxu0 %v12623_v2  ;;  %11718 = vmatprep.subr.mxu1 %v12623_v2  ;;  %v11305_v30 = vpop.f32.mrf.mxu0 }
 0x275   :  { %11708 = vmatpush3.msra.mxu0 %v14679_v35  ;;  %11709 = vmatprep.mubr.msk.f32.mxu0 %vm12624_vm2, %v12623_v2 }
 0x276   :  { %11719 = vmatpush3.msra.mxu1 %v14612_v23  ;;  %11710 = vmatmul.mubr.msk.f32.vlgmr.msra.gmra.mxu0 %vm5153_vm3, %v3157_v25  ;;  %v3808_v25 = vmax.f32 %v14193_v22, 0.0 }
 0x277   :  { %11720 = vmatprep.subr.mxu1 %v12623_v2  ;;  %11741 = vmatprep.subr.mxu0 %v12623_v2 }
 0x278   :  { %11721 = vmatpush3.msra.mxu1 %v14626_v63  ;;  %11742 = vmatpush3.msra.mxu0 %v14415_v24 }
 0x279   :  { %11722 = vmatprep.subr.mxu1 %v12623_v2  ;;  %11743 = vmatprep.subr.mxu0 %v12623_v2 }
 0x27a   :  { %11723 = vmatpush3.msra.mxu1 %v14640_v21  ;;  %11744 = vmatpush3.msra.mxu0 %v14424_v48 }
 0x27b   :  { %11724 = vmatprep.subr.mxu1 %v12623_v2  ;;  %11745 = vmatprep.subr.mxu0 %v12623_v2 }
 0x27c   :  { %11725 = vmatpush3.msra.mxu1 %v14654_v0  ;;  %11746 = vmatpush3.msra.mxu0 %v14433_v50 }
 0x27d   :  { %11726 = vmatprep.subr.mxu1 %v12623_v2  ;;  %11747 = vmatprep.subr.mxu0 %v12623_v2 }
 0x27e   :  { %11727 = vmatpush3.msra.mxu1 %v14668_v26  ;;  %11748 = vmatpush3.msra.mxu0 %v14442_v52 }
 0x27f   :  { %11728 = vmatprep.subr.mxu1 %v12623_v2  ;;  %11749 = vmatprep.subr.mxu0 %v12623_v2 }
 0x280   :  { %11729 = vmatpush3.msra.mxu1 %v14687_v36  ;;  %11750 = vmatpush3.msra.mxu0 %v14451_v58 }
 0x281   :  { %11730 = vmatprep.subr.mxu1 %v12623_v2  ;;  %11751 = vmatprep.subr.mxu0 %v12623_v2 }
 0x282   :  { %11731 = vmatpush3.msra.mxu1 %v14696_v60  ;;  %11752 = vmatpush3.msra.mxu0 %v14460_v1 }
 0x283   :  { %11732 = vmatprep.subr.mxu1 %v12623_v2  ;;  %11753 = vmatprep.subr.mxu0 %v12623_v2 }
 0x284   :  { %11733 = vmatpush3.msra.mxu1 %v14705_v42  ;;  %11754 = vmatpush3.msra.mxu0 %v14469_v8 }
 0x285   :  { %11734 = vmatprep.subr.mxu1 %v12623_v2  ;;  %11755 = vmatprep.subr.mxu0 %v12623_v2  ;;  %v5669_v41 = vpop.f32.mrf.mxu1 }
 0x286   :  { %11735 = vmatpush3.msra.mxu1 %v14714_v45  ;;  %11756 = vmatpush3.msra.mxu0 %v14478_v38  ;;  %v5673_v32 = vadd.f32 %v14499_v56, %v5669_v41 }
 0x287   :  { %11736 = vmatprep.subr.mxu1 %v12623_v2  ;;  %11757 = vmatprep.subr.mxu0 %v12623_v2  ;;  %v11334_v43 = vpop.f32.mrf.mxu1 }
 0x288   :  { %11737 = vmatpush3.msra.mxu1 %v14724_v10  ;;  %11738 = vmatprep.mubr.msk.f32.mxu1 %vm12624_vm2, %v12623_v2 }
 0x289   :  { %11758 = vmatpush3.msra.mxu0 %v14490_v13  ;;  %11739 = vmatmul.mubr.msk.f32.vlgmr.msra.gmra.mxu1 %vm5153_vm3, %v3374_v31 }
 0x28a   :  { %11759 = vmatprep.subr.mxu0 %v12623_v2  ;;  %11770 = vmatprep.subr.mxu1 %v12623_v2 }
 0x28b   :  { %11760 = vmatpush3.msra.mxu0 %v14504_v20  ;;  %11771 = vmatpush3.msra.mxu1 %v14510_v28 }
 0x28c   :  { %11761 = vmatprep.subr.mxu0 %v12623_v2  ;;  %11772 = vmatprep.subr.mxu1 %v12623_v2 }
 0x28d   :  { %11762 = vmatpush3.msra.mxu0 %v14518_v4  ;;  %11773 = vmatpush3.msra.mxu1 %v14524_v47 }
 0x28e   :  { %11763 = vmatprep.subr.mxu0 %v12623_v2  ;;  %11774 = vmatprep.subr.mxu1 %v12623_v2  ;;  %v5743_v46 = vpop.f32.mrf.mxu0 }
 0x28f   :  { %11764 = vmatpush3.msra.mxu0 %v14533_v33  ;;  %11775 = vmatpush3.msra.mxu1 %v14539_v39  ;;  %v5747_v9 = vadd.f32 %v5743_v46, %v5673_v32 }
 0x290   :  { %11765 = vmatprep.subr.mxu0 %v12623_v2  ;;  %11776 = vmatprep.subr.mxu1 %v12623_v2  ;;  %v11363_v19 = vpop.f32.mrf.mxu0 }
 0x291   :  { %11766 = vmatpush3.msra.mxu0 %v14547_v62  ;;  %11767 = vmatprep.mubr.msk.f32.mxu0 %vm12624_vm2, %v12623_v2 }
 0x292   :  { %11777 = vmatpush3.msra.mxu1 %v14555_v6  ;;  %11768 = vmatmul.mubr.msk.f32.vlgmr.msra.gmra.mxu0 %vm5153_vm3, %v3374_v31 }
 0x293   :  { %11778 = vmatprep.subr.mxu1 %v12623_v2  ;;  %11799 = vmatprep.subr.mxu0 %v12623_v2 }
 0x294   :  { %11779 = vmatpush3.msra.mxu1 %v14564_v59  ;;  %11800 = vmatpush3.msra.mxu0 %v14570_v34 }
 0x295   :  { %11780 = vmatprep.subr.mxu1 %v12623_v2  ;;  %11801 = vmatprep.subr.mxu0 %v12623_v2 }
 0x296   :  { %11781 = vmatpush3.msra.mxu1 %v14578_v40  ;;  %11802 = vmatpush3.msra.mxu0 %v14584_v16 }
 0x297   :  { %11782 = vmatprep.subr.mxu1 %v12623_v2  ;;  %11803 = vmatprep.subr.mxu0 %v12623_v2 }
 0x298   :  { %11783 = vmatpush3.msra.mxu1 %v14592_v18  ;;  %11804 = vmatpush3.msra.mxu0 %v14598_v27 }
 0x299   :  { %11784 = vmatprep.subr.mxu1 %v12623_v2  ;;  %11805 = vmatprep.subr.mxu0 %v12623_v2 }
 0x29a   :  { %11785 = vmatpush3.msra.mxu1 %v14606_v3  ;;  %11806 = vmatpush3.msra.mxu0 %v14612_v23 }
 0x29b   :  { %11786 = vmatprep.subr.mxu1 %v12623_v2  ;;  %11807 = vmatprep.subr.mxu0 %v12623_v2 }
 0x29c   :  { %11787 = vmatpush3.msra.mxu1 %v14620_v49  ;;  %11808 = vmatpush3.msra.mxu0 %v14626_v63 }
 0x29d   :  { %11788 = vmatprep.subr.mxu1 %v12623_v2  ;;  %11809 = vmatprep.subr.mxu0 %v12623_v2 }
 0x29e   :  { %11789 = vmatpush3.msra.mxu1 %v14634_v51  ;;  %11810 = vmatpush3.msra.mxu0 %v14640_v21 }
 0x29f   :  { %11790 = vmatprep.subr.mxu1 %v12623_v2  ;;  %11811 = vmatprep.subr.mxu0 %v12623_v2 }
 0x2a0   :  { %11791 = vmatpush3.msra.mxu1 %v14648_v53  ;;  %11812 = vmatpush3.msra.mxu0 %v14654_v0 }
 0x2a1   :  { %11792 = vmatprep.subr.mxu1 %v12623_v2  ;;  %11813 = vmatprep.subr.mxu0 %v12623_v2  ;;  %v5817_v12 = vpop.f32.mrf.mxu1 }
 0x2a2   :  { %11793 = vmatpush3.msra.mxu1 %v14662_v15  ;;  %11814 = vmatpush3.msra.mxu0 %v14668_v26  ;;  %v14885_v5 = vadd.f32 %v5817_v12, %v5747_v9  ;;  %v4025_v9 = vmax.f32 %v14222_v54, 0.0  ;;  %v4242_v12 = vmax.f32 %v14263_v11, 0.0 }
 0x2a3   :  { %11794 = vmatprep.subr.mxu1 %v12623_v2  ;;  %11815 = vmatprep.subr.mxu0 %v12623_v2  ;;  %v11392_v55 = vpop.f32.mrf.mxu1 }
 0x2a4   :  { %11795 = vmatpush3.msra.mxu1 %v14679_v35  ;;  %11796 = vmatprep.mubr.msk.f32.mxu1 %vm12624_vm2, %v12623_v2 }
 0x2a5   :  { %11816 = vmatpush3.msra.mxu0 %v14687_v36  ;;  %11797 = vmatmul.mubr.msk.f32.vlgmr.msra.gmra.mxu1 %vm5153_vm3, %v3591_v7 }
 0x2a6   :  { %11817 = vmatprep.subr.mxu0 %v12623_v2  ;;  %11828 = vmatprep.subr.mxu1 %v12623_v2 }
 0x2a7   :  { %11818 = vmatpush3.msra.mxu0 %v14696_v60  ;;  %11829 = vmatpush3.msra.mxu1 %v14415_v24 }
 0x2a8   :  { %11819 = vmatprep.subr.mxu0 %v12623_v2  ;;  %11830 = vmatprep.subr.mxu1 %v12623_v2 }
 0x2a9   :  { %11820 = vmatpush3.msra.mxu0 %v14705_v42  ;;  %11831 = vmatpush3.msra.mxu1 %v14424_v48 }
 0x2aa   :  { %11821 = vmatprep.subr.mxu0 %v12623_v2  ;;  %11832 = vmatprep.subr.mxu1 %v12623_v2  ;;  %v5889_v57 = vpop.f32.mrf.mxu0 }
 0x2ab   :  { %11822 = vmatpush3.msra.mxu0 %v14714_v45  ;;  %11833 = vmatpush3.msra.mxu1 %v14433_v50  ;;  %v5893_v22 = vadd.f32 %v14499_v56, %v5889_v57 }
 0x2ac   :  { %11823 = vmatprep.subr.mxu0 %v12623_v2  ;;  %11834 = vmatprep.subr.mxu1 %v12623_v2  ;;  %v11421_v30 = vpop.f32.mrf.mxu0 }
 0x2ad   :  { %11824 = vmatpush3.msra.mxu0 %v14724_v10  ;;  %11825 = vmatprep.mubr.msk.f32.mxu0 %vm12624_vm2, %v12623_v2 }
 0x2ae   :  { %11835 = vmatpush3.msra.mxu1 %v14442_v52  ;;  %11826 = vmatmul.mubr.msk.f32.vlgmr.msra.gmra.mxu0 %vm5153_vm3, %v3808_v25 }
 0x2af   :  { %11836 = vmatprep.subr.mxu1 %v12623_v2  ;;  %11857 = vmatprep.subr.mxu0 %v12623_v2 }
 0x2b0   :  { %11837 = vmatpush3.msra.mxu1 %v14451_v58  ;;  %11858 = vmatpush3.msra.mxu0 %v14510_v28 }
 0x2b1   :  { %11838 = vmatprep.subr.mxu1 %v12623_v2  ;;  %11859 = vmatprep.subr.mxu0 %v12623_v2 }
 0x2b2   :  { %11839 = vmatpush3.msra.mxu1 %v14460_v1  ;;  %11860 = vmatpush3.msra.mxu0 %v14524_v47 }
 0x2b3   :  { %11840 = vmatprep.subr.mxu1 %v12623_v2  ;;  %11861 = vmatprep.subr.mxu0 %v12623_v2 }
 0x2b4   :  { %11841 = vmatpush3.msra.mxu1 %v14469_v8  ;;  %11862 = vmatpush3.msra.mxu0 %v14539_v39 }
 0x2b5   :  { %11842 = vmatprep.subr.mxu1 %v12623_v2  ;;  %11863 = vmatprep.subr.mxu0 %v12623_v2 }
 0x2b6   :  { %11843 = vmatpush3.msra.mxu1 %v14478_v38  ;;  %11864 = vmatpush3.msra.mxu0 %v14555_v6 }
 0x2b7   :  { %11844 = vmatprep.subr.mxu1 %v12623_v2  ;;  %11865 = vmatprep.subr.mxu0 %v12623_v2 }
 0x2b8   :  { %11845 = vmatpush3.msra.mxu1 %v14490_v13  ;;  %11866 = vmatpush3.msra.mxu0 %v14564_v59 }
 0x2b9   :  { %11846 = vmatprep.subr.mxu1 %v12623_v2  ;;  %11867 = vmatprep.subr.mxu0 %v12623_v2 }
 0x2ba   :  { %11847 = vmatpush3.msra.mxu1 %v14504_v20  ;;  %11868 = vmatpush3.msra.mxu0 %v14578_v40 }
 0x2bb   :  { %11848 = vmatprep.subr.mxu1 %v12623_v2  ;;  %11869 = vmatprep.subr.mxu0 %v12623_v2 }
 0x2bc   :  { %11849 = vmatpush3.msra.mxu1 %v14518_v4  ;;  %11870 = vmatpush3.msra.mxu0 %v14592_v18 }
 0x2bd   :  { %11850 = vmatprep.subr.mxu1 %v12623_v2  ;;  %11871 = vmatprep.subr.mxu0 %v12623_v2  ;;  %v5963_v41 = vpop.f32.mrf.mxu1 }
 0x2be   :  { %11851 = vmatpush3.msra.mxu1 %v14533_v33  ;;  %11872 = vmatpush3.msra.mxu0 %v14606_v3  ;;  %v5967_v31 = vadd.f32 %v5963_v41, %v5893_v22  ;;  %v4459_v41 = vmax.f32 %v14291_v37, 0.0 }
 0x2bf   :  { %11852 = vmatprep.subr.mxu1 %v12623_v2  ;;  %11873 = vmatprep.subr.mxu0 %v12623_v2  ;;  %v11450_v43 = vpop.f32.mrf.mxu1 }
 0x2c0   :  { %11853 = vmatpush3.msra.mxu1 %v14547_v62  ;;  %11854 = vmatprep.mubr.msk.f32.mxu1 %vm12624_vm2, %v12623_v2  ;;  %v4676_v43 = vmax.f32 %v14332_v14, 0.0 }
 0x2c1   :  { %11874 = vmatpush3.msra.mxu0 %v14620_v49  ;;  %11855 = vmatmul.mubr.msk.f32.vlgmr.msra.gmra.mxu1 %vm5153_vm3, %v3808_v25 }
 0x2c2   :  { %11875 = vmatprep.subr.mxu0 %v12623_v2  ;;  %11886 = vmatprep.subr.mxu1 %v12623_v2 }
 0x2c3   :  { %11876 = vmatpush3.msra.mxu0 %v14634_v51  ;;  %11887 = vmatpush3.msra.mxu1 %v14570_v34 }
 0x2c4   :  { %11877 = vmatprep.subr.mxu0 %v12623_v2  ;;  %11888 = vmatprep.subr.mxu1 %v12623_v2 }
 0x2c5   :  { %11878 = vmatpush3.msra.mxu0 %v14648_v53  ;;  %11889 = vmatpush3.msra.mxu1 %v14584_v16 }
 0x2c6   :  { %11879 = vmatprep.subr.mxu0 %v12623_v2  ;;  %11890 = vmatprep.subr.mxu1 %v12623_v2  ;;  %v6037_v32 = vpop.f32.mrf.mxu0 }
 0x2c7   :  { %11880 = vmatpush3.msra.mxu0 %v14662_v15  ;;  %11891 = vmatpush3.msra.mxu1 %v14598_v27  ;;  %v14967_v46 = vadd.f32 %v6037_v32, %v5967_v31  ;;  %v15374_v32 = vld [vmem:[%s15944_s5 + $0xf0] sm:$0xff] }
 0x2c8   :  { %11881 = vmatprep.subr.mxu0 %v12623_v2  ;;  %11892 = vmatprep.subr.mxu1 %v12623_v2  ;;  %v11479_v19 = vpop.f32.mrf.mxu0 }
 0x2c9   :  { %11882 = vmatpush3.msra.mxu0 %v14679_v35  ;;  %11883 = vmatprep.mubr.msk.f32.mxu0 %vm12624_vm2, %v12623_v2  ;;  %v15388_v19 = vld [vmem:[%s15944_s5 + $0xe8] sm:$0xff] }
 0x2ca   :  { %11893 = vmatpush3.msra.mxu1 %v14612_v23  ;;  %11884 = vmatmul.mubr.msk.f32.vlgmr.msra.gmra.mxu0 %vm5153_vm3, %v4025_v9  ;;  %v15383_v9 = vld [vmem:[%s15944_s5 + $0x70] sm:$0xff] }
 0x2cb   :  { %11894 = vmatprep.subr.mxu1 %v12623_v2  ;;  %11915 = vmatprep.subr.mxu0 %v12623_v2 }
 0x2cc   :  { %11895 = vmatpush3.msra.mxu1 %v14626_v63  ;;  %11916 = vmatpush3.msra.mxu0 %v14415_v24 }
 0x2cd   :  { %11896 = vmatprep.subr.mxu1 %v12623_v2  ;;  %11917 = vmatprep.subr.mxu0 %v12623_v2 }
 0x2ce   :  { %11897 = vmatpush3.msra.mxu1 %v14640_v21  ;;  %11918 = vmatpush3.msra.mxu0 %v14424_v48 }
 0x2cf   :  { %11898 = vmatprep.subr.mxu1 %v12623_v2  ;;  %11919 = vmatprep.subr.mxu0 %v12623_v2 }
 0x2d0   :  { %11899 = vmatpush3.msra.mxu1 %v14654_v0  ;;  %11920 = vmatpush3.msra.mxu0 %v14433_v50 }
 0x2d1   :  { %11900 = vmatprep.subr.mxu1 %v12623_v2  ;;  %11921 = vmatprep.subr.mxu0 %v12623_v2 }
 0x2d2   :  { %11901 = vmatpush3.msra.mxu1 %v14668_v26  ;;  %11922 = vmatpush3.msra.mxu0 %v14442_v52 }
 0x2d3   :  { %11902 = vmatprep.subr.mxu1 %v12623_v2  ;;  %11923 = vmatprep.subr.mxu0 %v12623_v2 }
 0x2d4   :  { %11903 = vmatpush3.msra.mxu1 %v14687_v36  ;;  %11924 = vmatpush3.msra.mxu0 %v14451_v58 }
 0x2d5   :  { %11904 = vmatprep.subr.mxu1 %v12623_v2  ;;  %11925 = vmatprep.subr.mxu0 %v12623_v2 }
 0x2d6   :  { %11905 = vmatpush3.msra.mxu1 %v14696_v60  ;;  %11926 = vmatpush3.msra.mxu0 %v14460_v1 }
 0x2d7   :  { %11906 = vmatprep.subr.mxu1 %v12623_v2  ;;  %11927 = vmatprep.subr.mxu0 %v12623_v2 }
 0x2d8   :  { %11907 = vmatpush3.msra.mxu1 %v14705_v42  ;;  %11928 = vmatpush3.msra.mxu0 %v14469_v8 }
 0x2d9   :  { %11908 = vmatprep.subr.mxu1 %v12623_v2  ;;  %11929 = vmatprep.subr.mxu0 %v12623_v2  ;;  %v6109_v54 = vpop.f32.mrf.mxu1 }
 0x2da   :  { %11909 = vmatpush3.msra.mxu1 %v14714_v45  ;;  %11930 = vmatpush3.msra.mxu0 %v14478_v38  ;;  %v6113_v11 = vadd.f32 %v14499_v56, %v6109_v54  ;;  %v15397_v54 = vld [vmem:[%s15944_s5 + $0x68] sm:$0xff] }
 0x2db   :  { %11910 = vmatprep.subr.mxu1 %v12623_v2  ;;  %11931 = vmatprep.subr.mxu0 %v12623_v2  ;;  %v11508_v7 = vpop.f32.mrf.mxu1 }
 0x2dc   :  { %11911 = vmatpush3.msra.mxu1 %v14724_v10  ;;  %11912 = vmatprep.mubr.msk.f32.mxu1 %vm12624_vm2, %v12623_v2  ;;  %v15411_v7 = vld [vmem:[%s15944_s5 + $0x60] sm:$0xff] }
 0x2dd   :  { %11932 = vmatpush3.msra.mxu0 %v14490_v13  ;;  %11913 = vmatmul.mubr.msk.f32.vlgmr.msra.gmra.mxu1 %vm5153_vm3, %v4242_v12 }
 0x2de   :  { %11933 = vmatprep.subr.mxu0 %v12623_v2  ;;  %11944 = vmatprep.subr.mxu1 %v12623_v2 }
 0x2df   :  { %11934 = vmatpush3.msra.mxu0 %v14504_v20  ;;  %11945 = vmatpush3.msra.mxu1 %v14510_v28 }
 0x2e0   :  { %11935 = vmatprep.subr.mxu0 %v12623_v2  ;;  %11946 = vmatprep.subr.mxu1 %v12623_v2 }
 0x2e1   :  { %11936 = vmatpush3.msra.mxu0 %v14518_v4  ;;  %11947 = vmatpush3.msra.mxu1 %v14524_v47 }
 0x2e2   :  { %11937 = vmatprep.subr.mxu0 %v12623_v2  ;;  %11948 = vmatprep.subr.mxu1 %v12623_v2  ;;  %v6183_v55 = vpop.f32.mrf.mxu0 }
 0x2e3   :  { %11938 = vmatpush3.msra.mxu0 %v14533_v33  ;;  %11949 = vmatpush3.msra.mxu1 %v14539_v39  ;;  %v6187_v57 = vadd.f32 %v6183_v55, %v6113_v11  ;;  %v15418_v11 = vld [vmem:[%s15944_s5 + $0xd8] sm:$0xff]  ;;  %v5602_v55 = vmax.f32 %v14783_v61, 0.0 }
 0x2e4   :  { %11939 = vmatprep.subr.mxu0 %v12623_v2  ;;  %11950 = vmatprep.subr.mxu1 %v12623_v2  ;;  %v11537_v25 = vpop.f32.mrf.mxu0 }
 0x2e5   :  { %11940 = vmatpush3.msra.mxu0 %v14547_v62  ;;  %11941 = vmatprep.mubr.msk.f32.mxu0 %vm12624_vm2, %v12623_v2  ;;  %v15429_v25 = vld [vmem:[%s15944_s5 + $0xd0] sm:$0xff] }
 0x2e6   :  { %11951 = vmatpush3.msra.mxu1 %v14555_v6  ;;  %11942 = vmatmul.mubr.msk.f32.vlgmr.msra.gmra.mxu0 %vm5153_vm3, %v4242_v12  ;;  %v15402_v12 = vld [vmem:[%s15944_s5 + $0xe0] sm:$0xff] }
 0x2e7   :  { %11952 = vmatprep.subr.mxu1 %v12623_v2  ;;  %11973 = vmatprep.subr.mxu0 %v12623_v2 }
 0x2e8   :  { %11953 = vmatpush3.msra.mxu1 %v14564_v59  ;;  %11974 = vmatpush3.msra.mxu0 %v14570_v34 }
 0x2e9   :  { %11954 = vmatprep.subr.mxu1 %v12623_v2  ;;  %11975 = vmatprep.subr.mxu0 %v12623_v2 }
 0x2ea   :  { %11955 = vmatpush3.msra.mxu1 %v14578_v40  ;;  %11976 = vmatpush3.msra.mxu0 %v14584_v16 }
 0x2eb   :  { %11956 = vmatprep.subr.mxu1 %v12623_v2  ;;  %11977 = vmatprep.subr.mxu0 %v12623_v2 }
 0x2ec   :  { %11957 = vmatpush3.msra.mxu1 %v14592_v18  ;;  %11978 = vmatpush3.msra.mxu0 %v14598_v27 }
 0x2ed   :  { %11958 = vmatprep.subr.mxu1 %v12623_v2  ;;  %11979 = vmatprep.subr.mxu0 %v12623_v2 }
 0x2ee   :  { %11959 = vmatpush3.msra.mxu1 %v14606_v3  ;;  %11980 = vmatpush3.msra.mxu0 %v14612_v23 }
 0x2ef   :  { %11960 = vmatprep.subr.mxu1 %v12623_v2  ;;  %11981 = vmatprep.subr.mxu0 %v12623_v2 }
 0x2f0   :  { %11961 = vmatpush3.msra.mxu1 %v14620_v49  ;;  %11982 = vmatpush3.msra.mxu0 %v14626_v63 }
 0x2f1   :  { %11962 = vmatprep.subr.mxu1 %v12623_v2  ;;  %11983 = vmatprep.subr.mxu0 %v12623_v2 }
 0x2f2   :  { %11963 = vmatpush3.msra.mxu1 %v14634_v51  ;;  %11984 = vmatpush3.msra.mxu0 %v14640_v21 }
 0x2f3   :  { %11964 = vmatprep.subr.mxu1 %v12623_v2  ;;  %11985 = vmatprep.subr.mxu0 %v12623_v2 }
 0x2f4   :  { %11965 = vmatpush3.msra.mxu1 %v14648_v53  ;;  %11986 = vmatpush3.msra.mxu0 %v14654_v0 }
 0x2f5   :  { %11966 = vmatprep.subr.mxu1 %v12623_v2  ;;  %11987 = vmatprep.subr.mxu0 %v12623_v2  ;;  %v6257_v30 = vpop.f32.mrf.mxu1 }
 0x2f6   :  { %11967 = vmatpush3.msra.mxu1 %v14662_v15  ;;  %11988 = vmatpush3.msra.mxu0 %v14668_v26  ;;  %v15069_v22 = vadd.f32 %v6257_v30, %v6187_v57 }
 0x2f7   :  { %11968 = vmatprep.subr.mxu1 %v12623_v2  ;;  %11989 = vmatprep.subr.mxu0 %v12623_v2  ;;  %v11566_v31 = vpop.f32.mrf.mxu1 }
 0x2f8   :  { %11969 = vmatpush3.msra.mxu1 %v14679_v35  ;;  %11970 = vmatprep.mubr.msk.f32.mxu1 %vm12624_vm2, %v12623_v2  ;;  %v15449_v31 = vld [vmem:[%s15944_s5 + $0xc0] sm:$0xff] }
 0x2f9   :  { %11990 = vmatpush3.msra.mxu0 %v14687_v36  ;;  %11971 = vmatmul.mubr.msk.f32.vlgmr.msra.gmra.mxu1 %vm5153_vm3, %v4459_v41  ;;  %v15440_v41 = vld [vmem:[%s15944_s5 + $0xc8] sm:$0xff] }
 0x2fa   :  { %11991 = vmatprep.subr.mxu0 %v12623_v2  ;;  %12002 = vmatprep.subr.mxu1 %v12623_v2 }
 0x2fb   :  { %11992 = vmatpush3.msra.mxu0 %v14696_v60  ;;  %12003 = vmatpush3.msra.mxu1 %v14415_v24 }
 0x2fc   :  { %11993 = vmatprep.subr.mxu0 %v12623_v2  ;;  %12004 = vmatprep.subr.mxu1 %v12623_v2 }
 0x2fd   :  { %11994 = vmatpush3.msra.mxu0 %v14705_v42  ;;  %12005 = vmatpush3.msra.mxu1 %v14424_v48 }
 0x2fe   :  { %11995 = vmatprep.subr.mxu0 %v12623_v2  ;;  %12006 = vmatprep.subr.mxu1 %v12623_v2  ;;  %v6329_v37 = vpop.f32.mrf.mxu0 }
 0x2ff   :  { %11996 = vmatpush3.msra.mxu0 %v14714_v45  ;;  %12007 = vmatpush3.msra.mxu1 %v14433_v50  ;;  %v6333_v14 = vadd.f32 %v14499_v56, %v6329_v37  ;;  %v15180_v56 = vld [vmem:[%s15944_s5 + $0x48] sm:$0xff]  ;;  %v5822_v37 = vmax.f32 %v14885_v5, 0.0 }
 0x300   :  { %11997 = vmatprep.subr.mxu0 %v12623_v2  ;;  %12008 = vmatprep.subr.mxu1 %v12623_v2  ;;  %v11595_v24 = vpop.f32.mrf.mxu0 }
 0x301   :  { %11998 = vmatpush3.msra.mxu0 %v14724_v10  ;;  %11999 = vmatprep.mubr.msk.f32.mxu0 %vm12624_vm2, %v12623_v2 }
 0x302   :  { %12009 = vmatpush3.msra.mxu1 %v14442_v52  ;;  %12000 = vmatmul.mubr.msk.f32.vlgmr.msra.gmra.mxu0 %vm5153_vm3, %v4676_v43 }
 0x303   :  { %12010 = vmatprep.subr.mxu1 %v12623_v2  ;;  %12031 = vmatprep.subr.mxu0 %v12623_v2 }
 0x304   :  { %12011 = vmatpush3.msra.mxu1 %v14451_v58  ;;  %12032 = vmatpush3.msra.mxu0 %v14510_v28  ;;  %v15198_v28 = vld [vmem:[%s15944_s5 + $0x38] sm:$0xff] }
 0x305   :  { %12012 = vmatprep.subr.mxu1 %v12623_v2  ;;  %12033 = vmatprep.subr.mxu0 %v12623_v2 }
 0x306   :  { %12013 = vmatpush3.msra.mxu1 %v14460_v1  ;;  %12034 = vmatpush3.msra.mxu0 %v14524_v47  ;;  %v15216_v47 = vld [vmem:[%s15944_s5 + $0x28] sm:$0xff] }
 0x307   :  { %12014 = vmatprep.subr.mxu1 %v12623_v2  ;;  %12035 = vmatprep.subr.mxu0 %v12623_v2 }
 0x308   :  { %12015 = vmatpush3.msra.mxu1 %v14469_v8  ;;  %12036 = vmatpush3.msra.mxu0 %v14539_v39  ;;  %v4893_v8 = vmax.f32 %v14361_v17, 0.0  ;;  %v15171_v17 = vld [vmem:[%s15944_s5 + $0x50] sm:$0xff] }
 0x309   :  { %12016 = vmatprep.subr.mxu1 %v12623_v2  ;;  %12037 = vmatprep.subr.mxu0 %v12623_v2 }
 0x30a   :  { %12017 = vmatpush3.msra.mxu1 %v14478_v38  ;;  %12038 = vmatpush3.msra.mxu0 %v14555_v6  ;;  %v5110_v6 = vmax.f32 %v14399_v44, 0.0  ;;  %v15261_v44 = vld [vmem:[%s15944_s5 + $0x8] sm:$0xff] }
 0x30b   :  { %12018 = vmatprep.subr.mxu1 %v12623_v2  ;;  %12039 = vmatprep.subr.mxu0 %v12623_v2 }
 0x30c   :  { %12019 = vmatpush3.msra.mxu1 %v14490_v13  ;;  %12040 = vmatpush3.msra.mxu0 %v14564_v59  ;;  %v15162_v13 = vld [vmem:[%s15944_s5 + $0x58] sm:$0xff] }
 0x30d   :  { %12020 = vmatprep.subr.mxu1 %v12623_v2  ;;  %12041 = vmatprep.subr.mxu0 %v12623_v2 }
 0x30e   :  { %12021 = vmatpush3.msra.mxu1 %v14504_v20  ;;  %12042 = vmatpush3.msra.mxu0 %v14578_v40  ;;  %v15189_v20 = vld [vmem:[%s15944_s5 + $0x40] sm:$0xff]  ;;  %v15252_v40 = vld [vmem:[%s15944_s5 + $0xb8] sm:$0xff] }
 0x30f   :  { %12022 = vmatprep.subr.mxu1 %v12623_v2  ;;  %12043 = vmatprep.subr.mxu0 %v12623_v2 }
 0x310   :  { %12023 = vmatpush3.msra.mxu1 %v14518_v4  ;;  %12044 = vmatpush3.msra.mxu0 %v14592_v18  ;;  %v15207_v4 = vld [vmem:[%s15944_s5 + $0x30] sm:$0xff]  ;;  %v15275_v18 = vld [vmem:[%s15944_s5] sm:$0xff] }
 0x311   :  { %12024 = vmatprep.subr.mxu1 %v12623_v2  ;;  %12045 = vmatprep.subr.mxu0 %v12623_v2  ;;  %v6403_v48 = vpop.f32.mrf.mxu1 }
 0x312   :  { %12025 = vmatpush3.msra.mxu1 %v14533_v33  ;;  %12046 = vmatpush3.msra.mxu0 %v14606_v3  ;;  %v6407_v50 = vadd.f32 %v6403_v48, %v6333_v14  ;;  %v15225_v33 = vld [vmem:[%s15944_s5 + $0x20] sm:$0xff] }
 0x313   :  { %12026 = vmatprep.subr.mxu1 %v12623_v2  ;;  %12047 = vmatprep.subr.mxu0 %v12623_v2  ;;  %v11624_v52 = vpop.f32.mrf.mxu1  ;;  %v15287_v3 = vld [vmem:[%s15943_s4] ss:$0 sm:$0xff]  ;;  %s9055_s4 = sshll.u32 %s12627_s26, 4  ;;  %s9056_s4 = int_to_ptr.vmem [resolvable:$true] %s9055_s4 }
 0x314   :  { %12027 = vmatpush3.msra.mxu1 %v14547_v62  ;;  %12028 = vmatprep.mubr.msk.f32.mxu1 %vm12624_vm2, %v12623_v2  ;;  %v15236_v62 = vld [vmem:[%s15944_s5 + $0x18] sm:$0xff]  ;;  %v6042_v52 = vmax.f32 %v14967_v46, 0.0  ;;  %s12601_s2 = scalar_lea.vmem %s9056_s4, 32  ;;  %p12606_p1 = scmp.lt.s32.totalorder %s9056_s4, %s9056_s4 }
 0x315   :  { %12048 = vmatpush3.msra.mxu0 %v14620_v49  ;;  %12029 = vmatmul.mubr.msk.f32.vlgmr.msra.gmra.mxu1 %vm5153_vm3, %v4676_v43  ;;  %v5382_v49 = vmax.f32 %v14671_v29, 0.0  ;;  %v15327_v29 = vld [vmem:[%s15944_s5 + $0x90] sm:$0xff]  ;;  %p12602_p0 = scmp.ne.s32.totalorder %s9056_s4, %s12601_s2  ;;  %p12607_p2 = scmp.lt.s32.totalorder %s12601_s2, %s12601_s2 }
 0x316   :  { %12049 = vmatprep.subr.mxu0 %v12623_v2  ;;  %12060 = vmatprep.subr.mxu1 %v12623_v2 }
 0x317   :  { %12050 = vmatpush3.msra.mxu0 %v14634_v51  ;;  %12061 = vmatpush3.msra.mxu1 %v14570_v34  ;;  %v15247_v34 = vld [vmem:[%s15944_s5 + $0x10] sm:$0xff]  ;;  %v15299_v51 = vld [vmem:[%s15944_s5 + $0xa0] sm:$0xff]  ;;  %p12608_p3 = por %p12607_p2, %p12606_p1 }
 0x318   :  { %12051 = vmatprep.subr.mxu0 %v12623_v2  ;;  %12062 = vmatprep.subr.mxu1 %v12623_v2 }
 0x319   :  { %12052 = vmatpush3.msra.mxu0 %v14648_v53  ;;  %12063 = vmatpush3.msra.mxu1 %v14584_v16  ;;  %v15266_v16 = vld [vmem:[%s15944_s5 + $0xb0] sm:$0xff]  ;;  %p12609_p4 = pnand %p12608_p3, %p12602_p0 }
 0x31a   :  { %12053 = vmatprep.subr.mxu0 %v12623_v2  ;;  %12064 = vmatprep.subr.mxu1 %v12623_v2  ;;  %v6477_v58 = vpop.f32.mrf.mxu0 }
 0x31b   :  { %12054 = vmatpush3.msra.mxu0 %v14662_v15  ;;  %12065 = vmatpush3.msra.mxu1 %v14598_v27  ;;  %v15151_v1 = vadd.f32 %v6477_v58, %v6407_v50  ;;  %v15282_v27 = vld [vmem:[%s15944_s5 + $0xa8] sm:$0xff]  ;;  %v15313_v15 = vld [vmem:[%s15944_s5 + $0x98] sm:$0xff] }
 0x31c   :  { %12055 = vmatprep.subr.mxu0 %v12623_v2  ;;  %12066 = vmatprep.subr.mxu1 %v12623_v2  ;;  %v11653_v38 = vpop.f32.mrf.mxu0 }
 0x31d   :  { %12056 = vmatpush3.msra.mxu0 %v14679_v35  ;;  %12057 = vmatprep.mubr.msk.f32.mxu0 %vm12624_vm2, %v12623_v2  ;;  %v15332_v35 = vld [vmem:[%s15944_s5 + $0x108] sm:$0xff]  ;;  %v6262_v38 = vmax.f32 %v15069_v22, 0.0 }
 0x31e   :  { %12067 = vmatpush3.msra.mxu1 %v14612_v23  ;;  %12058 = vmatmul.mubr.msk.f32.vlgmr.msra.gmra.mxu0 %vm5153_vm3, %v4893_v8 }
 0x31f   :  { %12068 = vmatprep.subr.mxu1 %v12623_v2  ;;  %12089 = vmatprep.subr.mxu0 %v12623_v2 }
 0x320   :  { %12069 = vmatpush3.msra.mxu1 %v14626_v63  ;;  %12090 = vmatpush3.msra.mxu0 %v15162_v13 }
 0x321   :  { %12070 = vmatprep.subr.mxu1 %v12623_v2  ;;  %12091 = vmatprep.subr.mxu0 %v12623_v2 }
 0x322   :  { %12071 = vmatpush3.msra.mxu1 %v14640_v21  ;;  %12092 = vmatpush3.msra.mxu0 %v15171_v17  ;;  %v15304_v21 = vld [vmem:[%s15944_s5 + $0x118] sm:$0xff] }
 0x323   :  { %12072 = vmatprep.subr.mxu1 %v12623_v2  ;;  %12093 = vmatprep.subr.mxu0 %v12623_v2 }
 0x324   :  { %12073 = vmatpush3.msra.mxu1 %v14654_v0  ;;  %12094 = vmatpush3.msra.mxu0 %v15180_v56 }
 0x325   :  { %12074 = vmatprep.subr.mxu1 %v12623_v2  ;;  %12095 = vmatprep.subr.mxu0 %v12623_v2 }
 0x326   :  { %12075 = vmatpush3.msra.mxu1 %v14668_v26  ;;  %12096 = vmatpush3.msra.mxu0 %v15189_v20  ;;  %v15318_v26 = vld [vmem:[%s15944_s5 + $0x110] sm:$0xff] }
 0x327   :  { %12076 = vmatprep.subr.mxu1 %v12623_v2  ;;  %12097 = vmatprep.subr.mxu0 %v12623_v2 }
 0x328   :  { %12077 = vmatpush3.msra.mxu1 %v14687_v36  ;;  %12098 = vmatpush3.msra.mxu0 %v15198_v28  ;;  %v15341_v36 = vld [vmem:[%s15944_s5 + $0x88] sm:$0xff] }
 0x329   :  { %12078 = vmatprep.subr.mxu1 %v12623_v2  ;;  %12099 = vmatprep.subr.mxu0 %v12623_v2 }
 0x32a   :  { %12079 = vmatpush3.msra.mxu1 %v14696_v60  ;;  %12100 = vmatpush3.msra.mxu0 %v15207_v4  ;;  %v15346_v60 = vld [vmem:[%s15944_s5 + $0x100] sm:$0xff] }
 0x32b   :  { %12080 = vmatprep.subr.mxu1 %v12623_v2  ;;  %12101 = vmatprep.subr.mxu0 %v12623_v2 }
 0x32c   :  { %12081 = vmatpush3.msra.mxu1 %v14705_v42  ;;  %12102 = vmatpush3.msra.mxu0 %v15216_v47  ;;  %v15355_v42 = vld [vmem:[%s15944_s5 + $0x80] sm:$0xff] }
 0x32d   :  { %12082 = vmatprep.subr.mxu1 %v12623_v2  ;;  %12103 = vmatprep.subr.mxu0 %v12623_v2  ;;  %v6549_v39 = vpop.f32.mrf.mxu1 }
 0x32e   :  { %12083 = vmatpush3.msra.mxu1 %v14714_v45  ;;  %12104 = vmatpush3.msra.mxu0 %v15225_v33  ;;  %v6553_v23 = vadd.f32 %v15287_v3, %v6549_v39  ;;  %v15360_v45 = vld [vmem:[%s15944_s5 + $0xf8] sm:$0xff] }
 0x32f   :  { %12084 = vmatprep.subr.mxu1 %v12623_v2  ;;  %12105 = vmatprep.subr.mxu0 %v12623_v2  ;;  %v11682_v59 = vpop.f32.mrf.mxu1 }
 0x330   :  { %12085 = vmatpush3.msra.mxu1 %v14724_v10  ;;  %12086 = vmatprep.mubr.msk.f32.mxu1 %vm12624_vm2, %v12623_v2  ;;  %v15369_v10 = vld [vmem:[%s15944_s5 + $0x78] sm:$0xff] }
 0x331   :  { %12106 = vmatpush3.msra.mxu0 %v15236_v62  ;;  %12087 = vmatmul.mubr.msk.f32.vlgmr.msra.gmra.mxu1 %vm5153_vm3, %v5110_v6 }
 0x332   :  { %12107 = vmatprep.subr.mxu0 %v12623_v2  ;;  %12116 = vmatprep.subr.mxu1 %v12623_v2 }
 0x333   :  { %12108 = vmatpush3.msra.mxu0 %v15247_v34  ;;  %12117 = vmatpush3.msra.mxu1 %v15252_v40 }
 0x334   :  { %12109 = vmatprep.subr.mxu0 %v12623_v2  ;;  %12118 = vmatprep.subr.mxu1 %v12623_v2 }
 0x335   :  { %12110 = vmatpush3.msra.mxu0 %v15261_v44  ;;  %12119 = vmatpush3.msra.mxu1 %v15266_v16 }
 0x336   :  { %12111 = vmatprep.subr.mxu0 %v12623_v2  ;;  %12120 = vmatprep.subr.mxu1 %v12623_v2  ;;  %v6623_v63 = vpop.f32.mrf.mxu0 }
 0x337   :  { %12112 = vmatpush3.msra.mxu0 %v15275_v18  ;;  %12113 = vmatprep.mubr.msk.f32.mxu0 %vm12624_vm2, %v12623_v2  ;;  %v6627_v53 = vadd.f32 %v6623_v63, %v6553_v23  ;;  %v6482_v23 = vmax.f32 %v15151_v1, 0.0 }
 0x338   :  { %12121 = vmatpush3.msra.mxu1 %v15282_v27  ;;  %12114 = vmatmul.mubr.msk.f32.vlgmr.msra.gmra.mxu0 %vm7622_vm4, %v5382_v49  ;;  %v11711_v0 = vpop.f32.mrf.mxu0 }
 0x339   :  { %12122 = vmatprep.subr.mxu1 %v12623_v2  ;;  %12143 = vmatprep.subr.mxu0 %v12623_v2 }
 0x33a   :  { %12123 = vmatpush3.msra.mxu1 %v15299_v51  ;;  %12144 = vmatpush3.msra.mxu0 %v15304_v21 }
 0x33b   :  { %12124 = vmatprep.subr.mxu1 %v12623_v2  ;;  %12145 = vmatprep.subr.mxu0 %v12623_v2 }
 0x33c   :  { %12125 = vmatpush3.msra.mxu1 %v15313_v15  ;;  %12146 = vmatpush3.msra.mxu0 %v15318_v26 }
 0x33d   :  { %12126 = vmatprep.subr.mxu1 %v12623_v2  ;;  %12147 = vmatprep.subr.mxu0 %v12623_v2 }
 0x33e   :  { %12127 = vmatpush3.msra.mxu1 %v15327_v29  ;;  %12148 = vmatpush3.msra.mxu0 %v15332_v35 }
 0x33f   :  { %12128 = vmatprep.subr.mxu1 %v12623_v2  ;;  %12149 = vmatprep.subr.mxu0 %v12623_v2 }
 0x340   :  { %12129 = vmatpush3.msra.mxu1 %v15341_v36  ;;  %12150 = vmatpush3.msra.mxu0 %v15346_v60 }
 0x341   :  { %12130 = vmatprep.subr.mxu1 %v12623_v2  ;;  %12151 = vmatprep.subr.mxu0 %v12623_v2 }
 0x342   :  { %12131 = vmatpush3.msra.mxu1 %v15355_v42  ;;  %12152 = vmatpush3.msra.mxu0 %v15360_v45 }
 0x343   :  { %12132 = vmatprep.subr.mxu1 %v12623_v2  ;;  %12153 = vmatprep.subr.mxu0 %v12623_v2 }
 0x344   :  { %12133 = vmatpush3.msra.mxu1 %v15369_v10  ;;  %12154 = vmatpush3.msra.mxu0 %v15374_v32 }
 0x345   :  { %12134 = vmatprep.subr.mxu1 %v12623_v2  ;;  %12155 = vmatprep.subr.mxu0 %v12623_v2 }
 0x346   :  { %12135 = vmatpush3.msra.mxu1 %v15383_v9  ;;  %12156 = vmatpush3.msra.mxu0 %v15388_v19 }
 0x347   :  { %12136 = vmatprep.subr.mxu1 %v12623_v2  ;;  %12157 = vmatprep.subr.mxu0 %v12623_v2 }
 0x348   :  { %12137 = vmatpush3.msra.mxu1 %v15397_v54  ;;  %12158 = vmatpush3.msra.mxu0 %v15402_v12 }
 0x349   :  { %12138 = vmatprep.subr.mxu1 %v12623_v2  ;;  %12159 = vmatprep.subr.mxu0 %v12623_v2  ;;  %v6697_v57 = vpop.f32.mrf.mxu1 }
 0x34a   :  { %12139 = vmatpush3.msra.mxu1 %v15411_v7  ;;  %12140 = vmatprep.mubr.msk.f32.mxu1 %vm12624_vm2, %v12623_v2  ;;  %v15431_v30 = vadd.f32 %v6697_v57, %v6627_v53 }
 0x34b   :  { %12160 = vmatpush3.msra.mxu0 %v15418_v11  ;;  %12141 = vmatmul.mubr.msk.f32.vlgmr.msra.gmra.mxu1 %vm7622_vm4, %v5602_v55  ;;  %v11740_v61 = vpop.f32.mrf.mxu1 }
 0x34c   :  { %12161 = vmatprep.subr.mxu0 %v12623_v2  ;;  %12170 = vmatprep.subr.mxu1 %v12623_v2  ;;  %v6702_v49 = vmax.f32 %v15431_v30, 0.0 }
 0x34d   :  { %12162 = vmatpush3.msra.mxu0 %v15429_v25  ;;  %12171 = vmatpush3.msra.mxu1 %v15162_v13 }
 0x34e   :  { %12163 = vmatprep.subr.mxu0 %v12623_v2  ;;  %12172 = vmatprep.subr.mxu1 %v12623_v2 }
 0x34f   :  { %12164 = vmatpush3.msra.mxu0 %v15440_v41  ;;  %12173 = vmatpush3.msra.mxu1 %v15171_v17 }
 0x350   :  { %12165 = vmatprep.subr.mxu0 %v12623_v2  ;;  %12174 = vmatprep.subr.mxu1 %v12623_v2 }
 0x351   :  { %12166 = vmatpush3.msra.mxu0 %v15449_v31  ;;  %12167 = vmatprep.mubr.msk.f32.mxu0 %vm12624_vm2, %v12623_v2 }
 0x352   :  { %12175 = vmatpush3.msra.mxu1 %v15180_v56  ;;  %12168 = vmatmul.mubr.msk.f32.vlgmr.msra.gmra.mxu0 %vm7622_vm4, %v5822_v37  ;;  %v6769_v43 = vpop.f32.mrf.mxu0 }
 0x353   :  { %12176 = vmatprep.subr.mxu1 %v12623_v2  ;;  %12197 = vmatprep.subr.mxu0 %v12623_v2  ;;  %v6773_v24 = vadd.f32 %v15287_v3, %v6769_v43 }
 0x354   :  { %12177 = vmatpush3.msra.mxu1 %v15189_v20  ;;  %12198 = vmatpush3.msra.mxu0 %v15252_v40  ;;  %v11769_v5 = vpop.f32.mrf.mxu0 }
 0x355   :  { %12178 = vmatprep.subr.mxu1 %v12623_v2  ;;  %12199 = vmatprep.subr.mxu0 %v12623_v2  ;;  %v8794_v5 = vld [vmem:[%s15946_s7 + $0x18] sm:$0xff] }
 0x356   :  { %12179 = vmatpush3.msra.mxu1 %v15198_v28  ;;  %12200 = vmatpush3.msra.mxu0 %v15266_v16 }
 0x357   :  { %12180 = vmatprep.subr.mxu1 %v12623_v2  ;;  %12201 = vmatprep.subr.mxu0 %v12623_v2 }
 0x358   :  { %12181 = vmatpush3.msra.mxu1 %v15207_v4  ;;  %12202 = vmatpush3.msra.mxu0 %v15282_v27 }
 0x359   :  { %12182 = vmatprep.subr.mxu1 %v12623_v2  ;;  %12203 = vmatprep.subr.mxu0 %v12623_v2 }
 0x35a   :  { %12183 = vmatpush3.msra.mxu1 %v15216_v47  ;;  %12204 = vmatpush3.msra.mxu0 %v15299_v51 }
 0x35b   :  { %12184 = vmatprep.subr.mxu1 %v12623_v2  ;;  %12205 = vmatprep.subr.mxu0 %v12623_v2 }
 0x35c   :  { %12185 = vmatpush3.msra.mxu1 %v15225_v33  ;;  %12206 = vmatpush3.msra.mxu0 %v15313_v15 }
 0x35d   :  { %12186 = vmatprep.subr.mxu1 %v12623_v2  ;;  %12207 = vmatprep.subr.mxu0 %v12623_v2 }
 0x35e   :  { %12187 = vmatpush3.msra.mxu1 %v15236_v62  ;;  %12208 = vmatpush3.msra.mxu0 %v15327_v29 }
 0x35f   :  { %12188 = vmatprep.subr.mxu1 %v12623_v2  ;;  %12209 = vmatprep.subr.mxu0 %v12623_v2 }
 0x360   :  { %12189 = vmatpush3.msra.mxu1 %v15247_v34  ;;  %12210 = vmatpush3.msra.mxu0 %v15341_v36 }
 0x361   :  { %12190 = vmatprep.subr.mxu1 %v12623_v2  ;;  %12211 = vmatprep.subr.mxu0 %v12623_v2 }
 0x362   :  { %12191 = vmatpush3.msra.mxu1 %v15261_v44  ;;  %12212 = vmatpush3.msra.mxu0 %v15355_v42 }
 0x363   :  { %12192 = vmatprep.subr.mxu1 %v12623_v2  ;;  %12213 = vmatprep.subr.mxu0 %v12623_v2 }
 0x364   :  { %12193 = vmatpush3.msra.mxu1 %v15275_v18  ;;  %12194 = vmatprep.mubr.msk.f32.mxu1 %vm12624_vm2, %v12623_v2 }
 0x365   :  { %12214 = vmatpush3.msra.mxu0 %v15369_v10  ;;  %12195 = vmatmul.mubr.msk.f32.vlgmr.msra.gmra.mxu1 %vm7622_vm4, %v5822_v37  ;;  %v6843_v14 = vpop.f32.mrf.mxu1 }
 0x366   :  { %12215 = vmatprep.subr.mxu0 %v12623_v2  ;;  %12224 = vmatprep.subr.mxu1 %v12623_v2  ;;  %v6847_v48 = vadd.f32 %v6843_v14, %v6773_v24 }
 0x367   :  { %12216 = vmatpush3.msra.mxu0 %v15383_v9  ;;  %12225 = vmatpush3.msra.mxu1 %v15304_v21  ;;  %v11798_v50 = vpop.f32.mrf.mxu1 }
 0x368   :  { %12217 = vmatprep.subr.mxu0 %v12623_v2  ;;  %12226 = vmatprep.subr.mxu1 %v12623_v2 }
 0x369   :  { %12218 = vmatpush3.msra.mxu0 %v15397_v54  ;;  %12227 = vmatpush3.msra.mxu1 %v15318_v26 }
 0x36a   :  { %12219 = vmatprep.subr.mxu0 %v12623_v2  ;;  %12228 = vmatprep.subr.mxu1 %v12623_v2 }
 0x36b   :  { %12220 = vmatpush3.msra.mxu0 %v15411_v7  ;;  %12221 = vmatprep.mubr.msk.f32.mxu0 %vm12624_vm2, %v12623_v2 }
 0x36c   :  { %12229 = vmatpush3.msra.mxu1 %v15332_v35  ;;  %12222 = vmatmul.mubr.msk.f32.vlgmr.msra.gmra.mxu0 %vm7622_vm4, %v6042_v52 }
 0x36d   :  { %12230 = vmatprep.subr.mxu1 %v12623_v2  ;;  %12251 = vmatprep.subr.mxu0 %v12623_v2 }
 0x36e   :  { %12231 = vmatpush3.msra.mxu1 %v15346_v60  ;;  %12252 = vmatpush3.msra.mxu0 %v15162_v13  ;;  %v6917_v46 = vpop.f32.mrf.mxu0 }
 0x36f   :  { %12232 = vmatprep.subr.mxu1 %v12623_v2  ;;  %12253 = vmatprep.subr.mxu0 %v12623_v2  ;;  %v15523_v58 = vadd.f32 %v6917_v46, %v6847_v48  ;;  %v8793_v48 = vld [vmem:[%s15946_s7 + $0x10] sm:$0xff] }
 0x370   :  { %12233 = vmatpush3.msra.mxu1 %v15360_v45  ;;  %12254 = vmatpush3.msra.mxu0 %v15171_v17  ;;  %v11827_v8 = vpop.f32.mrf.mxu0 }
 0x371   :  { %12234 = vmatprep.subr.mxu1 %v12623_v2  ;;  %12255 = vmatprep.subr.mxu0 %v12623_v2  ;;  %v6922_v55 = vmax.f32 %v15523_v58, 0.0  ;;  %v8792_v8 = vld [vmem:[%s15946_s7 + $0x8] sm:$0xff] }
 0x372   :  { %12235 = vmatpush3.msra.mxu1 %v15374_v32  ;;  %12256 = vmatpush3.msra.mxu0 %v15180_v56 }
 0x373   :  { %12236 = vmatprep.subr.mxu1 %v12623_v2  ;;  %12257 = vmatprep.subr.mxu0 %v12623_v2 }
 0x374   :  { %12237 = vmatpush3.msra.mxu1 %v15388_v19  ;;  %12258 = vmatpush3.msra.mxu0 %v15189_v20 }
 0x375   :  { %12238 = vmatprep.subr.mxu1 %v12623_v2  ;;  %12259 = vmatprep.subr.mxu0 %v12623_v2 }
 0x376   :  { %12239 = vmatpush3.msra.mxu1 %v15402_v12  ;;  %12260 = vmatpush3.msra.mxu0 %v15198_v28 }
 0x377   :  { %12240 = vmatprep.subr.mxu1 %v12623_v2  ;;  %12261 = vmatprep.subr.mxu0 %v12623_v2 }
 0x378   :  { %12241 = vmatpush3.msra.mxu1 %v15418_v11  ;;  %12262 = vmatpush3.msra.mxu0 %v15207_v4 }
 0x379   :  { %12242 = vmatprep.subr.mxu1 %v12623_v2  ;;  %12263 = vmatprep.subr.mxu0 %v12623_v2 }
 0x37a   :  { %12243 = vmatpush3.msra.mxu1 %v15429_v25  ;;  %12264 = vmatpush3.msra.mxu0 %v15216_v47 }
 0x37b   :  { %12244 = vmatprep.subr.mxu1 %v12623_v2  ;;  %12265 = vmatprep.subr.mxu0 %v12623_v2 }
 0x37c   :  { %12245 = vmatpush3.msra.mxu1 %v15440_v41  ;;  %12266 = vmatpush3.msra.mxu0 %v15225_v33 }
 0x37d   :  { %12246 = vmatprep.subr.mxu1 %v12623_v2  ;;  %12267 = vmatprep.subr.mxu0 %v12623_v2 }
 0x37e   :  { %12247 = vmatpush3.msra.mxu1 %v15449_v31  ;;  %12248 = vmatprep.mubr.msk.f32.mxu1 %vm12624_vm2, %v12623_v2 }
 0x37f   :  { %12268 = vmatpush3.msra.mxu0 %v15236_v62  ;;  %12249 = vmatmul.mubr.msk.f32.vlgmr.msra.gmra.mxu1 %vm7622_vm4, %v6262_v38 }
 0x380   :  { %12269 = vmatprep.subr.mxu0 %v12623_v2  ;;  %12278 = vmatprep.subr.mxu1 %v12623_v2 }
 0x381   :  { %12270 = vmatpush3.msra.mxu0 %v15247_v34  ;;  %12279 = vmatpush3.msra.mxu1 %v15252_v40  ;;  %v15563_v22 = vpop.f32.mrf.mxu1 }
 0x382   :  { %12271 = vmatprep.subr.mxu0 %v12623_v2  ;;  %12280 = vmatprep.subr.mxu1 %v12623_v2 }
 0x383   :  { %12272 = vmatpush3.msra.mxu0 %v15261_v44  ;;  %12281 = vmatpush3.msra.mxu1 %v15266_v16  ;;  %v11856_v39 = vpop.f32.mrf.mxu1 }
 0x384   :  { %12273 = vmatprep.subr.mxu0 %v12623_v2  ;;  %12282 = vmatprep.subr.mxu1 %v12623_v2  ;;  %v9339_v39 = vld [vmem:[%s15946_s7 + $0x58] sm:$0xff] }
 0x385   :  { %12274 = vmatpush3.msra.mxu0 %v15275_v18  ;;  %12275 = vmatprep.mubr.msk.f32.mxu0 %vm12624_vm2, %v12623_v2 }
 0x386   :  { %12283 = vmatpush3.msra.mxu1 %v15282_v27  ;;  %12276 = vmatmul.mubr.msk.f32.vlgmr.msra.gmra.mxu0 %vm7622_vm4, %v6262_v38  ;;  %v8791_v38 = vld [vmem:[%s15946_s7] sm:$0xff] }
 0x387   :  { %12284 = vmatprep.subr.mxu1 %v12623_v2  ;;  %12305 = vmatprep.subr.mxu0 %v12623_v2 }
 0x388   :  { %12285 = vmatpush3.msra.mxu1 %v15299_v51  ;;  %12306 = vmatpush3.msra.mxu0 %v15304_v21 }
 0x389   :  { %12286 = vmatprep.subr.mxu1 %v12623_v2  ;;  %12307 = vmatprep.subr.mxu0 %v12623_v2 }
 0x38a   :  { %12287 = vmatpush3.msra.mxu1 %v15313_v15  ;;  %12308 = vmatpush3.msra.mxu0 %v15318_v26  ;;  %v15584_v6 = vpop.f32.mrf.mxu0 }
 0x38b   :  { %12288 = vmatprep.subr.mxu1 %v12623_v2  ;;  %12309 = vmatprep.subr.mxu0 %v12623_v2 }
 0x38c   :  { %12289 = vmatpush3.msra.mxu1 %v15327_v29  ;;  %12310 = vmatpush3.msra.mxu0 %v15332_v35  ;;  %v11885_v59 = vpop.f32.mrf.mxu0 }
 0x38d   :  { %12290 = vmatprep.subr.mxu1 %v12623_v2  ;;  %12311 = vmatprep.subr.mxu0 %v12623_v2 }
 0x38e   :  { %12291 = vmatpush3.msra.mxu1 %v15341_v36  ;;  %12312 = vmatpush3.msra.mxu0 %v15346_v60 }
 0x38f   :  { %12292 = vmatprep.subr.mxu1 %v12623_v2  ;;  %12313 = vmatprep.subr.mxu0 %v12623_v2 }
 0x390   :  { %12293 = vmatpush3.msra.mxu1 %v15355_v42  ;;  %12314 = vmatpush3.msra.mxu0 %v15360_v45 }
 0x391   :  { %12294 = vmatprep.subr.mxu1 %v12623_v2  ;;  %12315 = vmatprep.subr.mxu0 %v12623_v2 }
 0x392   :  { %12295 = vmatpush3.msra.mxu1 %v15369_v10  ;;  %12316 = vmatpush3.msra.mxu0 %v15374_v32 }
 0x393   :  { %12296 = vmatprep.subr.mxu1 %v12623_v2  ;;  %12317 = vmatprep.subr.mxu0 %v12623_v2 }
 0x394   :  { %12297 = vmatpush3.msra.mxu1 %v15383_v9  ;;  %12318 = vmatpush3.msra.mxu0 %v15388_v19 }
 0x395   :  { %12298 = vmatprep.subr.mxu1 %v12623_v2  ;;  %12319 = vmatprep.subr.mxu0 %v12623_v2 }
 0x396   :  { %12299 = vmatpush3.msra.mxu1 %v15397_v54  ;;  %12320 = vmatpush3.msra.mxu0 %v15402_v12 }
 0x397   :  { %12300 = vmatprep.subr.mxu1 %v12623_v2  ;;  %12321 = vmatprep.subr.mxu0 %v12623_v2 }
 0x398   :  { %12301 = vmatpush3.msra.mxu1 %v15411_v7  ;;  %12302 = vmatprep.mubr.msk.f32.mxu1 %vm12624_vm2, %v12623_v2 }
 0x399   :  { %12322 = vmatpush3.msra.mxu0 %v15418_v11  ;;  %12303 = vmatmul.mubr.msk.f32.vlgmr.msra.gmra.mxu1 %vm7622_vm4, %v6482_v23  ;;  %v9337_v23 = vld [vmem:[%s15946_s7 + $0x48] sm:$0xff] }
 0x39a   :  { %12323 = vmatprep.subr.mxu0 %v12623_v2  ;;  %12332 = vmatprep.subr.mxu1 %v12623_v2 }
 0x39b   :  { %12324 = vmatpush3.msra.mxu0 %v15429_v25  ;;  %12333 = vmatpush3.msra.mxu1 %v15162_v13 }
 0x39c   :  { %12325 = vmatprep.subr.mxu0 %v12623_v2  ;;  %12334 = vmatprep.subr.mxu1 %v12623_v2 }
 0x39d   :  { %12326 = vmatpush3.msra.mxu0 %v15440_v41  ;;  %12335 = vmatpush3.msra.mxu1 %v15171_v17  ;;  %v15626_v1 = vpop.f32.mrf.mxu1 }
 0x39e   :  { %12327 = vmatprep.subr.mxu0 %v12623_v2  ;;  %12336 = vmatprep.subr.mxu1 %v12623_v2 }
 0x39f   :  { %12328 = vmatpush3.msra.mxu0 %v15449_v31  ;;  %12329 = vmatprep.mubr.msk.f32.mxu0 %vm12624_vm2, %v12623_v2  ;;  %v11914_v63 = vpop.f32.mrf.mxu1 }
 0x3a0   :  { %12337 = vmatpush3.msra.mxu1 %v15180_v56  ;;  %12330 = vmatmul.mubr.msk.f32.vlgmr.msra.gmra.mxu0 %vm7622_vm4, %v6702_v49  ;;  %v9336_v63 = vld [vmem:[%s15946_s7 + $0x40] sm:$0xff] }
 0x3a1   :  { %12338 = vmatprep.subr.mxu1 %v12623_v2  ;;  %12359 = vmatprep.subr.mxu0 %v12623_v2 }
 0x3a2   :  { %12339 = vmatpush3.msra.mxu1 %v15189_v20  ;;  %12360 = vmatpush3.msra.mxu0 %v15252_v40 }
 0x3a3   :  { %12340 = vmatprep.subr.mxu1 %v12623_v2  ;;  %12361 = vmatprep.subr.mxu0 %v12623_v2 }
 0x3a4   :  { %12341 = vmatpush3.msra.mxu1 %v15198_v28  ;;  %12362 = vmatpush3.msra.mxu0 %v15266_v16 }
 0x3a5   :  { %12342 = vmatprep.subr.mxu1 %v12623_v2  ;;  %12363 = vmatprep.subr.mxu0 %v12623_v2 }
 0x3a6   :  { %12343 = vmatpush3.msra.mxu1 %v15207_v4  ;;  %12364 = vmatpush3.msra.mxu0 %v15282_v27  ;;  %v15648_v53 = vpop.f32.mrf.mxu0 }
 0x3a7   :  { %12344 = vmatprep.subr.mxu1 %v12623_v2  ;;  %12365 = vmatprep.subr.mxu0 %v12623_v2 }
 0x3a8   :  { %12345 = vmatpush3.msra.mxu1 %v15216_v47  ;;  %12366 = vmatpush3.msra.mxu0 %v15299_v51  ;;  %v11943_v0 = vpop.f32.mrf.mxu0 }
 0x3a9   :  { %12346 = vmatprep.subr.mxu1 %v12623_v2  ;;  %12367 = vmatprep.subr.mxu0 %v12623_v2 }
 0x3aa   :  { %12347 = vmatpush3.msra.mxu1 %v15225_v33  ;;  %12368 = vmatpush3.msra.mxu0 %v15313_v15 }
 0x3ab   :  { %12348 = vmatprep.subr.mxu1 %v12623_v2  ;;  %12369 = vmatprep.subr.mxu0 %v12623_v2 }
 0x3ac   :  { %12349 = vmatpush3.msra.mxu1 %v15236_v62  ;;  %12370 = vmatpush3.msra.mxu0 %v15327_v29 }
 0x3ad   :  { %12350 = vmatprep.subr.mxu1 %v12623_v2  ;;  %12371 = vmatprep.subr.mxu0 %v12623_v2 }
 0x3ae   :  { %12351 = vmatpush3.msra.mxu1 %v15247_v34  ;;  %12372 = vmatpush3.msra.mxu0 %v15341_v36 }
 0x3af   :  { %12352 = vmatprep.subr.mxu1 %v12623_v2  ;;  %12373 = vmatprep.subr.mxu0 %v12623_v2 }
 0x3b0   :  { %12353 = vmatpush3.msra.mxu1 %v15261_v44  ;;  %12374 = vmatpush3.msra.mxu0 %v15355_v42 }
 0x3b1   :  { %12354 = vmatprep.subr.mxu1 %v12623_v2  ;;  %12375 = vmatprep.subr.mxu0 %v12623_v2 }
 0x3b2   :  { %12355 = vmatpush3.msra.mxu1 %v15275_v18  ;;  %12356 = vmatprep.mubr.msk.f32.mxu1 %vm12624_vm2, %v12623_v2 }
 0x3b3   :  { %12376 = vmatpush3.msra.mxu0 %v15369_v10  ;;  %12357 = vmatmul.mubr.msk.f32.vlgmr.msra.gmra.mxu1 %vm7622_vm4, %v6702_v49 }
 0x3b4   :  { %12377 = vmatprep.subr.mxu0 %v12623_v2  ;;  %12386 = vmatprep.subr.mxu1 %v12623_v2 }
 0x3b5   :  { %12378 = vmatpush3.msra.mxu0 %v15383_v9  ;;  %12387 = vmatpush3.msra.mxu1 %v15304_v21 }
 0x3b6   :  { %12379 = vmatprep.subr.mxu0 %v12623_v2  ;;  %12388 = vmatprep.subr.mxu1 %v12623_v2 }
 0x3b7   :  { %12380 = vmatpush3.msra.mxu0 %v15397_v54  ;;  %12389 = vmatpush3.msra.mxu1 %v15318_v26 }
 0x3b8   :  { %12381 = vmatprep.subr.mxu0 %v12623_v2  ;;  %12390 = vmatprep.subr.mxu1 %v12623_v2 }
 0x3b9   :  { %12382 = vmatpush3.msra.mxu0 %v15411_v7  ;;  %12383 = vmatprep.mubr.msk.f32.mxu0 %vm12624_vm2, %v12623_v2  ;;  %v15691_v57 = vpop.f32.mrf.mxu1 }
 0x3ba   :  { %12391 = vmatpush3.msra.mxu1 %v15332_v35  ;;  %12384 = vmatmul.mubr.msk.f32.vlgmr.msra.gmra.mxu0 %vm7622_vm4, %v6922_v55 }
 0x3bb   :  { %12392 = vmatprep.subr.mxu1 %v12623_v2  ;;  %12413 = vmatprep.subr.mxu0 %v12623_v2  ;;  %v11972_v30 = vpop.f32.mrf.mxu1 }
 0x3bc   :  { %12393 = vmatpush3.msra.mxu1 %v15346_v60  ;;  %12414 = vmatpush3.msra.mxu0 %v15162_v13 }
 0x3bd   :  { %12394 = vmatprep.subr.mxu1 %v12623_v2  ;;  %12415 = vmatprep.subr.mxu0 %v12623_v2 }
 0x3be   :  { %12395 = vmatpush3.msra.mxu1 %v15360_v45  ;;  %12416 = vmatpush3.msra.mxu0 %v15171_v17  ;;  %v6993_v17 = vadd.f32 %v15287_v3, %v15563_v22 }
 0x3bf   :  { %12396 = vmatprep.subr.mxu1 %v12623_v2  ;;  %12417 = vmatprep.subr.mxu0 %v12623_v2 }
 0x3c0   :  { %12397 = vmatpush3.msra.mxu1 %v15374_v32  ;;  %12418 = vmatpush3.msra.mxu0 %v15180_v56  ;;  %v7067_v61 = vadd.f32 %v15584_v6, %v6993_v17  ;;  %v9338_v6 = vld [vmem:[%s15946_s7 + $0x50] sm:$0xff] }
 0x3c1   :  { %12398 = vmatprep.subr.mxu1 %v12623_v2  ;;  %12419 = vmatprep.subr.mxu0 %v12623_v2 }
 0x3c2   :  { %12399 = vmatpush3.msra.mxu1 %v15388_v19  ;;  %12420 = vmatpush3.msra.mxu0 %v15189_v20  ;;  %v15711_v13 = vpop.f32.mrf.mxu0  ;;  %v7141_v20 = vadd.f32 %v15626_v1, %v7067_v61  ;;  %v9334_v61 = vld [vmem:[%s15946_s7 + $0x30] sm:$0xff] }
 0x3c3   :  { %12400 = vmatprep.subr.mxu1 %v12623_v2  ;;  %12421 = vmatprep.subr.mxu0 %v12623_v2 }
 0x3c4   :  { %12401 = vmatpush3.msra.mxu1 %v15402_v12  ;;  %12422 = vmatpush3.msra.mxu0 %v15198_v28  ;;  %v12001_v56 = vpop.f32.mrf.mxu0  ;;  %v7142_v28 = vmax.f32 %v7141_v20, 0.0 }
 0x3c5   :  { %12402 = vmatprep.subr.mxu1 %v12623_v2  ;;  %12423 = vmatprep.subr.mxu0 %v12623_v2  ;;  %v9335_v56 = vld [vmem:[%s15946_s7 + $0x38] sm:$0xff] }
 0x3c6   :  { %12403 = vmatpush3.msra.mxu1 %v15418_v11  ;;  %12424 = vmatpush3.msra.mxu0 %v15207_v4 }
 0x3c7   :  { %12404 = vmatprep.subr.mxu1 %v12623_v2  ;;  %12425 = vmatprep.subr.mxu0 %v12623_v2 }
 0x3c8   :  { %12405 = vmatpush3.msra.mxu1 %v15429_v25  ;;  %12426 = vmatpush3.msra.mxu0 %v15216_v47 }
 0x3c9   :  { %12406 = vmatprep.subr.mxu1 %v12623_v2  ;;  %12427 = vmatprep.subr.mxu0 %v12623_v2 }
 0x3ca   :  { %12407 = vmatpush3.msra.mxu1 %v15440_v41  ;;  %12428 = vmatpush3.msra.mxu0 %v15225_v33  ;;  %v7213_v33 = vadd.f32 %v15287_v3, %v15648_v53 }
 0x3cb   :  { %12408 = vmatprep.subr.mxu1 %v12623_v2  ;;  %12429 = vmatprep.subr.mxu0 %v12623_v2 }
 0x3cc   :  { %12409 = vmatpush3.msra.mxu1 %v15449_v31  ;;  %12410 = vmatprep.mubr.msk.f32.mxu1 %vm12624_vm2, %v12623_v2 }
 0x3cd   :  { %12430 = vmatpush3.msra.mxu0 %v15236_v62  ;;  %12411 = vmatmul.mubr.msk.f32.vlgmr.msra.gmra.mxu1 %vm7622_vm4, %v7142_v28 }
 0x3ce   :  { %12431 = vmatprep.subr.mxu0 %v12623_v2  ;;  %12440 = vmatprep.subr.mxu1 %v12623_v2 }
 0x3cf   :  { %12432 = vmatpush3.msra.mxu0 %v15247_v34  ;;  %12441 = vmatpush3.msra.mxu1 %v15252_v40  ;;  %v7287_v34 = vadd.f32 %v15691_v57, %v7213_v33 }
 0x3d0   :  { %12433 = vmatprep.subr.mxu0 %v12623_v2  ;;  %12442 = vmatprep.subr.mxu1 %v12623_v2 }
 0x3d1   :  { %12434 = vmatpush3.msra.mxu0 %v15261_v44  ;;  %12443 = vmatpush3.msra.mxu1 %v15266_v16  ;;  %v7361_v44 = vadd.f32 %v15711_v13, %v7287_v34 }
 0x3d2   :  { %12435 = vmatprep.subr.mxu0 %v12623_v2  ;;  %12444 = vmatprep.subr.mxu1 %v12623_v2 }
 0x3d3   :  { %12436 = vmatpush3.msra.mxu0 %v15275_v18  ;;  %12437 = vmatprep.mubr.msk.f32.mxu0 %vm12624_vm2, %v12623_v2  ;;  %v7362_v16 = vmax.f32 %v7361_v44, 0.0 }
 0x3d4   :  { %12445 = vmatpush3.msra.mxu1 %v15282_v27  ;;  %12438 = vmatmul.mubr.msk.f32.vlgmr.msra.gmra.mxu0 %vm7622_vm4, %v7142_v28 }
 0x3d5   :  { %12446 = vmatprep.subr.mxu1 %v12623_v2  ;;  %v7429_v4 = vpop.f32.mrf.mxu1  ;;  %12464 = vmatprep.mubr.msk.f32.mxu1 %vm12624_vm2, %v12623_v2 }
 0x3d6   :  { %12447 = vmatpush3.msra.mxu1 %v15299_v51  ;;  %12467 = vmatprep.subr.mxu0 %v12623_v2  ;;  %v7433_v18 = vadd.f32 %v15287_v3, %v7429_v4 }
 0x3d7   :  { %12448 = vmatprep.subr.mxu1 %v12623_v2  ;;  %v12030_v47 = vpop.f32.mrf.mxu1  ;;  %12468 = vmatpush3.msra.mxu0 %v15304_v21 }
 0x3d8   :  { %12449 = vmatpush3.msra.mxu1 %v15313_v15  ;;  %12469 = vmatprep.subr.mxu0 %v12623_v2 }
 0x3d9   :  { %12450 = vmatprep.subr.mxu1 %v12623_v2  ;;  %12470 = vmatpush3.msra.mxu0 %v15318_v26 }
 0x3da   :  { %12451 = vmatpush3.msra.mxu1 %v15327_v29  ;;  %12471 = vmatprep.subr.mxu0 %v12623_v2 }
 0x3db   :  { %12452 = vmatprep.subr.mxu1 %v12623_v2  ;;  %12472 = vmatpush3.msra.mxu0 %v15332_v35 }
 0x3dc   :  { %12453 = vmatpush3.msra.mxu1 %v15341_v36  ;;  %12473 = vmatprep.subr.mxu0 %v12623_v2 }
 0x3dd   :  { %12454 = vmatprep.subr.mxu1 %v12623_v2  ;;  %12474 = vmatpush3.msra.mxu0 %v15346_v60  ;;  %v15817_v60 = vld [vmem:[%s15945_s6] ss:$0 sm:$0xff] }
 0x3de   :  { %12455 = vmatpush3.msra.mxu1 %v15355_v42  ;;  %v7503_v62 = vpop.f32.mrf.mxu0  ;;  %12475 = vmatprep.subr.mxu0 %v12623_v2 }
 0x3df   :  { %12456 = vmatprep.subr.mxu1 %v12623_v2  ;;  %12476 = vmatpush3.msra.mxu0 %v15360_v45  ;;  %v7507_v27 = vadd.f32 %v7503_v62, %v7433_v18 }
 0x3e0   :  { %12457 = vmatpush3.msra.mxu1 %v15369_v10  ;;  %v12059_v40 = vpop.f32.mrf.mxu0  ;;  %12477 = vmatprep.subr.mxu0 %v12623_v2 }
 0x3e1   :  { %12458 = vmatprep.subr.mxu1 %v12623_v2  ;;  %12478 = vmatpush3.msra.mxu0 %v15374_v32 }
 0x3e2   :  { %12459 = vmatpush3.msra.mxu1 %v15383_v9  ;;  %12479 = vmatprep.subr.mxu0 %v12623_v2 }
 0x3e3   :  { %12460 = vmatprep.subr.mxu1 %v12623_v2  ;;  %12480 = vmatpush3.msra.mxu0 %v15388_v19 }
 0x3e4   :  { %12461 = vmatpush3.msra.mxu1 %v15397_v54  ;;  %12481 = vmatprep.subr.mxu0 %v12623_v2 }
 0x3e5   :  { %12462 = vmatprep.subr.mxu1 %v12623_v2  ;;  %12482 = vmatpush3.msra.mxu0 %v15402_v12 }
 0x3e6   :  { %12463 = vmatpush3.msra.mxu1 %v15411_v7  ;;  %12483 = vmatprep.subr.mxu0 %v12623_v2 }
 0x3e7   :  { %12465 = vmatmul.mubr.msk.f32.vlgmr.msra.gmra.mxu1 %vm7622_vm4, %v7362_v16  ;;  %12484 = vmatpush3.msra.mxu0 %v15418_v11 }
 0x3e8   :  { %12485 = vmatprep.subr.mxu0 %v12623_v2  ;;  %12491 = vmatprep.mubr.msk.f32.mxu0 %vm12624_vm2, %v12623_v2 }
 0x3e9   :  { %12486 = vmatpush3.msra.mxu0 %v15429_v25  ;;  %12494 = vmatprep.subr.mxu1 %v12623_v2 }
 0x3ea   :  { %12487 = vmatprep.subr.mxu0 %v12623_v2  ;;  %12506 = vmatprep.mubr.msk.f32.mxu1 %vm12624_vm2, %v12623_v2 }
 0x3eb   :  { %12488 = vmatpush3.msra.mxu0 %v15440_v41  ;;  %v8796_v41 = vld [vmem:[%s15946_s7 + $0x28] sm:$0xff] }
 0x3ec   :  { %12489 = vmatprep.subr.mxu0 %v12623_v2  ;;  %12495 = vmatpush3.msra.mxu1 %v8796_v41 }
 0x3ed   :  { %12490 = vmatpush3.msra.mxu0 %v15449_v31  ;;  %v8795_v31 = vld [vmem:[%s15946_s7 + $0x20] sm:$0xff]  ;;  %12496 = vmatprep.subr.mxu1 %v12623_v2 }
 0x3ee   :  { %12509 = vmatprep.subr.mxu0 %v12623_v2  ;;  %12497 = vmatpush3.msra.mxu1 %v8795_v31  ;;  %v9344_v31 = vld [vmem:[%s15946_s7 + $0x80] sm:$0xff] }
 0x3ef   :  { %12498 = vmatprep.subr.mxu1 %v12623_v2 }
 0x3f0   :  { %12499 = vmatpush3.msra.mxu1 %v8794_v5  ;;  %v9341_v5 = vld [vmem:[%s15946_s7 + $0x68] sm:$0xff] }
 0x3f1   :  { %v7577_v51 = vpop.f32.mrf.mxu1  ;;  %12500 = vmatprep.subr.mxu1 %v12623_v2 }
 0x3f2   :  { %v7581_v21 = vadd.f32 %v7577_v51, %v7507_v27  ;;  %12501 = vmatpush3.msra.mxu1 %v8793_v48 }
 0x3f3   :  { %v12088_v15 = vpop.f32.mrf.mxu1  ;;  %12502 = vmatprep.subr.mxu1 %v12623_v2 }
 0x3f4   :  { %v7582_v26 = vmax.f32 %v7581_v21, 0.0  ;;  %12503 = vmatpush3.msra.mxu1 %v8792_v8 }
 0x3f5   :  { %12504 = vmatprep.subr.mxu1 %v12623_v2 }
 0x3f6   :  { %12492 = vmatmul.mubr.msk.f32.vlgmr.msra.gmra.mxu0 %vm7622_vm4, %v7582_v26  ;;  %12505 = vmatpush3.msra.mxu1 %v8791_v38 }
 0x3f7   :  { %12521 = vmatprep.mubr.msk.f32.mxu0 %vm12624_vm2, %v12623_v2  ;;  %12510 = vmatpush3.msra.mxu0 %v9339_v39 }
 0x3f8   :  { %v7692_v29 = vpop.f32.mrf.mxu0  ;;  %12511 = vmatprep.subr.mxu0 %v12623_v2  ;;  %12524 = vmatprep.subr.mxu1 %v12623_v2 }
 0x3f9   :  { %v7702_v42 = vadd.f32 %v15817_v60, %v7692_v29  ;;  %12512 = vmatpush3.msra.mxu0 %v9338_v6 }
 0x3fa   :  { %v12115_v35 = vpop.f32.mrf.mxu0  ;;  %12513 = vmatprep.subr.mxu0 %v12623_v2 }
 0x3fb   :  { %12514 = vmatpush3.msra.mxu0 %v9337_v23 }
 0x3fc   :  { %12515 = vmatprep.subr.mxu0 %v12623_v2 }
 0x3fd   :  { %12516 = vmatpush3.msra.mxu0 %v9336_v63 }
 0x3fe   :  { %12517 = vmatprep.subr.mxu0 %v12623_v2 }
 0x3ff   :  { %12518 = vmatpush3.msra.mxu0 %v9335_v56 }
 0x400   :  { %12519 = vmatprep.subr.mxu0 %v12623_v2 }
 0x401   :  { %12520 = vmatpush3.msra.mxu0 %v9334_v61 }
 0x40b   :  { %v7772_v36 = vpop.f32.mrf.mxu1 }
 0x40c   :  { %v7776_v45 = vadd.f32 %v7772_v36, %v7702_v42 }
 0x40d   :  { %v12142_v3 = vpop.f32.mrf.mxu1 }
 0x412   :  { %v7846_v10 = vpop.f32.mrf.mxu0 }
 0x413   :  { %v7850_v32 = vadd.f32 %v7846_v10, %v7776_v45 }
 0x414   :  { %v12169_v9 = vpop.f32.mrf.mxu0 }
 0x415   :  { %v15820_v19 = vmax.f32 %v7850_v32, 0.0 }
 0x417   :  { %8733 = vrot.lane.b32.xlu0 %v15820_v19, %s12625_s17 }
 0x41b   :  { %8737 = vrot.lane.b32.xlu0 %v15820_v19, %s12626_s18 }
 0x425   :  { %v7918_v54 = vpop.f32.mrf.mxu1 }
 0x426   :  { %v7922_v25 = vadd.f32 %v15817_v60, %v7918_v54 }
 0x427   :  { %v12196_v12 = vpop.f32.mrf.mxu1 }
 0x42c   :  { %v7992_v7 = vpop.f32.mrf.mxu0 }
 0x42d   :  { %v7996_v37 = vadd.f32 %v7992_v7, %v7922_v25 }
 0x42e   :  { %v12223_v11 = vpop.f32.mrf.mxu0 }
 0x43f   :  { %v8066_v43 = vpop.f32.mrf.mxu1 }
 0x440   :  { %v8070_v24 = vadd.f32 %v8066_v43, %v7996_v37  ;;  %v9343_v37 = vld [vmem:[%s15946_s7 + $0x78] sm:$0xff]  ;;  %v9342_v43 = vld [vmem:[%s15946_s7 + $0x70] sm:$0xff] }
 0x441   :  { %v12250_v14 = vpop.f32.mrf.mxu1 }
 0x442   :  { %v15841_v50 = vmax.f32 %v8070_v24, 0.0  ;;  %v9340_v24 = vld [vmem:[%s15946_s7 + $0x60] sm:$0xff] }
 0x444   :  { %8743 = vrot.lane.b32.xlu1 %v15841_v50, %s12625_s17 }
 0x446   :  { %v8138_v52 = vpop.f32.mrf.mxu0 }
 0x447   :  { %v8142_v59 = vadd.f32 %v15817_v60, %v8138_v52 }
 0x448   :  { %v12277_v46 = vpop.f32.mrf.mxu0  ;;  %8747 = vrot.lane.b32.xlu1 %v15841_v50, %s12626_s18 }
 0x459   :  { %v8212_v58 = vpop.f32.mrf.mxu1 }
 0x45a   :  { %v8216_v1 = vadd.f32 %v8212_v58, %v8142_v59 }
 0x45b   :  { %v12304_v22 = vpop.f32.mrf.mxu1 }
 0x460   :  { %v8286_v49 = vpop.f32.mrf.mxu0 }
 0x461   :  { %v8290_v53 = vadd.f32 %v8286_v49, %v8216_v1 }
 0x462   :  { %v12331_v0 = vpop.f32.mrf.mxu0 }
 0x463   :  { %v15873_v55 = vmax.f32 %v8290_v53, 0.0 }
 0x465   :  { %8757 = vrot.lane.b32.xlu1 %v15873_v55, %s12626_s18  ;;  %8753 = vrot.lane.b32.xlu0 %v15873_v55, %s12625_s17 }
 0x473   :  { %v8358_v57 = vpop.f32.mrf.mxu1 }
 0x474   :  { %v8362_v20 = vadd.f32 %v15817_v60, %v8358_v57 }
 0x475   :  { %v12358_v30 = vpop.f32.mrf.mxu1 }
 0x47a   :  { %v8432_v13 = vpop.f32.mrf.mxu0 }
 0x47b   :  { %v8436_v28 = vadd.f32 %v8432_v13, %v8362_v20  ;;  %v9347_v13 = vld [vmem:[%s15947_s8] ss:$0 sm:$0xff] }
 0x47c   :  { %v12385_v17 = vpop.f32.mrf.mxu0 }
 0x489   :  { %v8734_v29 = vpop.permute.xlu0 %8733 }
 0x48a   :  { %v8736_v36 = vmax.f32 %v15820_v19, %v8734_v29  ;;  %v9345_v19 = vld [vmem:[%s15946_s7 + $0x88] sm:$0xff] }
 0x48d   :  { %v8506_v4 = vpop.f32.mrf.mxu1  ;;  %v8738_v35 = vpop.permute.xlu0 %8737 }
 0x48e   :  { %v8510_v47 = vadd.f32 %v8506_v4, %v8436_v28  ;;  %v8740_v42 = vmax.f32 %v8736_v36, %v8738_v35 }
 0x48f   :  { %v12412_v33 = vpop.f32.mrf.mxu1 }
 0x490   :  { %v15888_v62 = vmax.f32 %v8510_v47, 0.0  ;;  %v8741_v45 = vmax.f32 %v8740_v42, %v15841_v50 }
 0x492   :  { %8772 = vrot.lane.b32.xlu1 %v15888_v62, %s12626_s18  ;;  %8768 = vrot.lane.b32.xlu0 %v15888_v62, %s12625_s17 }
 0x494   :  { %v8578_v34 = vpop.f32.mrf.mxu0 }
 0x495   :  { %v8582_v18 = vadd.f32 %v15817_v60, %v8578_v34 }
 0x496   :  { %v12439_v40 = vpop.f32.mrf.mxu0 }
 0x4a7   :  { %v8652_v44 = vpop.f32.mrf.mxu1 }
 0x4a8   :  { %v8656_v27 = vadd.f32 %v8652_v44, %v8582_v18 }
 0x4a9   :  { %v12466_v16 = vpop.f32.mrf.mxu1 }
 0x4b6   :  { %v8726_v51 = vpop.f32.mrf.mxu0  ;;  %v8744_v3 = vpop.permute.xlu1 %8743 }
 0x4b7   :  { %v8730_v21 = vadd.f32 %v8726_v51, %v8656_v27  ;;  %v8746_v32 = vmax.f32 %v8741_v45, %v8744_v3  ;;  %v8761_v14 = vmax.f32 %v15841_v50, %v8744_v3 }
 0x4b8   :  { %v12493_v15 = vpop.f32.mrf.mxu0 }
 0x4b9   :  { %v8731_v26 = vmax.f32 %v8730_v21, 0.0 }
 0x4ba   :  { %v8748_v10 = vpop.permute.xlu1 %8747 }
 0x4bb   :  { %8787 = vrot.lane.b32.xlu1 %v8731_v26, %s12626_s18  ;;  %8783 = vrot.lane.b32.xlu0 %v8731_v26, %s12625_s17  ;;  %v8750_v60 = vmax.f32 %v8746_v32, %v8748_v10  ;;  %v8762_v48 = vmax.f32 %v8761_v14, %v8748_v10 }
 0x4bd   :  { %v8751_v9 = vmax.f32 %v8750_v60, %v15873_v55  ;;  %v8763_v52 = vmax.f32 %v8762_v48, %v15873_v55 }
 0x4d7   :  { %v8754_v54 = vpop.permute.xlu0 %8753  ;;  %v8758_v11 = vpop.permute.xlu1 %8757 }
 0x4d8   :  { %v8756_v12 = vmax.f32 %v8751_v9, %v8754_v54  ;;  %v8776_v7 = vmax.f32 %v15873_v55, %v8754_v54  ;;  %v8764_v46 = vmax.f32 %v8763_v52, %v8754_v54 }
 0x4da   :  { %v8760_v25 = vmax.f32 %v8756_v12, %v8758_v11  ;;  %v8777_v41 = vmax.f32 %v8776_v7, %v8758_v11  ;;  %v8765_v58 = vmax.f32 %v8764_v46, %v8758_v11 }
 0x4dc   :  { %12507 = vmatmul.mubr.msk.f32.vlgmr.msra.gmra.mxu1 %vm8812_vm5, %v8760_v25  ;;  %v8766_v8 = vmax.f32 %v8765_v58, %v15888_v62  ;;  %v8778_v59 = vmax.f32 %v8777_v41, %v15888_v62 }
 0x4dd   :  { %12525 = vmatpush3.msra.mxu1 %v9345_v19  ;;  %12536 = vmatprep.mubr.msk.f32.mxu1 %vm12624_vm2, %v12623_v2 }
 0x4de   :  { %12526 = vmatprep.subr.mxu1 %v12623_v2 }
 0x4df   :  { %12527 = vmatpush3.msra.mxu1 %v9344_v31 }
 0x4e0   :  { %12528 = vmatprep.subr.mxu1 %v12623_v2 }
 0x4e1   :  { %12529 = vmatpush3.msra.mxu1 %v9343_v37 }
 0x4e2   :  { %12530 = vmatprep.subr.mxu1 %v12623_v2 }
 0x4e3   :  { %12531 = vmatpush3.msra.mxu1 %v9342_v43 }
 0x4e4   :  { %12532 = vmatprep.subr.mxu1 %v12623_v2 }
 0x4e5   :  { %12533 = vmatpush3.msra.mxu1 %v9341_v5 }
 0x4e6   :  { %12534 = vmatprep.subr.mxu1 %v12623_v2 }
 0x4e7   :  { %12535 = vmatpush3.msra.mxu1 %v9340_v24 }
 0x504   :  { %v8769_v38 = vpop.permute.xlu0 %8768  ;;  %v8773_v39 = vpop.permute.xlu1 %8772 }
 0x505   :  { %v8771_v22 = vmax.f32 %v8766_v8, %v8769_v38  ;;  %v8779_v23 = vmax.f32 %v8778_v59, %v8769_v38 }
 0x507   :  { %v8775_v6 = vmax.f32 %v8771_v22, %v8773_v39  ;;  %v8780_v2 = vmax.f32 %v8779_v23, %v8773_v39 }
 0x509   :  { %12522 = vmatmul.mubr.msk.f32.vlgmr.msra.gmra.mxu0 %vm8812_vm5, %v8775_v6  ;;  %v8781_v1 = vmax.f32 %v8780_v2, %v8731_v26 }
 0x52d   :  { %v8784_v49 = vpop.permute.xlu0 %8783  ;;  %v8788_v63 = vpop.permute.xlu1 %8787 }
 0x52e   :  { %v8786_v50 = vmax.f32 %v8781_v1, %v8784_v49 }
 0x530   :  { %v8790_v53 = vmax.f32 %v8786_v50, %v8788_v63 }
 0x532   :  { %12537 = vmatmul.mubr.msk.f32.vlgmr.msra.gmra.mxu1 %vm8812_vm5, %v8790_v53 }
 0x59c   :  { %v8882_v0 = vpop.f32.mrf.mxu1 }
 0x59d   :  { %v8892_v17 = vadd.f32 %v9347_v13, %v8882_v0 }
 0x59e   :  { %v12508_v55 = vpop.f32.mrf.mxu1 }
 0x5c9   :  { %v8962_v57 = vpop.f32.mrf.mxu0 }
 0x5ca   :  { %v8966_v56 = vadd.f32 %v8962_v57, %v8892_v17 }
 0x5cb   :  { %v12523_v30 = vpop.f32.mrf.mxu0 }
 0x5f2   :  { %v9036_v61 = vpop.f32.mrf.mxu1 }
 0x5f3   :  { %v9040_v20 = vadd.f32 %v9036_v61, %v8966_v56 }
 0x5f4   :  { %v12538_v28 = vpop.f32.mrf.mxu1 }
 0x5f5   :  { %v9041_v4 = vsub.f32 0.0, %v9040_v20 }
 0x5f7   :  { %v9042_v47 = vmul.f32 1.442695, %v9041_v4 }
 0x5f9   :  { %12544 = vpow2.f32 %v9042_v47 }
 0x606   :  { %v12545_v33 = vpop.eup %12544 }
 0x607   :  { %v9044_v62 = vadd.f32 1.0, %v12545_v33 }
 0x609   :  { %12546 = vrcp.f32 %v9044_v62 }
 0x616   :  { %v12547_v34 = vpop.eup %12546 }
 0x617   :  { %9048 = vst.msk [vmem:[#allocation2] sm:$0x3] %vm9047_vm6, %v12547_v34 }
 0x618   :  { %12612 = shalt.err (!%p12609_p4)
}
 0x619   :  { %9058 = dma.vmem_to_hbm [thread:$0]  %s9056_s4, 32, %s15948_s9, [#allocation3]  }
 0x61a   :  { %12621 = dma.done.wait [#allocation3], 32  }
 0x61b   :  { %12622 = vsyncadd [#allocation3], 4294967264 }
 0x61c   :  { %9062 = vsyncpa [#allocation3], 1 }

</bundles_post_ra>
